<compile_context>
chip_gen: v7x
topology: tpu7x:2x2x1
jax: 0.10.0
libtpu: 0.0.40
codegen_flags: <defaults>
</compile_context>

<pallas_src>
import math
import numpy as np
import jax
import jax.numpy as jnp
from jax.experimental import pallas as pl
from jax.experimental.pallas import tpu as pltpu

LANES = 128            # lane width: every layer dim here (<=128) fits one lane tile
SLOT_ROWS = LANES + 8  # per-layer slot in wmain: 128 weight rows + 8-row bias block


def _round_up(n, m):
    return (n + m - 1) // m * m


# ------------------------------ raw parameters --------------------------------
def _init_linear(key, fan_in, fan_out):
    """PyTorch-default-style uniform(-1/sqrt(fan_in), ...) init, (in,out) layout."""
    kw, kb = jax.random.split(key)
    bound = 1.0 / math.sqrt(fan_in)
    w = jax.random.uniform(kw, (fan_in, fan_out), jnp.float32, -bound, bound)
    b = jax.random.uniform(kb, (1, fan_out), jnp.float32, -bound, bound)
    return w, b


def make_params(key, state_dim, action_dim, h_dim, t_dim):
    """28 (W, b) pairs in the module's layer order (same as the PyTorch spec)."""
    dims = []
    dims.append((action_dim, h_dim))            # 0  action_mlp
    dims.append((t_dim, t_dim))                 # 1  time_mlp linear
    dims.append((state_dim, state_dim))         # 2  state_mlp

    def easy(dim):
        return [(dim, dim), (t_dim, dim), (state_dim, dim), (dim, dim)]

    dims += easy(h_dim)                         # 3..6   down_1
    dims.append((h_dim, h_dim // 2))            # 7      down_2
    dims += easy(h_dim // 2)                    # 8..11  down_3
    dims.append((h_dim // 2, h_dim // 4))       # 12     down_4
    dims += easy(h_dim // 4)                    # 13..16 mid_block
    dims += easy(h_dim // 4)                    # 17..20 up_1
    dims.append((h_dim // 4, h_dim // 2))       # 21     up_2
    dims += easy(h_dim // 2)                    # 22..25 up_3
    dims.append((h_dim // 2, h_dim))            # 26     up_4
    dims.append((h_dim, action_dim))            # 27     final_layer

    keys = jax.random.split(key, len(dims))
    flat = []
    for k, (fi, fo) in zip(keys, dims):
        w, b = _init_linear(k, fi, fo)
        flat += [w, b]
    return flat


# ------------------------------ parameter packing ------------------------------
def pack_params(raw, state_dim, action_dim, h_dim, t_dim):
    """Pack 28 (W,b) pairs into two uniform-128-lane VMEM buffers.

    wmain: (18*SLOT_ROWS, 128).  Layer i occupies rows [i*SLOT_ROWS, i*SLOT_ROWS+128)
           (zero-padded 128x128 weight tile) with its bias in row i*SLOT_ROWS+128.
    wts:   (256, 5*128).  Rows [0,128) = stacked EasyBlock time_mlp weights,
           rows [128,256) = stacked state_mlp weights; one 128-lane slot per block.
           Their biases are pre-summed into each block_1 bias (zero runtime cost).
    """
    def W(i):
        return np.asarray(raw[2 * i], np.float32)

    def Bv(i):
        return np.asarray(raw[2 * i + 1], np.float32).reshape(-1)

    assert max(state_dim, action_dim, h_dim, t_dim) <= LANES, "dims must fit one lane tile"

    # (original block_1 index, block width) for the 5 EasyBlocks, in forward order.
    easy = [(3, h_dim), (8, h_dim // 2), (13, h_dim // 4),
            (17, h_dim // 4), (22, h_dim // 2)]

    wts = np.zeros((2 * LANES, len(easy) * LANES), np.float32)
    for slot, (base, dim) in enumerate(easy):
        c0 = slot * LANES
        wts[:t_dim, c0:c0 + dim] = W(base + 1)                       # time_mlp weight
        wts[LANES:LANES + state_dim, c0:c0 + dim] = W(base + 2)      # state_mlp weight

    # kernel-order layer map: (orig index, extra orig indices whose bias is summed in)
    main_map = [(0, ()), (1, ()), (2, ()),
                (3, (4, 5)), (6, ()), (7, ()),
                (8, (9, 10)), (11, ()), (12, ()),
                (13, (14, 15)), (16, ()),
                (17, (18, 19)), (20, ()), (21, ()),
                (22, (23, 24)), (25, ()), (26, ()),
                (27, ())]
    n_layers = len(main_map)
    wmain = np.zeros((n_layers * SLOT_ROWS, LANES), np.float32)
    for li, (orig, extra) in enumerate(main_map):
        w = W(orig)
        kin, nout = w.shape
        r0 = li * SLOT_ROWS
        wmain[r0:r0 + kin, :nout] = w
        b = Bv(orig).copy()
        for e in extra:
            b += Bv(e)
        wmain[r0 + LANES, :nout] = b

    return jnp.asarray(wmain), jnp.asarray(wts)


# ----------------------------- Pallas kernel ----------------------------------
def _make_kernel():
    def kernel(x_ref, t_ref, s_ref, wmain_ref, wts_ref, out_ref):
        def lin(i, v):
            r0 = i * SLOT_ROWS                      # static python ints -> free slices
            w = wmain_ref[r0:r0 + LANES, :]         # full 128x128 tile, 8/128-aligned
            b = wmain_ref[r0 + LANES:r0 + LANES + 1, :]
            return jnp.dot(v, w, preferred_element_type=jnp.float32) + b

        def mish(v):
            # mish(v) = v * tanh(softplus(v)) = v * (1 - 2 / ((1 + e^v)^2 + 1))
            n = jnp.exp(jnp.minimum(v, 20.0))       # clamp: avoid f32 overflow
            y = 1.0 + n
            return jnp.where(v > 20.0, v, v * (1.0 - 2.0 / (y * y + 1.0)))

        x = mish(lin(0, x_ref[...]))                # action_mlp
        t = mish(lin(1, t_ref[...]))                # time_mlp (post sinusoidal emb)
        s = mish(lin(2, s_ref[...]))                # state_mlp

        # fused time/state projections for all 5 EasyBlocks: 2 wide, fully aligned matmuls
        # TODO(synk): fold into a single K=256 dot (concat t|s along lanes) if profitable.
        ts = (jnp.dot(t, wts_ref[0:LANES, :], preferred_element_type=jnp.float32)
              + jnp.dot(s, wts_ref[LANES:2 * LANES, :],
                        preferred_element_type=jnp.float32))

        def easy(slot, i_b1, i_b2, v):
            c0 = slot * LANES                       # whole-vreg, lane-aligned slice of ts
            h = lin(i_b1, v) + ts[:, c0:c0 + LANES]
            return mish(lin(i_b2, mish(h)))

        x = easy(0, 3, 4, x)                        # down_1
        x = mish(lin(5, x))                         # down_2
        x = easy(1, 6, 7, x)                        # down_3
        x = mish(lin(8, x))                         # down_4
        x = easy(2, 9, 10, x)                       # mid_block
        x = easy(3, 11, 12, x)                      # up_1
        x = mish(lin(13, x))                        # up_2
        x = easy(4, 14, 15, x)                      # up_3
        x = mish(lin(16, x))                        # up_4
        out_ref[...] = lin(17, x)                   # final_layer (lane-dense 128-wide write)

    return kernel


# ------------------------------ wrapper ----------------------------------------
def sinusoidal_pos_emb(time, t_dim):
    """SinusoidalPosEmb: time (B,) -> (B, t_dim).  Parameter-free glue (plain JAX)."""
    half = t_dim // 2
    scale = math.log(10000.0) / (half - 1)
    freqs = jnp.exp(jnp.arange(half, dtype=jnp.float32) * -scale)
    args = time[:, None].astype(jnp.float32) * freqs[None, :]
    return jnp.concatenate([jnp.sin(args), jnp.cos(args)], axis=-1)


def mlp_unet_forward(x, time, state, wmain, wts, *, t_dim, action_dim, block_b=None):
    B = x.shape[0]
    t_emb = sinusoidal_pos_emb(time, t_dim)

    # Batch tiling: pad B up to a multiple of the batch block, tile it on a grid axis.
    if block_b is None:
        block_b = min(128, _round_up(max(B, 8), 8))
    block_b = max(8, _round_up(block_b, 8))
    b_pad = _round_up(max(B, block_b), block_b)
    nb = b_pad // block_b

    def pad(a):
        a = a.astype(jnp.float32)
        return jnp.pad(a, ((0, b_pad - B), (0, LANES - a.shape[1])))

    xp, tp, sp = pad(x), pad(t_emb), pad(state)

    act_spec = pl.BlockSpec((block_b, LANES), lambda i: (i, 0))
    # Constant index maps -> weights DMA'd once, VMEM-resident across all batch blocks.
    wmain_spec = pl.BlockSpec(wmain.shape, lambda i: (0, 0))
    wts_spec = pl.BlockSpec(wts.shape, lambda i: (0, 0))

    out = pl.pallas_call(
        _make_kernel(),
        out_shape=jax.ShapeDtypeStruct((b_pad, LANES), jnp.float32),
        grid=(nb,),
        in_specs=[act_spec, act_spec, act_spec, wmain_spec, wts_spec],
        out_specs=act_spec,
        compiler_params=pltpu.CompilerParams(dimension_semantics=("parallel",)),
    )(xp, tp, sp, wmain, wts)
    return out[:B, :action_dim]


# ------------------------- pure-JAX reference (check) ---------------------------
def _ref_forward(x, time, state, params, *, t_dim):
    def lin(i, v):
        return v @ params[2 * i] + params[2 * i + 1]

    def mish(v):
        return v * jnp.tanh(jax.nn.softplus(v))

    def easy(idx, v, t, s):
        h = lin(idx, v) + lin(idx + 1, t) + lin(idx + 2, s)
        return mish(lin(idx + 3, mish(h)))

    t = sinusoidal_pos_emb(time, t_dim)
    x = mish(lin(0, x)); t = mish(lin(1, t)); s = mish(lin(2, state))
    x = easy(3, x, t, s); x = mish(lin(7, x)); x = easy(8, x, t, s)
    x = mish(lin(12, x)); x = easy(13, x, t, s); x = easy(17, x, t, s)
    x = mish(lin(21, x)); x = easy(22, x, t, s); x = mish(lin(26, x))
    return lin(27, x)


# --------------------------------- main -----------------------------------------
if __name__ == "__main__":
    # small shapes consistent with the forward pass (block_b=8 -> a 2-step batch grid,
    # exercising the VMEM-resident-weights + parallel-batch-axis path)
    B, state_dim, action_dim, h_dim, t_dim = 16, 11, 6, 64, 16

    key = jax.random.PRNGKey(0)
    k_p, k_x, k_t, k_s = jax.random.split(key, 4)

    raw_params = make_params(k_p, state_dim, action_dim, h_dim, t_dim)
    wmain, wts = pack_params(raw_params, state_dim, action_dim, h_dim, t_dim)

    x = jax.random.normal(k_x, (B, action_dim), jnp.float32)
    time = jax.random.uniform(k_t, (B,), jnp.float32, 0.0, 100.0)
    state = jax.random.normal(k_s, (B, state_dim), jnp.float32)

    out = mlp_unet_forward(x, time, state, wmain, wts,
                           t_dim=t_dim, action_dim=action_dim, block_b=8)
    out = jax.block_until_ready(out)

    ref = _ref_forward(x, time, state, raw_params, t_dim=t_dim)
    assert out.shape == (B, action_dim)
    assert jnp.allclose(out, ref, atol=1e-3, rtol=1e-3), float(jnp.max(jnp.abs(out - ref)))

    print("KERNEL_OK")
</pallas_src>

<mosaic_0001>
module attributes {stable_mosaic.version = 11 : i64} {
  func.func @kernel(%arg0: i32, %arg1: memref<8x128xf32, #tpu.memory_space<vmem>>, %arg2: memref<8x128xf32, #tpu.memory_space<vmem>>, %arg3: memref<8x128xf32, #tpu.memory_space<vmem>>, %arg4: memref<2448x128xf32, #tpu.memory_space<vmem>>, %arg5: memref<256x640xf32, #tpu.memory_space<vmem>>, %arg6: memref<8x128xf32, #tpu.memory_space<vmem>>) attributes {dimension_semantics = [#tpu.dimension_semantics<parallel>], iteration_bounds = array<i64: 2>, scalar_prefetch = 0 : i64, scratch_operands = 0 : i64, tpu.core_type = #tpu.core_type<tc>, window_params = [{transform_indices = @transform_0, window_bounds = array<i64: 8, 128>}, {transform_indices = @transform_1, window_bounds = array<i64: 8, 128>}, {transform_indices = @transform_2, window_bounds = array<i64: 8, 128>}, {pipeline_mode = #tpu.pipeline_mode<synchronous>, transform_indices = @transform_3, window_bounds = array<i64: 2448, 128>}, {pipeline_mode = #tpu.pipeline_mode<synchronous>, transform_indices = @transform_4, window_bounds = array<i64: 256, 640>}, {transform_indices = @transform_5, window_bounds = array<i64: 8, 128>}]} {
    %c0 = arith.constant 0 : index
    %c0_0 = arith.constant 0 : index
    %0 = vector.load %arg1[%c0, %c0_0] : memref<8x128xf32, #tpu.memory_space<vmem>>, vector<8x128xf32>
    %c0_1 = arith.constant 0 : index
    %c0_2 = arith.constant 0 : index
    %1 = vector.load %arg4[%c0_1, %c0_2] : memref<2448x128xf32, #tpu.memory_space<vmem>>, vector<128x128xf32>
    %c128 = arith.constant 128 : index
    %c0_3 = arith.constant 0 : index
    %2 = vector.load %arg4[%c128, %c0_3] : memref<2448x128xf32, #tpu.memory_space<vmem>>, vector<1x128xf32>
    %cst = arith.constant dense<0.000000e+00> : vector<8x128xf32>
    %3 = tpu.matmul %0, %1, %cst {dimension_numbers = #tpu.dot_dimension_numbers<[1], [0], [0], [1], [0, 0, 1, 1], [], []>} : vector<8x128xf32>, vector<128x128xf32>, vector<8x128xf32> -> vector<8x128xf32>
    %4 = vector.broadcast %2 : vector<1x128xf32> to vector<8x128xf32>
    %5 = arith.addf %3, %4 : vector<8x128xf32>
    %cst_4 = arith.constant 2.000000e+01 : f32
    %6 = vector.broadcast %cst_4 : f32 to vector<8x128xf32>
    %7 = arith.minimumf %5, %6 : vector<8x128xf32>
    %8 = math.exp %7 : vector<8x128xf32>
    %cst_5 = arith.constant 1.000000e+00 : f32
    %9 = vector.broadcast %cst_5 : f32 to vector<8x128xf32>
    %10 = arith.addf %9, %8 : vector<8x128xf32>
    %cst_6 = arith.constant 2.000000e+01 : f32
    %11 = vector.broadcast %cst_6 : f32 to vector<8x128xf32>
    %12 = arith.cmpf ogt, %5, %11 : vector<8x128xf32>
    %13 = arith.mulf %10, %10 : vector<8x128xf32>
    %cst_7 = arith.constant 1.000000e+00 : f32
    %14 = vector.broadcast %cst_7 : f32 to vector<8x128xf32>
    %15 = arith.addf %13, %14 : vector<8x128xf32>
    %cst_8 = arith.constant 2.000000e+00 : f32
    %16 = vector.broadcast %cst_8 : f32 to vector<8x128xf32>
    %17 = arith.divf %16, %15 : vector<8x128xf32>
    %cst_9 = arith.constant 1.000000e+00 : f32
    %18 = vector.broadcast %cst_9 : f32 to vector<8x128xf32>
    %19 = arith.subf %18, %17 : vector<8x128xf32>
    %20 = arith.mulf %5, %19 : vector<8x128xf32>
    %21 = arith.select %12, %5, %20 : vector<8x128xi1>, vector<8x128xf32>
    %c0_10 = arith.constant 0 : index
    %c0_11 = arith.constant 0 : index
    %22 = vector.load %arg2[%c0_10, %c0_11] : memref<8x128xf32, #tpu.memory_space<vmem>>, vector<8x128xf32>
    %c136 = arith.constant 136 : index
    %c0_12 = arith.constant 0 : index
    %23 = vector.load %arg4[%c136, %c0_12] : memref<2448x128xf32, #tpu.memory_space<vmem>>, vector<128x128xf32>
    %c264 = arith.constant 264 : index
    %c0_13 = arith.constant 0 : index
    %24 = vector.load %arg4[%c264, %c0_13] : memref<2448x128xf32, #tpu.memory_space<vmem>>, vector<1x128xf32>
    %cst_14 = arith.constant dense<0.000000e+00> : vector<8x128xf32>
    %25 = tpu.matmul %22, %23, %cst_14 {dimension_numbers = #tpu.dot_dimension_numbers<[1], [0], [0], [1], [0, 0, 1, 1], [], []>} : vector<8x128xf32>, vector<128x128xf32>, vector<8x128xf32> -> vector<8x128xf32>
    %26 = vector.broadcast %24 : vector<1x128xf32> to vector<8x128xf32>
    %27 = arith.addf %25, %26 : vector<8x128xf32>
    %cst_15 = arith.constant 2.000000e+01 : f32
    %28 = vector.broadcast %cst_15 : f32 to vector<8x128xf32>
    %29 = arith.minimumf %27, %28 : vector<8x128xf32>
    %30 = math.exp %29 : vector<8x128xf32>
    %cst_16 = arith.constant 1.000000e+00 : f32
    %31 = vector.broadcast %cst_16 : f32 to vector<8x128xf32>
    %32 = arith.addf %31, %30 : vector<8x128xf32>
    %cst_17 = arith.constant 2.000000e+01 : f32
    %33 = vector.broadcast %cst_17 : f32 to vector<8x128xf32>
    %34 = arith.cmpf ogt, %27, %33 : vector<8x128xf32>
    %35 = arith.mulf %32, %32 : vector<8x128xf32>
    %cst_18 = arith.constant 1.000000e+00 : f32
    %36 = vector.broadcast %cst_18 : f32 to vector<8x128xf32>
    %37 = arith.addf %35, %36 : vector<8x128xf32>
    %cst_19 = arith.constant 2.000000e+00 : f32
    %38 = vector.broadcast %cst_19 : f32 to vector<8x128xf32>
    %39 = arith.divf %38, %37 : vector<8x128xf32>
    %cst_20 = arith.constant 1.000000e+00 : f32
    %40 = vector.broadcast %cst_20 : f32 to vector<8x128xf32>
    %41 = arith.subf %40, %39 : vector<8x128xf32>
    %42 = arith.mulf %27, %41 : vector<8x128xf32>
    %43 = arith.select %34, %27, %42 : vector<8x128xi1>, vector<8x128xf32>
    %c0_21 = arith.constant 0 : index
    %c0_22 = arith.constant 0 : index
    %44 = vector.load %arg3[%c0_21, %c0_22] : memref<8x128xf32, #tpu.memory_space<vmem>>, vector<8x128xf32>
    %c272 = arith.constant 272 : index
    %c0_23 = arith.constant 0 : index
    %45 = vector.load %arg4[%c272, %c0_23] : memref<2448x128xf32, #tpu.memory_space<vmem>>, vector<128x128xf32>
    %c400 = arith.constant 400 : index
    %c0_24 = arith.constant 0 : index
    %46 = vector.load %arg4[%c400, %c0_24] : memref<2448x128xf32, #tpu.memory_space<vmem>>, vector<1x128xf32>
    %cst_25 = arith.constant dense<0.000000e+00> : vector<8x128xf32>
    %47 = tpu.matmul %44, %45, %cst_25 {dimension_numbers = #tpu.dot_dimension_numbers<[1], [0], [0], [1], [0, 0, 1, 1], [], []>} : vector<8x128xf32>, vector<128x128xf32>, vector<8x128xf32> -> vector<8x128xf32>
    %48 = vector.broadcast %46 : vector<1x128xf32> to vector<8x128xf32>
    %49 = arith.addf %47, %48 : vector<8x128xf32>
    %cst_26 = arith.constant 2.000000e+01 : f32
    %50 = vector.broadcast %cst_26 : f32 to vector<8x128xf32>
    %51 = arith.minimumf %49, %50 : vector<8x128xf32>
    %52 = math.exp %51 : vector<8x128xf32>
    %cst_27 = arith.constant 1.000000e+00 : f32
    %53 = vector.broadcast %cst_27 : f32 to vector<8x128xf32>
    %54 = arith.addf %53, %52 : vector<8x128xf32>
    %cst_28 = arith.constant 2.000000e+01 : f32
    %55 = vector.broadcast %cst_28 : f32 to vector<8x128xf32>
    %56 = arith.cmpf ogt, %49, %55 : vector<8x128xf32>
    %57 = arith.mulf %54, %54 : vector<8x128xf32>
    %cst_29 = arith.constant 1.000000e+00 : f32
    %58 = vector.broadcast %cst_29 : f32 to vector<8x128xf32>
    %59 = arith.addf %57, %58 : vector<8x128xf32>
    %cst_30 = arith.constant 2.000000e+00 : f32
    %60 = vector.broadcast %cst_30 : f32 to vector<8x128xf32>
    %61 = arith.divf %60, %59 : vector<8x128xf32>
    %cst_31 = arith.constant 1.000000e+00 : f32
    %62 = vector.broadcast %cst_31 : f32 to vector<8x128xf32>
    %63 = arith.subf %62, %61 : vector<8x128xf32>
    %64 = arith.mulf %49, %63 : vector<8x128xf32>
    %65 = arith.select %56, %49, %64 : vector<8x128xi1>, vector<8x128xf32>
    %c0_32 = arith.constant 0 : index
    %c0_33 = arith.constant 0 : index
    %66 = vector.load %arg5[%c0_32, %c0_33] : memref<256x640xf32, #tpu.memory_space<vmem>>, vector<128x640xf32>
    %cst_34 = arith.constant dense<0.000000e+00> : vector<8x640xf32>
    %67 = tpu.matmul %43, %66, %cst_34 {dimension_numbers = #tpu.dot_dimension_numbers<[1], [0], [0], [1], [0, 0, 1, 1], [], []>} : vector<8x128xf32>, vector<128x640xf32>, vector<8x640xf32> -> vector<8x640xf32>
    %c128_35 = arith.constant 128 : index
    %c0_36 = arith.constant 0 : index
    %68 = vector.load %arg5[%c128_35, %c0_36] : memref<256x640xf32, #tpu.memory_space<vmem>>, vector<128x640xf32>
    %cst_37 = arith.constant dense<0.000000e+00> : vector<8x640xf32>
    %69 = tpu.matmul %65, %68, %cst_37 {dimension_numbers = #tpu.dot_dimension_numbers<[1], [0], [0], [1], [0, 0, 1, 1], [], []>} : vector<8x128xf32>, vector<128x640xf32>, vector<8x640xf32> -> vector<8x640xf32>
    %70 = arith.addf %67, %69 : vector<8x640xf32>
    %c408 = arith.constant 408 : index
    %c0_38 = arith.constant 0 : index
    %71 = vector.load %arg4[%c408, %c0_38] : memref<2448x128xf32, #tpu.memory_space<vmem>>, vector<128x128xf32>
    %c536 = arith.constant 536 : index
    %c0_39 = arith.constant 0 : index
    %72 = vector.load %arg4[%c536, %c0_39] : memref<2448x128xf32, #tpu.memory_space<vmem>>, vector<1x128xf32>
    %cst_40 = arith.constant dense<0.000000e+00> : vector<8x128xf32>
    %73 = tpu.matmul %21, %71, %cst_40 {dimension_numbers = #tpu.dot_dimension_numbers<[1], [0], [0], [1], [0, 0, 1, 1], [], []>} : vector<8x128xf32>, vector<128x128xf32>, vector<8x128xf32> -> vector<8x128xf32>
    %74 = vector.broadcast %72 : vector<1x128xf32> to vector<8x128xf32>
    %75 = arith.addf %73, %74 : vector<8x128xf32>
    %76 = vector.extract_strided_slice %70 {offsets = [0, 0], sizes = [8, 128], strides = [1, 1]} : vector<8x640xf32> to vector<8x128xf32>
    %77 = arith.addf %75, %76 : vector<8x128xf32>
    %cst_41 = arith.constant 2.000000e+01 : f32
    %78 = vector.broadcast %cst_41 : f32 to vector<8x128xf32>
    %79 = arith.minimumf %77, %78 : vector<8x128xf32>
    %80 = math.exp %79 : vector<8x128xf32>
    %cst_42 = arith.constant 1.000000e+00 : f32
    %81 = vector.broadcast %cst_42 : f32 to vector<8x128xf32>
    %82 = arith.addf %81, %80 : vector<8x128xf32>
    %cst_43 = arith.constant 2.000000e+01 : f32
    %83 = vector.broadcast %cst_43 : f32 to vector<8x128xf32>
    %84 = arith.cmpf ogt, %77, %83 : vector<8x128xf32>
    %85 = arith.mulf %82, %82 : vector<8x128xf32>
    %cst_44 = arith.constant 1.000000e+00 : f32
    %86 = vector.broadcast %cst_44 : f32 to vector<8x128xf32>
    %87 = arith.addf %85, %86 : vector<8x128xf32>
    %cst_45 = arith.constant 2.000000e+00 : f32
    %88 = vector.broadcast %cst_45 : f32 to vector<8x128xf32>
    %89 = arith.divf %88, %87 : vector<8x128xf32>
    %cst_46 = arith.constant 1.000000e+00 : f32
    %90 = vector.broadcast %cst_46 : f32 to vector<8x128xf32>
    %91 = arith.subf %90, %89 : vector<8x128xf32>
    %92 = arith.mulf %77, %91 : vector<8x128xf32>
    %93 = arith.select %84, %77, %92 : vector<8x128xi1>, vector<8x128xf32>
    %c544 = arith.constant 544 : index
    %c0_47 = arith.constant 0 : index
    %94 = vector.load %arg4[%c544, %c0_47] : memref<2448x128xf32, #tpu.memory_space<vmem>>, vector<128x128xf32>
    %c672 = arith.constant 672 : index
    %c0_48 = arith.constant 0 : index
    %95 = vector.load %arg4[%c672, %c0_48] : memref<2448x128xf32, #tpu.memory_space<vmem>>, vector<1x128xf32>
    %cst_49 = arith.constant dense<0.000000e+00> : vector<8x128xf32>
    %96 = tpu.matmul %93, %94, %cst_49 {dimension_numbers = #tpu.dot_dimension_numbers<[1], [0], [0], [1], [0, 0, 1, 1], [], []>} : vector<8x128xf32>, vector<128x128xf32>, vector<8x128xf32> -> vector<8x128xf32>
    %97 = vector.broadcast %95 : vector<1x128xf32> to vector<8x128xf32>
    %98 = arith.addf %96, %97 : vector<8x128xf32>
    %cst_50 = arith.constant 2.000000e+01 : f32
    %99 = vector.broadcast %cst_50 : f32 to vector<8x128xf32>
    %100 = arith.minimumf %98, %99 : vector<8x128xf32>
    %101 = math.exp %100 : vector<8x128xf32>
    %cst_51 = arith.constant 1.000000e+00 : f32
    %102 = vector.broadcast %cst_51 : f32 to vector<8x128xf32>
    %103 = arith.addf %102, %101 : vector<8x128xf32>
    %cst_52 = arith.constant 2.000000e+01 : f32
    %104 = vector.broadcast %cst_52 : f32 to vector<8x128xf32>
    %105 = arith.cmpf ogt, %98, %104 : vector<8x128xf32>
    %106 = arith.mulf %103, %103 : vector<8x128xf32>
    %cst_53 = arith.constant 1.000000e+00 : f32
    %107 = vector.broadcast %cst_53 : f32 to vector<8x128xf32>
    %108 = arith.addf %106, %107 : vector<8x128xf32>
    %cst_54 = arith.constant 2.000000e+00 : f32
    %109 = vector.broadcast %cst_54 : f32 to vector<8x128xf32>
    %110 = arith.divf %109, %108 : vector<8x128xf32>
    %cst_55 = arith.constant 1.000000e+00 : f32
    %111 = vector.broadcast %cst_55 : f32 to vector<8x128xf32>
    %112 = arith.subf %111, %110 : vector<8x128xf32>
    %113 = arith.mulf %98, %112 : vector<8x128xf32>
    %114 = arith.select %105, %98, %113 : vector<8x128xi1>, vector<8x128xf32>
    %c680 = arith.constant 680 : index
    %c0_56 = arith.constant 0 : index
    %115 = vector.load %arg4[%c680, %c0_56] : memref<2448x128xf32, #tpu.memory_space<vmem>>, vector<128x128xf32>
    %c808 = arith.constant 808 : index
    %c0_57 = arith.constant 0 : index
    %116 = vector.load %arg4[%c808, %c0_57] : memref<2448x128xf32, #tpu.memory_space<vmem>>, vector<1x128xf32>
    %cst_58 = arith.constant dense<0.000000e+00> : vector<8x128xf32>
    %117 = tpu.matmul %114, %115, %cst_58 {dimension_numbers = #tpu.dot_dimension_numbers<[1], [0], [0], [1], [0, 0, 1, 1], [], []>} : vector<8x128xf32>, vector<128x128xf32>, vector<8x128xf32> -> vector<8x128xf32>
    %118 = vector.broadcast %116 : vector<1x128xf32> to vector<8x128xf32>
    %119 = arith.addf %117, %118 : vector<8x128xf32>
    %cst_59 = arith.constant 2.000000e+01 : f32
    %120 = vector.broadcast %cst_59 : f32 to vector<8x128xf32>
    %121 = arith.minimumf %119, %120 : vector<8x128xf32>
    %122 = math.exp %121 : vector<8x128xf32>
    %cst_60 = arith.constant 1.000000e+00 : f32
    %123 = vector.broadcast %cst_60 : f32 to vector<8x128xf32>
    %124 = arith.addf %123, %122 : vector<8x128xf32>
    %cst_61 = arith.constant 2.000000e+01 : f32
    %125 = vector.broadcast %cst_61 : f32 to vector<8x128xf32>
    %126 = arith.cmpf ogt, %119, %125 : vector<8x128xf32>
    %127 = arith.mulf %124, %124 : vector<8x128xf32>
    %cst_62 = arith.constant 1.000000e+00 : f32
    %128 = vector.broadcast %cst_62 : f32 to vector<8x128xf32>
    %129 = arith.addf %127, %128 : vector<8x128xf32>
    %cst_63 = arith.constant 2.000000e+00 : f32
    %130 = vector.broadcast %cst_63 : f32 to vector<8x128xf32>
    %131 = arith.divf %130, %129 : vector<8x128xf32>
    %cst_64 = arith.constant 1.000000e+00 : f32
    %132 = vector.broadcast %cst_64 : f32 to vector<8x128xf32>
    %133 = arith.subf %132, %131 : vector<8x128xf32>
    %134 = arith.mulf %119, %133 : vector<8x128xf32>
    %135 = arith.select %126, %119, %134 : vector<8x128xi1>, vector<8x128xf32>
    %c816 = arith.constant 816 : index
    %c0_65 = arith.constant 0 : index
    %136 = vector.load %arg4[%c816, %c0_65] : memref<2448x128xf32, #tpu.memory_space<vmem>>, vector<128x128xf32>
    %c944 = arith.constant 944 : index
    %c0_66 = arith.constant 0 : index
    %137 = vector.load %arg4[%c944, %c0_66] : memref<2448x128xf32, #tpu.memory_space<vmem>>, vector<1x128xf32>
    %cst_67 = arith.constant dense<0.000000e+00> : vector<8x128xf32>
    %138 = tpu.matmul %135, %136, %cst_67 {dimension_numbers = #tpu.dot_dimension_numbers<[1], [0], [0], [1], [0, 0, 1, 1], [], []>} : vector<8x128xf32>, vector<128x128xf32>, vector<8x128xf32> -> vector<8x128xf32>
    %139 = vector.broadcast %137 : vector<1x128xf32> to vector<8x128xf32>
    %140 = arith.addf %138, %139 : vector<8x128xf32>
    %141 = vector.extract_strided_slice %70 {offsets = [0, 128], sizes = [8, 128], strides = [1, 1]} : vector<8x640xf32> to vector<8x128xf32>
    %142 = arith.addf %140, %141 : vector<8x128xf32>
    %cst_68 = arith.constant 2.000000e+01 : f32
    %143 = vector.broadcast %cst_68 : f32 to vector<8x128xf32>
    %144 = arith.minimumf %142, %143 : vector<8x128xf32>
    %145 = math.exp %144 : vector<8x128xf32>
    %cst_69 = arith.constant 1.000000e+00 : f32
    %146 = vector.broadcast %cst_69 : f32 to vector<8x128xf32>
    %147 = arith.addf %146, %145 : vector<8x128xf32>
    %cst_70 = arith.constant 2.000000e+01 : f32
    %148 = vector.broadcast %cst_70 : f32 to vector<8x128xf32>
    %149 = arith.cmpf ogt, %142, %148 : vector<8x128xf32>
    %150 = arith.mulf %147, %147 : vector<8x128xf32>
    %cst_71 = arith.constant 1.000000e+00 : f32
    %151 = vector.broadcast %cst_71 : f32 to vector<8x128xf32>
    %152 = arith.addf %150, %151 : vector<8x128xf32>
    %cst_72 = arith.constant 2.000000e+00 : f32
    %153 = vector.broadcast %cst_72 : f32 to vector<8x128xf32>
    %154 = arith.divf %153, %152 : vector<8x128xf32>
    %cst_73 = arith.constant 1.000000e+00 : f32
    %155 = vector.broadcast %cst_73 : f32 to vector<8x128xf32>
    %156 = arith.subf %155, %154 : vector<8x128xf32>
    %157 = arith.mulf %142, %156 : vector<8x128xf32>
    %158 = arith.select %149, %142, %157 : vector<8x128xi1>, vector<8x128xf32>
    %c952 = arith.constant 952 : index
    %c0_74 = arith.constant 0 : index
    %159 = vector.load %arg4[%c952, %c0_74] : memref<2448x128xf32, #tpu.memory_space<vmem>>, vector<128x128xf32>
    %c1080 = arith.constant 1080 : index
    %c0_75 = arith.constant 0 : index
    %160 = vector.load %arg4[%c1080, %c0_75] : memref<2448x128xf32, #tpu.memory_space<vmem>>, vector<1x128xf32>
    %cst_76 = arith.constant dense<0.000000e+00> : vector<8x128xf32>
    %161 = tpu.matmul %158, %159, %cst_76 {dimension_numbers = #tpu.dot_dimension_numbers<[1], [0], [0], [1], [0, 0, 1, 1], [], []>} : vector<8x128xf32>, vector<128x128xf32>, vector<8x128xf32> -> vector<8x128xf32>
    %162 = vector.broadcast %160 : vector<1x128xf32> to vector<8x128xf32>
    %163 = arith.addf %161, %162 : vector<8x128xf32>
    %cst_77 = arith.constant 2.000000e+01 : f32
    %164 = vector.broadcast %cst_77 : f32 to vector<8x128xf32>
    %165 = arith.minimumf %163, %164 : vector<8x128xf32>
    %166 = math.exp %165 : vector<8x128xf32>
    %cst_78 = arith.constant 1.000000e+00 : f32
    %167 = vector.broadcast %cst_78 : f32 to vector<8x128xf32>
    %168 = arith.addf %167, %166 : vector<8x128xf32>
    %cst_79 = arith.constant 2.000000e+01 : f32
    %169 = vector.broadcast %cst_79 : f32 to vector<8x128xf32>
    %170 = arith.cmpf ogt, %163, %169 : vector<8x128xf32>
    %171 = arith.mulf %168, %168 : vector<8x128xf32>
    %cst_80 = arith.constant 1.000000e+00 : f32
    %172 = vector.broadcast %cst_80 : f32 to vector<8x128xf32>
    %173 = arith.addf %171, %172 : vector<8x128xf32>
    %cst_81 = arith.constant 2.000000e+00 : f32
    %174 = vector.broadcast %cst_81 : f32 to vector<8x128xf32>
    %175 = arith.divf %174, %173 : vector<8x128xf32>
    %cst_82 = arith.constant 1.000000e+00 : f32
    %176 = vector.broadcast %cst_82 : f32 to vector<8x128xf32>
    %177 = arith.subf %176, %175 : vector<8x128xf32>
    %178 = arith.mulf %163, %177 : vector<8x128xf32>
    %179 = arith.select %170, %163, %178 : vector<8x128xi1>, vector<8x128xf32>
    %c1088 = arith.constant 1088 : index
    %c0_83 = arith.constant 0 : index
    %180 = vector.load %arg4[%c1088, %c0_83] : memref<2448x128xf32, #tpu.memory_space<vmem>>, vector<128x128xf32>
    %c1216 = arith.constant 1216 : index
    %c0_84 = arith.constant 0 : index
    %181 = vector.load %arg4[%c1216, %c0_84] : memref<2448x128xf32, #tpu.memory_space<vmem>>, vector<1x128xf32>
    %cst_85 = arith.constant dense<0.000000e+00> : vector<8x128xf32>
    %182 = tpu.matmul %179, %180, %cst_85 {dimension_numbers = #tpu.dot_dimension_numbers<[1], [0], [0], [1], [0, 0, 1, 1], [], []>} : vector<8x128xf32>, vector<128x128xf32>, vector<8x128xf32> -> vector<8x128xf32>
    %183 = vector.broadcast %181 : vector<1x128xf32> to vector<8x128xf32>
    %184 = arith.addf %182, %183 : vector<8x128xf32>
    %cst_86 = arith.constant 2.000000e+01 : f32
    %185 = vector.broadcast %cst_86 : f32 to vector<8x128xf32>
    %186 = arith.minimumf %184, %185 : vector<8x128xf32>
    %187 = math.exp %186 : vector<8x128xf32>
    %cst_87 = arith.constant 1.000000e+00 : f32
    %188 = vector.broadcast %cst_87 : f32 to vector<8x128xf32>
    %189 = arith.addf %188, %187 : vector<8x128xf32>
    %cst_88 = arith.constant 2.000000e+01 : f32
    %190 = vector.broadcast %cst_88 : f32 to vector<8x128xf32>
    %191 = arith.cmpf ogt, %184, %190 : vector<8x128xf32>
    %192 = arith.mulf %189, %189 : vector<8x128xf32>
    %cst_89 = arith.constant 1.000000e+00 : f32
    %193 = vector.broadcast %cst_89 : f32 to vector<8x128xf32>
    %194 = arith.addf %192, %193 : vector<8x128xf32>
    %cst_90 = arith.constant 2.000000e+00 : f32
    %195 = vector.broadcast %cst_90 : f32 to vector<8x128xf32>
    %196 = arith.divf %195, %194 : vector<8x128xf32>
    %cst_91 = arith.constant 1.000000e+00 : f32
    %197 = vector.broadcast %cst_91 : f32 to vector<8x128xf32>
    %198 = arith.subf %197, %196 : vector<8x128xf32>
    %199 = arith.mulf %184, %198 : vector<8x128xf32>
    %200 = arith.select %191, %184, %199 : vector<8x128xi1>, vector<8x128xf32>
    %c1224 = arith.constant 1224 : index
    %c0_92 = arith.constant 0 : index
    %201 = vector.load %arg4[%c1224, %c0_92] : memref<2448x128xf32, #tpu.memory_space<vmem>>, vector<128x128xf32>
    %c1352 = arith.constant 1352 : index
    %c0_93 = arith.constant 0 : index
    %202 = vector.load %arg4[%c1352, %c0_93] : memref<2448x128xf32, #tpu.memory_space<vmem>>, vector<1x128xf32>
    %cst_94 = arith.constant dense<0.000000e+00> : vector<8x128xf32>
    %203 = tpu.matmul %200, %201, %cst_94 {dimension_numbers = #tpu.dot_dimension_numbers<[1], [0], [0], [1], [0, 0, 1, 1], [], []>} : vector<8x128xf32>, vector<128x128xf32>, vector<8x128xf32> -> vector<8x128xf32>
    %204 = vector.broadcast %202 : vector<1x128xf32> to vector<8x128xf32>
    %205 = arith.addf %203, %204 : vector<8x128xf32>
    %206 = vector.extract_strided_slice %70 {offsets = [0, 256], sizes = [8, 128], strides = [1, 1]} : vector<8x640xf32> to vector<8x128xf32>
    %207 = arith.addf %205, %206 : vector<8x128xf32>
    %cst_95 = arith.constant 2.000000e+01 : f32
    %208 = vector.broadcast %cst_95 : f32 to vector<8x128xf32>
    %209 = arith.minimumf %207, %208 : vector<8x128xf32>
    %210 = math.exp %209 : vector<8x128xf32>
    %cst_96 = arith.constant 1.000000e+00 : f32
    %211 = vector.broadcast %cst_96 : f32 to vector<8x128xf32>
    %212 = arith.addf %211, %210 : vector<8x128xf32>
    %cst_97 = arith.constant 2.000000e+01 : f32
    %213 = vector.broadcast %cst_97 : f32 to vector<8x128xf32>
    %214 = arith.cmpf ogt, %207, %213 : vector<8x128xf32>
    %215 = arith.mulf %212, %212 : vector<8x128xf32>
    %cst_98 = arith.constant 1.000000e+00 : f32
    %216 = vector.broadcast %cst_98 : f32 to vector<8x128xf32>
    %217 = arith.addf %215, %216 : vector<8x128xf32>
    %cst_99 = arith.constant 2.000000e+00 : f32
    %218 = vector.broadcast %cst_99 : f32 to vector<8x128xf32>
    %219 = arith.divf %218, %217 : vector<8x128xf32>
    %cst_100 = arith.constant 1.000000e+00 : f32
    %220 = vector.broadcast %cst_100 : f32 to vector<8x128xf32>
    %221 = arith.subf %220, %219 : vector<8x128xf32>
    %222 = arith.mulf %207, %221 : vector<8x128xf32>
    %223 = arith.select %214, %207, %222 : vector<8x128xi1>, vector<8x128xf32>
    %c1360 = arith.constant 1360 : index
    %c0_101 = arith.constant 0 : index
    %224 = vector.load %arg4[%c1360, %c0_101] : memref<2448x128xf32, #tpu.memory_space<vmem>>, vector<128x128xf32>
    %c1488 = arith.constant 1488 : index
    %c0_102 = arith.constant 0 : index
    %225 = vector.load %arg4[%c1488, %c0_102] : memref<2448x128xf32, #tpu.memory_space<vmem>>, vector<1x128xf32>
    %cst_103 = arith.constant dense<0.000000e+00> : vector<8x128xf32>
    %226 = tpu.matmul %223, %224, %cst_103 {dimension_numbers = #tpu.dot_dimension_numbers<[1], [0], [0], [1], [0, 0, 1, 1], [], []>} : vector<8x128xf32>, vector<128x128xf32>, vector<8x128xf32> -> vector<8x128xf32>
    %227 = vector.broadcast %225 : vector<1x128xf32> to vector<8x128xf32>
    %228 = arith.addf %226, %227 : vector<8x128xf32>
    %cst_104 = arith.constant 2.000000e+01 : f32
    %229 = vector.broadcast %cst_104 : f32 to vector<8x128xf32>
    %230 = arith.minimumf %228, %229 : vector<8x128xf32>
    %231 = math.exp %230 : vector<8x128xf32>
    %cst_105 = arith.constant 1.000000e+00 : f32
    %232 = vector.broadcast %cst_105 : f32 to vector<8x128xf32>
    %233 = arith.addf %232, %231 : vector<8x128xf32>
    %cst_106 = arith.constant 2.000000e+01 : f32
    %234 = vector.broadcast %cst_106 : f32 to vector<8x128xf32>
    %235 = arith.cmpf ogt, %228, %234 : vector<8x128xf32>
    %236 = arith.mulf %233, %233 : vector<8x128xf32>
    %cst_107 = arith.constant 1.000000e+00 : f32
    %237 = vector.broadcast %cst_107 : f32 to vector<8x128xf32>
    %238 = arith.addf %236, %237 : vector<8x128xf32>
    %cst_108 = arith.constant 2.000000e+00 : f32
    %239 = vector.broadcast %cst_108 : f32 to vector<8x128xf32>
    %240 = arith.divf %239, %238 : vector<8x128xf32>
    %cst_109 = arith.constant 1.000000e+00 : f32
    %241 = vector.broadcast %cst_109 : f32 to vector<8x128xf32>
    %242 = arith.subf %241, %240 : vector<8x128xf32>
    %243 = arith.mulf %228, %242 : vector<8x128xf32>
    %244 = arith.select %235, %228, %243 : vector<8x128xi1>, vector<8x128xf32>
    %c1496 = arith.constant 1496 : index
    %c0_110 = arith.constant 0 : index
    %245 = vector.load %arg4[%c1496, %c0_110] : memref<2448x128xf32, #tpu.memory_space<vmem>>, vector<128x128xf32>
    %c1624 = arith.constant 1624 : index
    %c0_111 = arith.constant 0 : index
    %246 = vector.load %arg4[%c1624, %c0_111] : memref<2448x128xf32, #tpu.memory_space<vmem>>, vector<1x128xf32>
    %cst_112 = arith.constant dense<0.000000e+00> : vector<8x128xf32>
    %247 = tpu.matmul %244, %245, %cst_112 {dimension_numbers = #tpu.dot_dimension_numbers<[1], [0], [0], [1], [0, 0, 1, 1], [], []>} : vector<8x128xf32>, vector<128x128xf32>, vector<8x128xf32> -> vector<8x128xf32>
    %248 = vector.broadcast %246 : vector<1x128xf32> to vector<8x128xf32>
    %249 = arith.addf %247, %248 : vector<8x128xf32>
    %250 = vector.extract_strided_slice %70 {offsets = [0, 384], sizes = [8, 128], strides = [1, 1]} : vector<8x640xf32> to vector<8x128xf32>
    %251 = arith.addf %249, %250 : vector<8x128xf32>
    %cst_113 = arith.constant 2.000000e+01 : f32
    %252 = vector.broadcast %cst_113 : f32 to vector<8x128xf32>
    %253 = arith.minimumf %251, %252 : vector<8x128xf32>
    %254 = math.exp %253 : vector<8x128xf32>
    %cst_114 = arith.constant 1.000000e+00 : f32
    %255 = vector.broadcast %cst_114 : f32 to vector<8x128xf32>
    %256 = arith.addf %255, %254 : vector<8x128xf32>
    %cst_115 = arith.constant 2.000000e+01 : f32
    %257 = vector.broadcast %cst_115 : f32 to vector<8x128xf32>
    %258 = arith.cmpf ogt, %251, %257 : vector<8x128xf32>
    %259 = arith.mulf %256, %256 : vector<8x128xf32>
    %cst_116 = arith.constant 1.000000e+00 : f32
    %260 = vector.broadcast %cst_116 : f32 to vector<8x128xf32>
    %261 = arith.addf %259, %260 : vector<8x128xf32>
    %cst_117 = arith.constant 2.000000e+00 : f32
    %262 = vector.broadcast %cst_117 : f32 to vector<8x128xf32>
    %263 = arith.divf %262, %261 : vector<8x128xf32>
    %cst_118 = arith.constant 1.000000e+00 : f32
    %264 = vector.broadcast %cst_118 : f32 to vector<8x128xf32>
    %265 = arith.subf %264, %263 : vector<8x128xf32>
    %266 = arith.mulf %251, %265 : vector<8x128xf32>
    %267 = arith.select %258, %251, %266 : vector<8x128xi1>, vector<8x128xf32>
    %c1632 = arith.constant 1632 : index
    %c0_119 = arith.constant 0 : index
    %268 = vector.load %arg4[%c1632, %c0_119] : memref<2448x128xf32, #tpu.memory_space<vmem>>, vector<128x128xf32>
    %c1760 = arith.constant 1760 : index
    %c0_120 = arith.constant 0 : index
    %269 = vector.load %arg4[%c1760, %c0_120] : memref<2448x128xf32, #tpu.memory_space<vmem>>, vector<1x128xf32>
    %cst_121 = arith.constant dense<0.000000e+00> : vector<8x128xf32>
    %270 = tpu.matmul %267, %268, %cst_121 {dimension_numbers = #tpu.dot_dimension_numbers<[1], [0], [0], [1], [0, 0, 1, 1], [], []>} : vector<8x128xf32>, vector<128x128xf32>, vector<8x128xf32> -> vector<8x128xf32>
    %271 = vector.broadcast %269 : vector<1x128xf32> to vector<8x128xf32>
    %272 = arith.addf %270, %271 : vector<8x128xf32>
    %cst_122 = arith.constant 2.000000e+01 : f32
    %273 = vector.broadcast %cst_122 : f32 to vector<8x128xf32>
    %274 = arith.minimumf %272, %273 : vector<8x128xf32>
    %275 = math.exp %274 : vector<8x128xf32>
    %cst_123 = arith.constant 1.000000e+00 : f32
    %276 = vector.broadcast %cst_123 : f32 to vector<8x128xf32>
    %277 = arith.addf %276, %275 : vector<8x128xf32>
    %cst_124 = arith.constant 2.000000e+01 : f32
    %278 = vector.broadcast %cst_124 : f32 to vector<8x128xf32>
    %279 = arith.cmpf ogt, %272, %278 : vector<8x128xf32>
    %280 = arith.mulf %277, %277 : vector<8x128xf32>
    %cst_125 = arith.constant 1.000000e+00 : f32
    %281 = vector.broadcast %cst_125 : f32 to vector<8x128xf32>
    %282 = arith.addf %280, %281 : vector<8x128xf32>
    %cst_126 = arith.constant 2.000000e+00 : f32
    %283 = vector.broadcast %cst_126 : f32 to vector<8x128xf32>
    %284 = arith.divf %283, %282 : vector<8x128xf32>
    %cst_127 = arith.constant 1.000000e+00 : f32
    %285 = vector.broadcast %cst_127 : f32 to vector<8x128xf32>
    %286 = arith.subf %285, %284 : vector<8x128xf32>
    %287 = arith.mulf %272, %286 : vector<8x128xf32>
    %288 = arith.select %279, %272, %287 : vector<8x128xi1>, vector<8x128xf32>
    %c1768 = arith.constant 1768 : index
    %c0_128 = arith.constant 0 : index
    %289 = vector.load %arg4[%c1768, %c0_128] : memref<2448x128xf32, #tpu.memory_space<vmem>>, vector<128x128xf32>
    %c1896 = arith.constant 1896 : index
    %c0_129 = arith.constant 0 : index
    %290 = vector.load %arg4[%c1896, %c0_129] : memref<2448x128xf32, #tpu.memory_space<vmem>>, vector<1x128xf32>
    %cst_130 = arith.constant dense<0.000000e+00> : vector<8x128xf32>
    %291 = tpu.matmul %288, %289, %cst_130 {dimension_numbers = #tpu.dot_dimension_numbers<[1], [0], [0], [1], [0, 0, 1, 1], [], []>} : vector<8x128xf32>, vector<128x128xf32>, vector<8x128xf32> -> vector<8x128xf32>
    %292 = vector.broadcast %290 : vector<1x128xf32> to vector<8x128xf32>
    %293 = arith.addf %291, %292 : vector<8x128xf32>
    %cst_131 = arith.constant 2.000000e+01 : f32
    %294 = vector.broadcast %cst_131 : f32 to vector<8x128xf32>
    %295 = arith.minimumf %293, %294 : vector<8x128xf32>
    %296 = math.exp %295 : vector<8x128xf32>
    %cst_132 = arith.constant 1.000000e+00 : f32
    %297 = vector.broadcast %cst_132 : f32 to vector<8x128xf32>
    %298 = arith.addf %297, %296 : vector<8x128xf32>
    %cst_133 = arith.constant 2.000000e+01 : f32
    %299 = vector.broadcast %cst_133 : f32 to vector<8x128xf32>
    %300 = arith.cmpf ogt, %293, %299 : vector<8x128xf32>
    %301 = arith.mulf %298, %298 : vector<8x128xf32>
    %cst_134 = arith.constant 1.000000e+00 : f32
    %302 = vector.broadcast %cst_134 : f32 to vector<8x128xf32>
    %303 = arith.addf %301, %302 : vector<8x128xf32>
    %cst_135 = arith.constant 2.000000e+00 : f32
    %304 = vector.broadcast %cst_135 : f32 to vector<8x128xf32>
    %305 = arith.divf %304, %303 : vector<8x128xf32>
    %cst_136 = arith.constant 1.000000e+00 : f32
    %306 = vector.broadcast %cst_136 : f32 to vector<8x128xf32>
    %307 = arith.subf %306, %305 : vector<8x128xf32>
    %308 = arith.mulf %293, %307 : vector<8x128xf32>
    %309 = arith.select %300, %293, %308 : vector<8x128xi1>, vector<8x128xf32>
    %c1904 = arith.constant 1904 : index
    %c0_137 = arith.constant 0 : index
    %310 = vector.load %arg4[%c1904, %c0_137] : memref<2448x128xf32, #tpu.memory_space<vmem>>, vector<128x128xf32>
    %c2032 = arith.constant 2032 : index
    %c0_138 = arith.constant 0 : index
    %311 = vector.load %arg4[%c2032, %c0_138] : memref<2448x128xf32, #tpu.memory_space<vmem>>, vector<1x128xf32>
    %cst_139 = arith.constant dense<0.000000e+00> : vector<8x128xf32>
    %312 = tpu.matmul %309, %310, %cst_139 {dimension_numbers = #tpu.dot_dimension_numbers<[1], [0], [0], [1], [0, 0, 1, 1], [], []>} : vector<8x128xf32>, vector<128x128xf32>, vector<8x128xf32> -> vector<8x128xf32>
    %313 = vector.broadcast %311 : vector<1x128xf32> to vector<8x128xf32>
    %314 = arith.addf %312, %313 : vector<8x128xf32>
    %315 = vector.extract_strided_slice %70 {offsets = [0, 512], sizes = [8, 128], strides = [1, 1]} : vector<8x640xf32> to vector<8x128xf32>
    %316 = arith.addf %314, %315 : vector<8x128xf32>
    %cst_140 = arith.constant 2.000000e+01 : f32
    %317 = vector.broadcast %cst_140 : f32 to vector<8x128xf32>
    %318 = arith.minimumf %316, %317 : vector<8x128xf32>
    %319 = math.exp %318 : vector<8x128xf32>
    %cst_141 = arith.constant 1.000000e+00 : f32
    %320 = vector.broadcast %cst_141 : f32 to vector<8x128xf32>
    %321 = arith.addf %320, %319 : vector<8x128xf32>
    %cst_142 = arith.constant 2.000000e+01 : f32
    %322 = vector.broadcast %cst_142 : f32 to vector<8x128xf32>
    %323 = arith.cmpf ogt, %316, %322 : vector<8x128xf32>
    %324 = arith.mulf %321, %321 : vector<8x128xf32>
    %cst_143 = arith.constant 1.000000e+00 : f32
    %325 = vector.broadcast %cst_143 : f32 to vector<8x128xf32>
    %326 = arith.addf %324, %325 : vector<8x128xf32>
    %cst_144 = arith.constant 2.000000e+00 : f32
    %327 = vector.broadcast %cst_144 : f32 to vector<8x128xf32>
    %328 = arith.divf %327, %326 : vector<8x128xf32>
    %cst_145 = arith.constant 1.000000e+00 : f32
    %329 = vector.broadcast %cst_145 : f32 to vector<8x128xf32>
    %330 = arith.subf %329, %328 : vector<8x128xf32>
    %331 = arith.mulf %316, %330 : vector<8x128xf32>
    %332 = arith.select %323, %316, %331 : vector<8x128xi1>, vector<8x128xf32>
    %c2040 = arith.constant 2040 : index
    %c0_146 = arith.constant 0 : index
    %333 = vector.load %arg4[%c2040, %c0_146] : memref<2448x128xf32, #tpu.memory_space<vmem>>, vector<128x128xf32>
    %c2168 = arith.constant 2168 : index
    %c0_147 = arith.constant 0 : index
    %334 = vector.load %arg4[%c2168, %c0_147] : memref<2448x128xf32, #tpu.memory_space<vmem>>, vector<1x128xf32>
    %cst_148 = arith.constant dense<0.000000e+00> : vector<8x128xf32>
    %335 = tpu.matmul %332, %333, %cst_148 {dimension_numbers = #tpu.dot_dimension_numbers<[1], [0], [0], [1], [0, 0, 1, 1], [], []>} : vector<8x128xf32>, vector<128x128xf32>, vector<8x128xf32> -> vector<8x128xf32>
    %336 = vector.broadcast %334 : vector<1x128xf32> to vector<8x128xf32>
    %337 = arith.addf %335, %336 : vector<8x128xf32>
    %cst_149 = arith.constant 2.000000e+01 : f32
    %338 = vector.broadcast %cst_149 : f32 to vector<8x128xf32>
    %339 = arith.minimumf %337, %338 : vector<8x128xf32>
    %340 = math.exp %339 : vector<8x128xf32>
    %cst_150 = arith.constant 1.000000e+00 : f32
    %341 = vector.broadcast %cst_150 : f32 to vector<8x128xf32>
    %342 = arith.addf %341, %340 : vector<8x128xf32>
    %cst_151 = arith.constant 2.000000e+01 : f32
    %343 = vector.broadcast %cst_151 : f32 to vector<8x128xf32>
    %344 = arith.cmpf ogt, %337, %343 : vector<8x128xf32>
    %345 = arith.mulf %342, %342 : vector<8x128xf32>
    %cst_152 = arith.constant 1.000000e+00 : f32
    %346 = vector.broadcast %cst_152 : f32 to vector<8x128xf32>
    %347 = arith.addf %345, %346 : vector<8x128xf32>
    %cst_153 = arith.constant 2.000000e+00 : f32
    %348 = vector.broadcast %cst_153 : f32 to vector<8x128xf32>
    %349 = arith.divf %348, %347 : vector<8x128xf32>
    %cst_154 = arith.constant 1.000000e+00 : f32
    %350 = vector.broadcast %cst_154 : f32 to vector<8x128xf32>
    %351 = arith.subf %350, %349 : vector<8x128xf32>
    %352 = arith.mulf %337, %351 : vector<8x128xf32>
    %353 = arith.select %344, %337, %352 : vector<8x128xi1>, vector<8x128xf32>
    %c2176 = arith.constant 2176 : index
    %c0_155 = arith.constant 0 : index
    %354 = vector.load %arg4[%c2176, %c0_155] : memref<2448x128xf32, #tpu.memory_space<vmem>>, vector<128x128xf32>
    %c2304 = arith.constant 2304 : index
    %c0_156 = arith.constant 0 : index
    %355 = vector.load %arg4[%c2304, %c0_156] : memref<2448x128xf32, #tpu.memory_space<vmem>>, vector<1x128xf32>
    %cst_157 = arith.constant dense<0.000000e+00> : vector<8x128xf32>
    %356 = tpu.matmul %353, %354, %cst_157 {dimension_numbers = #tpu.dot_dimension_numbers<[1], [0], [0], [1], [0, 0, 1, 1], [], []>} : vector<8x128xf32>, vector<128x128xf32>, vector<8x128xf32> -> vector<8x128xf32>
    %357 = vector.broadcast %355 : vector<1x128xf32> to vector<8x128xf32>
    %358 = arith.addf %356, %357 : vector<8x128xf32>
    %cst_158 = arith.constant 2.000000e+01 : f32
    %359 = vector.broadcast %cst_158 : f32 to vector<8x128xf32>
    %360 = arith.minimumf %358, %359 : vector<8x128xf32>
    %361 = math.exp %360 : vector<8x128xf32>
    %cst_159 = arith.constant 1.000000e+00 : f32
    %362 = vector.broadcast %cst_159 : f32 to vector<8x128xf32>
    %363 = arith.addf %362, %361 : vector<8x128xf32>
    %cst_160 = arith.constant 2.000000e+01 : f32
    %364 = vector.broadcast %cst_160 : f32 to vector<8x128xf32>
    %365 = arith.cmpf ogt, %358, %364 : vector<8x128xf32>
    %366 = arith.mulf %363, %363 : vector<8x128xf32>
    %cst_161 = arith.constant 1.000000e+00 : f32
    %367 = vector.broadcast %cst_161 : f32 to vector<8x128xf32>
    %368 = arith.addf %366, %367 : vector<8x128xf32>
    %cst_162 = arith.constant 2.000000e+00 : f32
    %369 = vector.broadcast %cst_162 : f32 to vector<8x128xf32>
    %370 = arith.divf %369, %368 : vector<8x128xf32>
    %cst_163 = arith.constant 1.000000e+00 : f32
    %371 = vector.broadcast %cst_163 : f32 to vector<8x128xf32>
    %372 = arith.subf %371, %370 : vector<8x128xf32>
    %373 = arith.mulf %358, %372 : vector<8x128xf32>
    %374 = arith.select %365, %358, %373 : vector<8x128xi1>, vector<8x128xf32>
    %c2312 = arith.constant 2312 : index
    %c0_164 = arith.constant 0 : index
    %375 = vector.load %arg4[%c2312, %c0_164] : memref<2448x128xf32, #tpu.memory_space<vmem>>, vector<128x128xf32>
    %c2440 = arith.constant 2440 : index
    %c0_165 = arith.constant 0 : index
    %376 = vector.load %arg4[%c2440, %c0_165] : memref<2448x128xf32, #tpu.memory_space<vmem>>, vector<1x128xf32>
    %cst_166 = arith.constant dense<0.000000e+00> : vector<8x128xf32>
    %377 = tpu.matmul %374, %375, %cst_166 {dimension_numbers = #tpu.dot_dimension_numbers<[1], [0], [0], [1], [0, 0, 1, 1], [], []>} : vector<8x128xf32>, vector<128x128xf32>, vector<8x128xf32> -> vector<8x128xf32>
    %378 = vector.broadcast %376 : vector<1x128xf32> to vector<8x128xf32>
    %379 = arith.addf %377, %378 : vector<8x128xf32>
    %c0_167 = arith.constant 0 : index
    %c0_168 = arith.constant 0 : index
    %380 = vector.load %arg6[%c0_167, %c0_168] : memref<8x128xf32, #tpu.memory_space<vmem>>, vector<8x128xf32>
    tpu.vector_store %arg6[%c0_167, %c0_168], %379 {strides = array<i32>} : memref<8x128xf32, #tpu.memory_space<vmem>>, vector<8x128xf32>,
    return
  }
  func.func @transform_0(%arg0: i32) -> (i32, i32) {
    %c0_i32 = arith.constant 0 : i32
    %c0_i32_0 = arith.constant 0 : i32
    return %arg0, %c0_i32 : i32, i32
  }
  func.func @transform_1(%arg0: i32) -> (i32, i32) {
    %c0_i32 = arith.constant 0 : i32
    %c0_i32_0 = arith.constant 0 : i32
    return %arg0, %c0_i32 : i32, i32
  }
  func.func @transform_2(%arg0: i32) -> (i32, i32) {
    %c0_i32 = arith.constant 0 : i32
    %c0_i32_0 = arith.constant 0 : i32
    return %arg0, %c0_i32 : i32, i32
  }
  func.func @transform_3(%arg0: i32) -> (i32, i32) {
    %c0_i32 = arith.constant 0 : i32
    %c0_i32_0 = arith.constant 0 : i32
    %c0_i32_1 = arith.constant 0 : i32
    return %c0_i32, %c0_i32_0 : i32, i32
  }
  func.func @transform_4(%arg0: i32) -> (i32, i32) {
    %c0_i32 = arith.constant 0 : i32
    %c0_i32_0 = arith.constant 0 : i32
    %c0_i32_1 = arith.constant 0 : i32
    return %c0_i32, %c0_i32_0 : i32, i32
  }
  func.func @transform_5(%arg0: i32) -> (i32, i32) {
    %c0_i32 = arith.constant 0 : i32
    %c0_i32_0 = arith.constant 0 : i32
    return %arg0, %c0_i32 : i32, i32
  }
}

</mosaic_0001>

<bundles_post_ra>
// kernel: tpu_custom_call.1
= control target key start
LH: loop header
LB: loop body
LE: loop exit
PB: predicated region body
PF: predicated region fallthrough
CT: control target
= control target key end

     0   :  { %s5574_s0 = inlined_call_operand.hbm [shape: f32[16,128], index: 0, kind: input, shape index: {}]   ;;  %s5575_s1 = inlined_call_operand.hbm [shape: f32[16,128], index: 1, kind: input, shape index: {}]   ;;  %s5576_s2 = inlined_call_operand.hbm [shape: f32[16,128], index: 2, kind: input, shape index: {}]   ;;  %s5577_s3 = inlined_call_operand.hbm [shape: f32[2448,128], index: 3, kind: input, shape index: {}]   ;;  %s5578_s4 = inlined_call_operand.hbm [shape: f32[256,640], index: 4, kind: input, shape index: {}]   ;;  %s5579_s5 = inlined_call_operand.hbm [shape: f32[16,128], index: 5, kind: output, shape index: {}]  }
   0x1   :  { %5595 = sst [smem:[#allocation19_spill]] %s5575_s1 }
   0x2   :  { %5596 = sst [smem:[#allocation20_spill]] %s5577_s3 }
   0x3   :  { %10 = vsyncpa [#allocation3], 0 }
   0x4   :  { %12 = vsyncpa [#allocation3 + $0x1], 0 }
   0x5   :  { %13 = vsyncpa [#allocation6], 0 }
   0x6   :  { %15 = vsyncpa [#allocation6 + $0x1], 0 }
   0x7   :  { %16 = vsyncpa [#allocation9], 0 }
   0x8   :  { %17 = vsyncpa [#allocation4], 0 }
   0x9   :  { %19 = vsyncpa [#allocation4 + $0x1], 0  ;;  %s5035_s18 = smov 0   ;;  %s5037_s19 = smov 0  }
   0xa   :  { %s5039_s20 = smov 0   ;;  %s5041_s21 = smov 0  }
   0xb LB: > { %5597 = sst [smem:[#allocation16_spill]] %s4990_s21  ;;  %s5056_s22 = sadd.s32 4294967295, %s4990_s21   ;;  %s4990_s21 = sphi %s5041_s21, %s5625_s21   ;;  %s4986_s20 = sphi %s5039_s20, %s5629_s20   ;;  %s4982_s19 = sphi %s5037_s19, %s5628_s19   ;;  %s4978_s18 = sphi %s5035_s18, %s5627_s18  }
   0xc   : > { %s2921_s23 = sadd.s32 4294967294, %s4990_s21   ;;  %p45_p0 = scmp.ne.s32.totalorder %s4982_s19, %s4978_s18 }
   0xd   : > { %p5580_p1 = scmp.eq.s32.totalorder %s5056_s22, 0  ;;  %p169_p3 = scmp.eq.s32.totalorder %s2921_s23, 1 }
   0xe   : > { %p2922_p5 = scmp.ge.s32.totalorder %s4990_s21, 1  ;;  %p176_p7 = scmp.lt.s32.totalorder %s4990_s21, 3 }
   0xf   : > { %p5065_p4 = por %p5580_p1, %p45_p0  ;;  %p5070_p6 = por %p169_p3, %p45_p0 }
  0x10   : > { %p5075_p8 = pnand %p2922_p5, %p176_p7  ;;  %s4992_s27 = smov [#allocation8]  }
  0x11   : > { %s5598_s24 = scalar_select %p5065_p4, 1, 0 }
  0x12   : > { %s5599_s25 = scalar_select %p5070_p6, 1, 0 }
  0x13   : > { %s5600_s26 = scalar_select %p5075_p8, 1, 0 }
  0x14   : > { %s188_s28 = sshll.u32 %s4992_s27, 4  ;;  %p4634_p9 = pneg %p5075_p8  ;;  %s5079_s28 = int_to_ptr.vmem [resolvable:$true] %s188_s28 }
  0x15   : > { %s5091_s30 = sadd.s32 1, %s4990_s21   ;;  %s32_s6 = sadd.s32 1, %s4986_s20 }
  0x16   : > { %p5086_p11 = pnand %p4634_p9, %p5580_p1  ;;  %5602 = sst [smem:[#allocation17_spill]] %s5091_s30 }
  0x17   : > { %s29_s7 = ssub.s32 %s4990_s21, %s5091_s30  ;;  %s5603_s3 = sld [smem:[#allocation20_spill]] }
  0x18   : > { %s5601_s29 = scalar_select %p5086_p11, 1, 0 }
  0x19   : > { %p5582_p13 = pneg %p5086_p11 }
  0x1d   : > { %s4770_s10 = scalar_lea.hbm %s5603_s3, 39168 }
  0x1e   : > { %p4771_p12 = scmp.ne.s32.totalorder %s5603_s3, %s4770_s10  ;;  %p4777_p5 = scmp.lt.u32.totalorder %s4770_s10, %s5603_s3 }
  0x20   : > { %p4773_p0 = pnand %p5582_p13, %p4771_p12 }
  0x22   : > { %p4774_p3 = pneg %p4773_p0 }
  0x24   : > { %p4779_p7 = pnand %p4777_p5, %p4774_p3 }
  0x26   : > { %4782 = shalt.err (!%p4779_p7)
}
  0x27   : > { %s4783_s15 = scalar_lea.vmem %s5079_s28, 39168  ;;  %p4791_p2 = scmp.lt.s32.totalorder %s5079_s28, %s5079_s28 }
  0x28   : > { %p4784_p9 = scmp.ne.s32.totalorder %s5079_s28, %s4783_s15  ;;  %p4792_p12 = scmp.lt.s32.totalorder %s4783_s15, %s4783_s15 }
  0x2a   : > { %p4786_p10 = pnand %p4784_p9, %p5582_p13  ;;  %p4793_p0 = por %p4792_p12, %p4791_p2 }
  0x2c   : > { %p4787_p1 = pneg %p4786_p10 }
  0x2e   : > { %p4794_p6 = pnand %p4793_p0, %p4787_p1 }
  0x30   : > { %4797 = shalt.err (!%p4794_p6)
}
  0x31   : > { %s4993_s16 = smov 128   ;;  %s4994_s17 = smov 8  }
  0x32   : > { %4637 = dma.hbm_to_vmem [thread:$0]  (!%p5086_p11), %s5603_s3, 39168, %s5079_s28, [#allocation9], %s4993_s16, %s4993_s16, %s4994_s17  }
  0x33   : > { %p30_p1 = scmp.eq.s32.totalorder %s29_s7, 0  ;;  %p39_p2 = scmp.ne.s32.totalorder %s4986_s20, %s4982_s19 }
  0x34   : > { %p40_p6 = scmp.eq.s32.totalorder %s4990_s21, 0  ;;  %p4657_p10 = scmp.lt.s32.totalorder %s4990_s21, 2 }
  0x35   : > { %s5128_s8 = scalar_select %p30_p1, %s4986_s20, %s32_s6  }
  0x36   : > { %p41_p3 = por %p40_p6, %p39_p2  ;;  %p5605_p5 = scmp.eq.s32.totalorder %s5056_s22, 1 }
  0x37   : > { %5604 = sst [smem:[#allocation18_spill]] %s5128_s8  ;;  %s5581_s10 = sand.u32 1, %s4986_s20  }
  0x38   : > { %p5132_p7 = por %p5605_p5, %p39_p2  ;;  %s5138_s11 = sshll.u32 %s4990_s21, 7 }
  0x39   : > { %s5142_s12 = sshll.u32 %s5581_s10, 3  ;;  %p5144_p9 = pnand %p4657_p10, %p41_p3 }
  0x3a   : > { %s5606_s9 = scalar_select %p5132_p7, 1, 0 }
  0x3b   : > { %s5607_s28 = scalar_select %p5144_p9, 1, 0 }
  0x3c   : > { %s233_s6 = sand.u32 1, %s4990_s21   ;;  %s5608_s1 = sld [smem:[#allocation19_spill]] }
  0x3d   : > { %s237_s15 = scalar_lea.vmem [#allocation5], %s5142_s12  ;;  %s5158_s17 = scalar_lea.sflag [#allocation6], %s233_s6 }
  0x3e   : > { %s244_s16 = sshll.u32 %s237_s15, 4  ;;  %p5164_p0 = pneg %p5144_p9  ;;  %s5156_s16 = int_to_ptr.vmem [resolvable:$true] %s244_s16 }
  0x40   : > { %s5609_s27 = scalar_select %p5164_p0, 1, 0 }
  0x42   : > { %s5153_s14 = scalar_lea.hbm %s5608_s1, %s5138_s11  ;;  %s4803_s10 = scalar_lea.hbm %s5608_s1, 256 }
  0x43   : > { %s4798_s23 = scalar_lea.hbm %s5153_s14, 128  ;;  %p4804_p6 = scmp.lt.u32.totalorder %s5153_s14, %s5608_s1 }
  0x44   : > { %p4799_p12 = scmp.ne.s32.totalorder %s5153_s14, %s4798_s23  ;;  %p4805_p10 = scmp.lt.u32.totalorder %s4803_s10, %s4798_s23 }
  0x45   : > { %p4807_p5 = scmp.lt.u32.totalorder %s4798_s23, %s5153_s14 }
  0x46   : > { %p4801_p1 = pnand %p5164_p0, %p4799_p12  ;;  %p4806_p3 = por %p4805_p10, %p4804_p6 }
  0x48   : > { %p4802_p2 = pneg %p4801_p1  ;;  %p4808_p13 = por %p4807_p5, %p4806_p3 }
  0x4a   : > { %p4809_p7 = pnand %p4808_p13, %p4802_p2 }
  0x4c   : > { %4812 = shalt.err (!%p4809_p7)
}
  0x4d   : > { %s4813_s6 = scalar_lea.vmem %s5156_s16, 128  ;;  %s4995_s7 = smov [#allocation5]  }
  0x4e   : > { %p4814_p12 = scmp.ne.s32.totalorder %s5156_s16, %s4813_s6  ;;  %s4818_s13 = sshll.u32 %s4995_s7, 4  ;;  %s4819_s13 = int_to_ptr.vmem [resolvable:$false] %s4818_s13 }
  0x4f   : > { %s4820_s3 = scalar_lea.vmem %s4819_s13, 256  ;;  %p4821_p8 = scmp.lt.s32.totalorder %s5156_s16, %s4819_s13 }
  0x50   : > { %p4816_p1 = pnand %p4814_p12, %p5164_p0  ;;  %p4822_p11 = scmp.lt.s32.totalorder %s4820_s3, %s4813_s6 }
  0x52   : > { %p4817_p4 = pneg %p4816_p1  ;;  %p4823_p6 = por %p4822_p11, %p4821_p8 }
  0x54   : > { %p4824_p10 = pnand %p4823_p6, %p4817_p4 }
  0x56   : > { %4827 = shalt.err (!%p4824_p10)
}
  0x57   : > { %4647 = dma.hbm_to_vmem [thread:$0]  (!%p5144_p9), %s5153_s14, 128, %s5156_s16, %s5158_s17  }
  0x58   : > { %s4996_s10 = smov [#allocation10]   ;;  %s4828_s7 = scalar_lea.hbm %s5578_s4, 20480 }
  0x59   : > { %s201_s23 = sshll.u32 %s4996_s10, 4  ;;  %p4829_p8 = scmp.ne.s32.totalorder %s5578_s4, %s4828_s7  ;;  %s202_s23 = int_to_ptr.vmem [resolvable:$true] %s201_s23 }
  0x5a   : > { %p5610_p4 = scmp.ne.s32.totalorder %s5601_s29, 0  ;;  %p4835_p2 = scmp.lt.u32.totalorder %s4828_s7, %s5578_s4 }
  0x5c   : > { %p5611_p11 = pneg %p5610_p4 }
  0x5e   : > { %p4831_p13 = pnand %p4829_p8, %p5611_p11 }
  0x60   : > { %p4832_p7 = pneg %p4831_p13 }
  0x62   : > { %p4837_p3 = pnand %p4835_p2, %p4832_p7 }
  0x64   : > { %4840 = shalt.err (!%p4837_p3)
}
  0x65   : > { %s4841_s14 = scalar_lea.vmem %s202_s23, 20480  ;;  %p5612_p12 = pmov %p5611_p11 }
  0x66   : > { %p4842_p5 = scmp.ne.s32.totalorder %s202_s23, %s4841_s14  ;;  %p4849_p10 = scmp.lt.s32.totalorder %s202_s23, %s202_s23 }
  0x67   : > { %p4850_p9 = scmp.lt.s32.totalorder %s4841_s14, %s4841_s14 }
  0x68   : > { %p4844_p1 = pnand %p4842_p5, %p5612_p12 }
  0x69   : > { %p4851_p0 = por %p4850_p9, %p4849_p10 }
  0x6a   : > { %p4845_p6 = pneg %p4844_p1 }
  0x6c   : > { %p4852_p8 = pnand %p4851_p0, %p4845_p6 }
  0x6e   : > { %4855 = shalt.err (!%p4852_p8)
}
  0x6f   : > { %s4997_s1 = smov 640   ;;  %s4998_s8 = smov 40  }
  0x70   : > { %4640 = dma.hbm_to_vmem [thread:$0]  (!%p5610_p4), %s5578_s4, 20480, %s202_s23, [#allocation9], %s4997_s1, %s4997_s1, %s4998_s8  }
  0x71   : > { %s5212_s13 = scalar_lea.hbm %s5574_s0, %s5138_s11  ;;  %s219_s6 = scalar_lea.vmem [#allocation2], %s5142_s12 }
  0x72   : > { %s226_s3 = sshll.u32 %s219_s6, 4  ;;  %s5613_s14 = sand.u32 1, %s4986_s20   ;;  %s227_s3 = int_to_ptr.vmem [resolvable:$true] %s226_s3 }
  0x73   : > { %s216_s30 = scalar_lea.sflag [#allocation3], %s5613_s14  ;;  %s4856_s21 = scalar_lea.hbm %s5212_s13, 128 }
  0x74   : > { %p4857_p9 = scmp.ne.s32.totalorder %s5212_s13, %s4856_s21  ;;  %p5614_p0 = scmp.ne.s32.totalorder %s5609_s27, 0 }
  0x75   : > { %s4861_s1 = scalar_lea.hbm %s5574_s0, 256  ;;  %p4862_p4 = scmp.lt.u32.totalorder %s5212_s13, %s5574_s0 }
  0x76   : > { %p4859_p11 = pnand %p4857_p9, %p5614_p0  ;;  %p4863_p7 = scmp.lt.u32.totalorder %s4861_s1, %s4856_s21 }
  0x77   : > { %p4865_p3 = scmp.lt.u32.totalorder %s4856_s21, %s5212_s13 }
  0x78   : > { %p4860_p13 = pneg %p4859_p11  ;;  %p4864_p2 = por %p4863_p7, %p4862_p4 }
  0x7a   : > { %p4866_p5 = por %p4865_p3, %p4864_p2 }
  0x7c   : > { %p4867_p12 = pnand %p4866_p5, %p4860_p13 }
  0x7e   : > { %4870 = shalt.err (!%p4867_p12)
}
  0x7f   : > { %s4871_s10 = scalar_lea.vmem %s227_s3, 128  ;;  %s4999_s15 = smov [#allocation2]  }
  0x80   : > { %p4872_p1 = scmp.ne.s32.totalorder %s227_s3, %s4871_s10  ;;  %s4876_s7 = sshll.u32 %s4999_s15, 4  ;;  %s4877_s7 = int_to_ptr.vmem [resolvable:$false] %s4876_s7 }
  0x81   : > { %s4878_s6 = scalar_lea.vmem %s4877_s7, 256  ;;  %p4879_p8 = scmp.lt.s32.totalorder %s227_s3, %s4877_s7 }
  0x82   : > { %p4874_p6 = pnand %p4872_p1, %p5614_p0  ;;  %p4880_p9 = scmp.lt.s32.totalorder %s4878_s6, %s4871_s10 }
  0x84   : > { %p4875_p10 = pneg %p4874_p6  ;;  %p4881_p11 = por %p4880_p9, %p4879_p8 }
  0x86   : > { %p4882_p4 = pnand %p4881_p11, %p4875_p10 }
  0x88   : > { %4885 = shalt.err (!%p4882_p4)
}
  0x89   : > { %p5615_p7 = scmp.ne.s32.totalorder %s5607_s28, 0  ;;  %s5238_s29 = scalar_lea.hbm %s5576_s2, %s5138_s11 }
  0x8a   : > { %s255_s23 = scalar_lea.vmem [#allocation7], %s5142_s12  ;;  %s4886_s8 = scalar_lea.hbm %s5238_s29, 128 }
  0x8b   : > { %4644 = dma.hbm_to_vmem [thread:$0]  (!%p5615_p7), %s5212_s13, 128, %s227_s3, %s216_s30  }
  0x8c   : > { %s262_s1 = sshll.u32 %s255_s23, 4  ;;  %p4887_p13 = scmp.ne.s32.totalorder %s5238_s29, %s4886_s8  ;;  %s263_s1 = int_to_ptr.vmem [resolvable:$true] %s262_s1 }
  0x8d   : > { %s4891_s30 = scalar_lea.hbm %s5576_s2, 256  ;;  %p4892_p5 = scmp.lt.u32.totalorder %s5238_s29, %s5576_s2 }
  0x8e   : > { %p4889_p2 = pnand %p4887_p13, %p5614_p0  ;;  %p4893_p12 = scmp.lt.u32.totalorder %s4891_s30, %s4886_s8 }
  0x8f   : > { %p4895_p6 = scmp.lt.u32.totalorder %s4886_s8, %s5238_s29 }
  0x90   : > { %p4890_p3 = pneg %p4889_p2  ;;  %p4894_p1 = por %p4893_p12, %p4892_p5 }
  0x92   : > { %p4896_p10 = por %p4895_p6, %p4894_p1 }
  0x94   : > { %p4897_p8 = pnand %p4896_p10, %p4890_p3 }
  0x96   : > { %4900 = shalt.err (!%p4897_p8)
}
  0x97   : > { %s4901_s11 = scalar_lea.vmem %s263_s1, 128  ;;  %s5000_s12 = smov [#allocation7]  }
  0x98   : > { %p4902_p9 = scmp.ne.s32.totalorder %s263_s1, %s4901_s11  ;;  %s4906_s15 = sshll.u32 %s5000_s12, 4  ;;  %s4907_s15 = int_to_ptr.vmem [resolvable:$false] %s4906_s15 }
  0x99   : > { %s4908_s7 = scalar_lea.vmem %s4907_s15, 256  ;;  %p4909_p13 = scmp.lt.s32.totalorder %s263_s1, %s4907_s15 }
  0x9a   : > { %p4904_p11 = pnand %p4902_p9, %p5614_p0  ;;  %p4910_p2 = scmp.lt.s32.totalorder %s4908_s7, %s4901_s11 }
  0x9c   : > { %p4905_p4 = pneg %p4904_p11  ;;  %p4911_p7 = por %p4910_p2, %p4909_p13 }
  0x9e   : > { %p4912_p5 = pnand %p4911_p7, %p4905_p4 }
  0xa0   : > { %4915 = shalt.err (!%p4912_p5)
}
  0xa1   : > { %p5616_p12 = scmp.ne.s32.totalorder %s5607_s28, 0  ;;  %p5617_p3 = scmp.ne.s32.totalorder %s5600_s26, 0 }
  0xa2   : > { %s5262_s27 = sand.u32 (!%p5617_p3), 1, %s4982_s19   ;;  %p5618_p0 = scmp.ne.s32.totalorder (!%p5617_p3), %s5598_s24, 0 }
  0xa3   : > { %4650 = dma.hbm_to_vmem [thread:$0]  (!%p5616_p12), %s5238_s29, 128, %s263_s1, %s5158_s17  }
  0xa4   : > { %271 = sbr.rel (%p5617_p3) target bundleno = 4339 (0x10f3), region = 40  ;;  %s5265_s6 = sshll.u32 (!%p5617_p3), %s5262_s27, 3 }
  0xa5   : > { %s274_s21 = scalar_lea.sflag (!%p5617_p3), [#allocation3], %s5262_s27  ;;  %s277_s14 = scalar_lea.vmem (!%p5617_p3), [#allocation2], %s5265_s6 }
  0xab   : > { %4961 = dma.done.wait (%p5618_p0), %s274_s21, 128  }
  0xac   : > { %4963 = vsyncadd (%p5618_p0), %s274_s21, 4294967168  ;;  %s282_s26 = sand.u32 1, %s5056_s22   ;;  %s286_s17 = scalar_lea.vmem [#allocation5], %s5265_s6 }
  0xad   : > { %s283_s28 = scalar_lea.sflag [#allocation6], %s282_s26 }
  0xae   : > { %4965 = dma.done.wait (%p5618_p0), %s283_s28, 256  }
  0xaf   : > { %4967 = vsyncadd (%p5618_p0), %s283_s28, 4294967040  ;;  %s295_s29 = scalar_lea.vmem [#allocation7], %s5265_s6  ;;  %p5619_p7 = scmp.eq.s32.totalorder %s5056_s22, 0 }
  0xb1   : > { %4969 = dma.done.wait (%p5619_p7), [#allocation9], 59648   ;;  %p5620_p1 = pmov %p5619_p7 }
  0xb2   : > { %v5001_v0 = vmov 0.0|0.0   ;;  %vm5002_vm0 = vmmov 0   ;;  %v5003_v1 = vmov 0.0   ;;  %v341_v2 = vld [vmem:[#allocation8] sm:$0xff]  ;;  %v342_v3 = vld [vmem:[#allocation8 + $0x8] sm:$0xff]  ;;  %v343_v4 = vld [vmem:[#allocation8 + $0x10] sm:$0xff] }
  0xb3   : > { %4971 = vsyncadd (%p5620_p1), [#allocation9], 4294907648  ;;  %4001 = vmatprep.subr.bf16.mxu0 %v5001_v0  ;;  %4025 = vmatprep.subr.bf16.mxu1 %v5001_v0  ;;  %v4002_v5 = vpack.c.bf16 %v342_v3, %v341_v2  ;;  %v344_v6 = vld [vmem:[#allocation8 + $0x18] sm:$0xff]  ;;  %v345_v8 = vld [vmem:[#allocation8 + $0x20] sm:$0xff]  ;;  %s2958_s24 = sshll.u32 %s5056_s22, 7  ;;  %s339_s23 = scalar_lea.vmem [#allocation11], %s5265_s6 }
  0xb4   : > { %3333 = vmatprep.mubr.msk.f32.mxu0 %vm5002_vm0, %v5003_v1  ;;  %3368 = vmatprep.mubr.msk.f32.mxu1 %vm5002_vm0, %v5003_v1  ;;  %v4005_v7 = vpack.c.bf16 %v344_v6, %v343_v4  ;;  %v346_v9 = vld [vmem:[#allocation8 + $0x28] sm:$0xff]  ;;  %v446_v11 = vld [vmem:[#allocation8 + $0x90] sm:$0xff]  ;;  %v447_v13 = vld [vmem:[#allocation8 + $0x98] sm:$0xff]  ;;  %s2789_s1 = sshll.u32 %s339_s23, 4  ;;  %s5530_s10 = scalar_lea.hbm %s5579_s5, %s2958_s24  ;;  %s5532_s1 = int_to_ptr.vmem [resolvable:$true] %s2789_s1 }
  0xb5   : > { %4003 = vmatpush3.bf16.msra.mxu0 %v4002_v5  ;;  %v445_v10 = vld [vmem:[#allocation8 + $0x88] sm:$0xff]  ;;  %v448_v14 = vld [vmem:[#allocation8 + $0xa0] sm:$0xff]  ;;  %v4008_v15 = vpack.c.bf16 %v346_v9, %v345_v8  ;;  %v347_v16 = vld [vmem:[#allocation8 + $0x30] sm:$0xff]  ;;  %s2776_s30 = scalar_lea.sflag [#allocation4], %s5262_s27  ;;  %s4916_s13 = scalar_lea.vmem %s5532_s1, 128 }
  0xb6   : > { %4004 = vmatprep.subr.bf16.mxu0 %v5001_v0  ;;  %v4026_v12 = vpack.c.bf16 %v446_v11, %v445_v10  ;;  %v348_v17 = vld [vmem:[#allocation8 + $0x38] sm:$0xff]  ;;  %v4029_v18 = vpack.c.bf16 %v448_v14, %v447_v13  ;;  %v449_v19 = vld [vmem:[#allocation8 + $0xa8] sm:$0xff]  ;;  %v450_v20 = vld [vmem:[#allocation8 + $0xb0] sm:$0xff]  ;;  %p4917_p6 = scmp.ne.s32.totalorder %s5532_s1, %s4916_s13  ;;  %p5621_p10 = scmp.ne.s32.totalorder %s5606_s9, 0 }
  0xb7   : > { %v4011_v21 = vpack.c.bf16 %v348_v17, %v347_v16  ;;  %v349_v22 = vld [vmem:[#allocation8 + $0x40] sm:$0xff]  ;;  %v350_v23 = vld [vmem:[#allocation8 + $0x48] sm:$0xff]  ;;  %v4032_v24 = vpack.c.bf16 %v450_v20, %v449_v19  ;;  %v451_v25 = vld [vmem:[#allocation8 + $0xb8] sm:$0xff]  ;;  %s5004_s22 = smov [#allocation11]  }
  0xb8   : > { %4027 = vmatpush3.bf16.msra.mxu1 %v4026_v12  ;;  %v452_v26 = vld [vmem:[#allocation8 + $0xc0] sm:$0xff]  ;;  %v4014_v27 = vpack.c.bf16 %v350_v23, %v349_v22  ;;  %v351_v28 = vld [vmem:[#allocation8 + $0x50] sm:$0xff]  ;;  %v352_v29 = vld [vmem:[#allocation8 + $0x58] sm:$0xff]  ;;  %p4918_p8 = pnand %p4917_p6, %p5621_p10  ;;  %s4920_s3 = sshll.u32 %s5004_s22, 4  ;;  %s4921_s3 = int_to_ptr.vmem [resolvable:$false] %s4920_s3 }
  0xb9   : > { %4006 = vmatpush3.bf16.msra.mxu0 %v4005_v7  ;;  %4028 = vmatprep.subr.bf16.mxu1 %v5001_v0  ;;  %v4035_v30 = vpack.c.bf16 %v452_v26, %v451_v25  ;;  %v453_v31 = vld [vmem:[#allocation8 + $0xc8] sm:$0xff]  ;;  %v454_v32 = vld [vmem:[#allocation8 + $0xd0] sm:$0xff]  ;;  %v4017_v33 = vpack.c.bf16 %v352_v29, %v351_v28  ;;  %v353_v34 = vld [vmem:[#allocation8 + $0x60] sm:$0xff]  ;;  %s4922_s11 = scalar_lea.vmem %s4921_s3, 256  ;;  %p4923_p11 = scmp.lt.s32.totalorder %s5532_s1, %s4921_s3 }
  0xba   : > { %4007 = vmatprep.subr.bf16.mxu0 %v5001_v0  ;;  %v354_v35 = vld [vmem:[#allocation8 + $0x68] sm:$0xff]  ;;  %v4038_v36 = vpack.c.bf16 %v454_v32, %v453_v31  ;;  %v455_v37 = vld [vmem:[#allocation8 + $0xd8] sm:$0xff]  ;;  %v456_v38 = vld [vmem:[#allocation8 + $0xe0] sm:$0xff]  ;;  %p4919_p9 = pneg %p4918_p8  ;;  %p4924_p4 = scmp.lt.s32.totalorder %s4922_s11, %s4916_s13 }
  0xbb   : > { %v4020_v39 = vpack.c.bf16 %v354_v35, %v353_v34  ;;  %v355_v40 = vld [vmem:[#allocation8 + $0x70] sm:$0xff]  ;;  %v356_v41 = vld [vmem:[#allocation8 + $0x78] sm:$0xff]  ;;  %v4041_v42 = vpack.c.bf16 %v456_v38, %v455_v37  ;;  %v457_v43 = vld [vmem:[#allocation8 + $0xe8] sm:$0xff] }
  0xbc   : > { %4030 = vmatpush3.bf16.msra.mxu1 %v4029_v18  ;;  %v458_v44 = vld [vmem:[#allocation8 + $0xf0] sm:$0xff]  ;;  %v4023_v45 = vpack.c.bf16 %v356_v41, %v355_v40  ;;  %v550_v47 = vld [vmem:[#allocation8 + $0x118] sm:$0xff]  ;;  %v460_v50 = vld [vmem:[#allocation8 + $0x100] sm:$0xff]  ;;  %p4925_p13 = por %p4924_p4, %p4923_p11 }
  0xbd   : > { %4009 = vmatpush3.bf16.msra.mxu0 %v4008_v15  ;;  %4031 = vmatprep.subr.bf16.mxu1 %v5001_v0  ;;  %v549_v46 = vld [vmem:[#allocation8 + $0x110] sm:$0xff]  ;;  %v4044_v48 = vpack.c.bf16 %v458_v44, %v457_v43  ;;  %v459_v49 = vld [vmem:[#allocation8 + $0xf8] sm:$0xff]  ;;  %v551_v53 = vld [vmem:[#allocation8 + $0x120] sm:$0xff] }
  0xbe   : > { %4010 = vmatprep.subr.bf16.mxu0 %v5001_v0  ;;  %v340_v51 = vld [vmem:[%s277_s14] sm:$0xff]  ;;  %v4050_v52 = vpack.c.bf16 %v550_v47, %v549_v46  ;;  %v552_v54 = vld [vmem:[#allocation8 + $0x128] sm:$0xff]  ;;  %v4047_v55 = vpack.c.bf16 %v460_v50, %v459_v49  ;;  %v555_v61 = vld [vmem:[#allocation8 + $0x140] sm:$0xff]  ;;  %p4926_p2 = pnand %p4925_p13, %p4919_p9 }
  0xbf   : > { %v4053_v56 = vpack.c.bf16 %v552_v54, %v551_v53  ;;  %v553_v57 = vld [vmem:[#allocation8 + $0x130] sm:$0xff]  ;;  %v554_v58 = vld [vmem:[#allocation8 + $0x138] sm:$0xff]  ;;  %v444_v59 = vld [vmem:[%s286_s17] sm:$0xff] }
  0xc0   : > { %4033 = vmatpush3.bf16.msra.mxu1 %v4032_v24  ;;  %v4056_v60 = vpack.c.bf16 %v554_v58, %v553_v57  ;;  %v556_v62 = vld [vmem:[#allocation8 + $0x148] sm:$0xff]  ;;  %v557_v2 = vld [vmem:[#allocation8 + $0x150] sm:$0xff]  ;;  %v558_v3 = vld [vmem:[#allocation8 + $0x158] sm:$0xff] }
  0xc1   : > { %4012 = vmatpush3.bf16.msra.mxu0 %v4011_v21  ;;  %4034 = vmatprep.subr.bf16.mxu1 %v5001_v0  ;;  %v4059_v63 = vpack.c.bf16 %v556_v62, %v555_v61  ;;  %v4062_v4 = vpack.c.bf16 %v558_v3, %v557_v2  ;;  %v559_v5 = vld [vmem:[#allocation8 + $0x160] sm:$0xff]  ;;  %v560_v6 = vld [vmem:[#allocation8 + $0x168] sm:$0xff]  ;;  %v561_v8 = vld [vmem:[#allocation8 + $0x170] sm:$0xff] }
  0xc2   : > { %4013 = vmatprep.subr.bf16.mxu0 %v5001_v0  ;;  %v4065_v7 = vpack.c.bf16 %v560_v6, %v559_v5  ;;  %v562_v9 = vld [vmem:[#allocation8 + $0x178] sm:$0xff]  ;;  %v563_v11 = vld [vmem:[#allocation8 + $0x180] sm:$0xff]  ;;  %v564_v12 = vld [vmem:[#allocation8 + $0x188] sm:$0xff] }
  0xc3   : > { %v4068_v10 = vpack.c.bf16 %v562_v9, %v561_v8  ;;  %v4071_v13 = vpack.c.bf16 %v564_v12, %v563_v11  ;;  %v548_v14 = vld [vmem:[%s295_s29] sm:$0xff]  ;;  %v738_v16 = vld [vmem:[#allocation10 + $0x2b0] sm:$0xff]  ;;  %v735_v17 = vld [vmem:[#allocation10 + $0x298] sm:$0xff] }
  0xc4   : > { %4036 = vmatpush3.bf16.msra.mxu1 %v4035_v30  ;;  %v733_v15 = vld [vmem:[#allocation10 + $0x288] sm:$0xff]  ;;  %v740_v19 = vld [vmem:[#allocation10 + $0x2c0] sm:$0xff]  ;;  %v734_v24 = vld [vmem:[#allocation10 + $0x290] sm:$0xff] }
  0xc5   : > { %4015 = vmatpush3.bf16.msra.mxu0 %v4014_v27  ;;  %4037 = vmatprep.subr.bf16.mxu1 %v5001_v0  ;;  %v4073_v18 = vpack.c.bf16 %v738_v16, %v733_v15  ;;  %v732_v20 = vld [vmem:[#allocation10 + $0x280] sm:$0xff]  ;;  %v737_v21 = vld [vmem:[#allocation10 + $0x2a8] sm:$0xff]  ;;  %v4105_v22 = vpack.c.bf16 %v740_v19, %v735_v17  ;;  %v739_v25 = vld [vmem:[#allocation10 + $0x2b8] sm:$0xff] }
  0xc6   : > { %4016 = vmatprep.subr.bf16.mxu0 %v5001_v0  ;;  %v4075_v23 = vpack.c.bf16 %v737_v21, %v732_v20  ;;  %v4107_v26 = vpack.c.bf16 %v739_v25, %v734_v24  ;;  %v743_v27 = vld [vmem:[#allocation10 + $0x2d8] sm:$0xff]  ;;  %v748_v28 = vld [vmem:[#allocation10 + $0x300] sm:$0xff]  ;;  %v745_v29 = vld [vmem:[#allocation10 + $0x2e8] sm:$0xff] }
  0xc7   : > { %v4077_v30 = vpack.c.bf16 %v748_v28, %v743_v27  ;;  %v750_v31 = vld [vmem:[#allocation10 + $0x310] sm:$0xff]  ;;  %v749_v37 = vld [vmem:[#allocation10 + $0x308] sm:$0xff]  ;;  %v755_v41 = vld [vmem:[#allocation10 + $0x338] sm:$0xff] }
  0xc8   : > { %4039 = vmatpush3.bf16.msra.mxu1 %v4038_v36  ;;  %v742_v32 = vld [vmem:[#allocation10 + $0x2d0] sm:$0xff]  ;;  %v4109_v34 = vpack.c.bf16 %v750_v31, %v745_v29  ;;  %v744_v36 = vld [vmem:[#allocation10 + $0x2e0] sm:$0xff]  ;;  %v759_v49 = vld [vmem:[#allocation10 + $0x358] sm:$0xff] }
  0xc9   : > { %4018 = vmatpush3.bf16.msra.mxu0 %v4017_v33  ;;  %4040 = vmatprep.subr.bf16.mxu1 %v5001_v0  ;;  %v747_v33 = vld [vmem:[#allocation10 + $0x2f8] sm:$0xff]  ;;  %v4111_v38 = vpack.c.bf16 %v749_v37, %v744_v36  ;;  %v758_v40 = vld [vmem:[#allocation10 + $0x350] sm:$0xff]  ;;  %v760_v43 = vld [vmem:[#allocation10 + $0x360] sm:$0xff] }
  0xca   : > { %4019 = vmatprep.subr.bf16.mxu0 %v5001_v0  ;;  %v4079_v35 = vpack.c.bf16 %v747_v33, %v742_v32  ;;  %v752_v44 = vld [vmem:[#allocation10 + $0x320] sm:$0xff]  ;;  %v4113_v46 = vpack.c.bf16 %v760_v43, %v755_v41  ;;  %v765_v53 = vld [vmem:[#allocation10 + $0x388] sm:$0xff]  ;;  %v767_v57 = vld [vmem:[#allocation10 + $0x398] sm:$0xff] }
  0xcb   : > { %v769_v61 = vld [vmem:[#allocation10 + $0x3a8] sm:$0xff]  ;;  %v778_v2 = vld [vmem:[#allocation10 + $0x3f0] sm:$0xff]  ;;  %v775_v3 = vld [vmem:[#allocation10 + $0x3d8] sm:$0xff] }
  0xcc   : > { %4042 = vmatpush3.bf16.msra.mxu1 %v4041_v42  ;;  %v780_v5 = vld [vmem:[#allocation10 + $0x400] sm:$0xff]  ;;  %v779_v11 = vld [vmem:[#allocation10 + $0x3f8] sm:$0xff]  ;;  %v785_v15 = vld [vmem:[#allocation10 + $0x428] sm:$0xff] }
  0xcd   : > { %4021 = vmatpush3.bf16.msra.mxu0 %v4020_v39  ;;  %4043 = vmatprep.subr.bf16.mxu1 %v5001_v0  ;;  %v753_v39 = vld [vmem:[#allocation10 + $0x328] sm:$0xff]  ;;  %v772_v6 = vld [vmem:[#allocation10 + $0x3c0] sm:$0xff]  ;;  %v4121_v8 = vpack.c.bf16 %v780_v5, %v775_v3  ;;  %v783_v12 = vld [vmem:[#allocation10 + $0x418] sm:$0xff] }
  0xce   : > { %4022 = vmatprep.subr.bf16.mxu0 %v5001_v0  ;;  %v4081_v42 = vpack.c.bf16 %v758_v40, %v753_v39  ;;  %v790_v16 = vld [vmem:[#allocation10 + $0x450] sm:$0xff]  ;;  %v787_v20 = vld [vmem:[#allocation10 + $0x438] sm:$0xff]  ;;  %v784_v21 = vld [vmem:[#allocation10 + $0x420] sm:$0xff] }
  0xcf   : > { %v782_v19 = vld [vmem:[#allocation10 + $0x410] sm:$0xff]  ;;  %v793_v24 = vld [vmem:[#allocation10 + $0x468] sm:$0xff]  ;;  %v795_v28 = vld [vmem:[#allocation10 + $0x478] sm:$0xff] }
  0xd0   : > { %4045 = vmatpush3.bf16.msra.mxu1 %v4044_v48  ;;  %v754_v48 = vld [vmem:[#allocation10 + $0x330] sm:$0xff]  ;;  %v800_v29 = vld [vmem:[#allocation10 + $0x4a0] sm:$0xff]  ;;  %v797_v32 = vld [vmem:[#allocation10 + $0x488] sm:$0xff] }
  0xd1   : > { %4024 = vmatpush3.bf16.msra.mxu0 %v4023_v45  ;;  %4046 = vmatprep.subr.bf16.mxu1 %v5001_v0  ;;  %v757_v45 = vld [vmem:[#allocation10 + $0x348] sm:$0xff]  ;;  %v4115_v50 = vpack.c.bf16 %v759_v49, %v754_v48  ;;  %v798_v25 = vld [vmem:[#allocation10 + $0x490] sm:$0xff]  ;;  %v4129_v31 = vpack.c.bf16 %v800_v29, %v795_v28  ;;  %v803_v36 = vld [vmem:[#allocation10 + $0x4b8] sm:$0xff] }
  0xd2   : > { %4049 = vmatprep.subr.bf16.mxu0 %v5001_v0  ;;  %v4083_v47 = vpack.c.bf16 %v757_v45, %v752_v44  ;;  %v4097_v27 = vpack.c.bf16 %v798_v25, %v793_v24  ;;  %v794_v33 = vld [vmem:[#allocation10 + $0x470] sm:$0xff]  ;;  %v808_v37 = vld [vmem:[#allocation10 + $0x4e0] sm:$0xff]  ;;  %v807_v43 = vld [vmem:[#allocation10 + $0x4d8] sm:$0xff] }
  0xd3   : > { %v4101_v40 = vpack.c.bf16 %v808_v37, %v803_v36  ;;  %v810_v41 = vld [vmem:[#allocation10 + $0x4f0] sm:$0xff]  ;;  %v804_v45 = vld [vmem:[#allocation10 + $0x4c0] sm:$0xff]  ;;  %v669_v28 = vld [vmem:[#allocation10 + $0x88] sm:$0xff] }
  0xd4   : > { %3334 = vmatmul.mubr.f32.vlgmr.msra.gmra.mrb[0].mxu0 %v340_v51  ;;  %4048 = vmatpush3.bf16.msra.mxu1 %v4047_v55  ;;  %v763_v51 = vld [vmem:[#allocation10 + $0x378] sm:$0xff]  ;;  %v770_v55 = vld [vmem:[#allocation10 + $0x3b0] sm:$0xff]  ;;  %v660_v48 = vld [vmem:[#allocation10 + $0x40] sm:$0xff] }
  0xd5   : > { %4051 = vmatpush3.bf16.msra.mxu0 %v4050_v52  ;;  %3403 = vmatprep.mubr.msk.f32.mxu0 %vm5002_vm0, %v5003_v1  ;;  %v768_v52 = vld [vmem:[#allocation10 + $0x3a0] sm:$0xff]  ;;  %v4117_v58 = vpack.c.bf16 %v770_v55, %v765_v53 }
  0xd6   : > { %4052 = vmatprep.subr.bf16.mxu0 %v5001_v0  ;;  %4074 = vmatprep.subr.bf16.mxu1 %v4073_v18  ;;  %v4085_v54 = vpack.c.bf16 %v768_v52, %v763_v51  ;;  %v4125_v18 = vpack.c.bf16 %v790_v16, %v785_v15  ;;  %v659_v15 = vld [vmem:[#allocation10 + $0x38] sm:$0xff] }
  0xd7   : > { %3369 = vmatmul.mubr.f32.vlgmr.msra.gmra.mrb[0].mxu1 %v444_v59 }
  0xd8   : > { %876 = vmatprep.mubr.f32.mxu1 %v5003_v1  ;;  %4076 = vmatpush1.bf16.msra.mxu1 %v4075_v23  ;;  %v789_v23 = vld [vmem:[#allocation10 + $0x448] sm:$0xff] }
  0xd9   : > { %4054 = vmatpush3.bf16.msra.mxu0 %v4053_v56  ;;  %4078 = vmatprep.subr.bf16.mxu1 %v4077_v30  ;;  %v762_v56 = vld [vmem:[#allocation10 + $0x370] sm:$0xff]  ;;  %v792_v30 = vld [vmem:[#allocation10 + $0x460] sm:$0xff] }
  0xda   : > { %4055 = vmatprep.subr.bf16.mxu0 %v5001_v0  ;;  %v4087_v59 = vpack.c.bf16 %v767_v57, %v762_v56  ;;  %v2941_v56 = vld [vmem:[#allocation8 + $0x190] ss:$0 sm:$0xff] }
  0xdc   : > { %4080 = vmatpush1.bf16.msra.mxu1 %v4079_v35  ;;  %v4099_v35 = vpack.c.bf16 %v797_v32, %v792_v30  ;;  %v675_v30 = vld [vmem:[#allocation10 + $0xb8] sm:$0xff] }
  0xdd   : > { %4057 = vmatpush3.bf16.msra.mxu0 %v4056_v60  ;;  %4082 = vmatprep.subr.bf16.mxu1 %v4081_v42  ;;  %v764_v60 = vld [vmem:[#allocation10 + $0x380] sm:$0xff]  ;;  %v802_v42 = vld [vmem:[#allocation10 + $0x4b0] sm:$0xff] }
  0xde   : > { %4058 = vmatprep.subr.bf16.mxu0 %v5001_v0  ;;  %v4119_v62 = vpack.c.bf16 %v769_v61, %v764_v60  ;;  %v4103_v49 = vpack.c.bf16 %v807_v43, %v802_v42  ;;  %v690_v42 = vld [vmem:[#allocation10 + $0x130] sm:$0xff] }
  0xe0   : > { %4084 = vmatpush1.bf16.msra.mxu1 %v4083_v47  ;;  %v655_v47 = vld [vmem:[#allocation10 + $0x18] sm:$0xff] }
  0xe1   : > { %4060 = vmatpush3.bf16.msra.mxu0 %v4059_v63  ;;  %4086 = vmatprep.subr.bf16.mxu1 %v4085_v54  ;;  %v773_v63 = vld [vmem:[#allocation10 + $0x3c8] sm:$0xff]  ;;  %v4193_v51 = vpack.c.bf16 %v660_v48, %v655_v47  ;;  %v771_v48 = vld [vmem:[#allocation10 + $0x3b8] sm:$0xff] }
  0xe2   : > { %4061 = vmatprep.subr.bf16.mxu0 %v5001_v0 }
  0xe4   : > { %4088 = vmatpush1.bf16.msra.mxu1 %v4087_v59 }
  0xe5   : > { %4063 = vmatpush3.bf16.msra.mxu0 %v4062_v4  ;;  %v4089_v4 = vpack.c.bf16 %v778_v2, %v773_v63 }
  0xe6   : > { %4064 = vmatprep.subr.bf16.mxu0 %v5001_v0 }
  0xe7   : > { %4090 = vmatprep.subr.bf16.mxu1 %v4089_v4 }
  0xe9   : > { %4066 = vmatpush3.bf16.msra.mxu0 %v4065_v7  ;;  %v777_v7 = vld [vmem:[#allocation10 + $0x3e8] sm:$0xff] }
  0xea   : > { %4067 = vmatprep.subr.bf16.mxu0 %v5001_v0  ;;  %v4091_v9 = vpack.c.bf16 %v777_v7, %v772_v6 }
  0xec   : > { %4092 = vmatpush1.bf16.msra.mxu1 %v4091_v9 }
  0xed   : > { %4069 = vmatpush3.bf16.msra.mxu0 %v4068_v10  ;;  %v774_v10 = vld [vmem:[#allocation10 + $0x3d0] sm:$0xff] }
  0xee   : > { %4070 = vmatprep.subr.bf16.mxu0 %v5001_v0 }
  0xf1   : > { %4072 = vmatpush3.bf16.msra.mxu0 %v4071_v13  ;;  %v4123_v13 = vpack.c.bf16 %v779_v11, %v774_v10  ;;  %v736_v11 = vld [vmem:[#allocation10 + $0x2a0] sm:$0xff] }
  0xf2   : > { %4106 = vmatprep.subr.bf16.mxu0 %v4105_v22  ;;  %v4095_v22 = vpack.c.bf16 %v787_v20, %v782_v19  ;;  %v2939_v19 = vld [vmem:[#allocation8 + $0x80] ss:$0 sm:$0xff] }
  0xf4   : > { %3404 = vmatmul.mubr.f32.vlgmr.msra.gmra.mrb[2].mxu0 %v548_v14  ;;  %v788_v14 = vld [vmem:[#allocation10 + $0x440] sm:$0xff] }
  0xf5   : > { %947 = vmatprep.mubr.f32.mxu0 %v5003_v1  ;;  %4108 = vmatpush1.bf16.msra.mxu0 %v4107_v26  ;;  %v4093_v17 = vpack.c.bf16 %v788_v14, %v783_v12  ;;  %v4127_v26 = vpack.c.bf16 %v789_v23, %v784_v21  ;;  %v654_v14 = vld [vmem:[#allocation10 + $0x10] sm:$0xff] }
  0xf6   : > { %4110 = vmatprep.subr.bf16.mxu0 %v4109_v34  ;;  %v799_v34 = vld [vmem:[#allocation10 + $0x498] sm:$0xff]  ;;  %v746_v23 = vld [vmem:[#allocation10 + $0x2f0] sm:$0xff] }
  0xf7   : > { %4094 = vmatprep.subr.bf16.mxu1 %v4093_v17  ;;  %v4131_v39 = vpack.c.bf16 %v799_v34, %v794_v33  ;;  %v665_v17 = vld [vmem:[#allocation10 + $0x68] sm:$0xff] }
  0xf8   : > { %4096 = vmatpush1.bf16.msra.mxu1 %v4095_v22  ;;  %v4195_v22 = vpack.c.bf16 %v659_v15, %v654_v14  ;;  %v796_v14 = vld [vmem:[#allocation10 + $0x480] sm:$0xff] }
  0xf9   : > { %4112 = vmatpush1.bf16.msra.mxu0 %v4111_v38  ;;  %v805_v38 = vld [vmem:[#allocation10 + $0x4c8] sm:$0xff]  ;;  %4098 = vmatprep.subr.bf16.mxu1 %v4097_v27  ;;  %v664_v27 = vld [vmem:[#allocation10 + $0x60] sm:$0xff] }
  0xfa   : > { %4114 = vmatprep.subr.bf16.mxu0 %v4113_v46  ;;  %v4133_v44 = vpack.c.bf16 %v810_v41, %v805_v38  ;;  %v809_v46 = vld [vmem:[#allocation10 + $0x4e8] sm:$0xff]  ;;  %v4199_v34 = vpack.c.bf16 %v669_v28, %v664_v27  ;;  %v724_v27 = vld [vmem:[#allocation10 + $0x240] sm:$0xff] }
  0xfb   : > { %v761_v38 = vld [vmem:[#allocation10 + $0x368] sm:$0xff] }
  0xfc   : > { %4100 = vmatpush1.bf16.msra.mxu1 %v4099_v35  ;;  %v756_v35 = vld [vmem:[#allocation10 + $0x340] sm:$0xff]  ;;  %v685_v41 = vld [vmem:[#allocation10 + $0x108] sm:$0xff] }
  0xfd   : > { %4116 = vmatpush1.bf16.msra.mxu0 %v4115_v50  ;;  %4102 = vmatprep.subr.bf16.mxu1 %v4101_v40  ;;  %v4135_v50 = vpack.c.bf16 %v809_v46, %v804_v45  ;;  %v679_v40 = vld [vmem:[#allocation10 + $0xd8] sm:$0xff]  ;;  %v766_v46 = vld [vmem:[#allocation10 + $0x390] sm:$0xff]  ;;  %v4205_v47 = vpack.c.bf16 %v690_v42, %v685_v41  ;;  %v729_v28 = vld [vmem:[#allocation10 + $0x268] sm:$0xff] }
  0xfe   : > { %4118 = vmatprep.subr.bf16.mxu0 %v4117_v58  ;;  %v1236_v41 = vld [vmem:[#allocation8 + $0x198] sm:$0xff]  ;;  %v1237_v42 = vld [vmem:[#allocation8 + $0x1a0] sm:$0xff] }
 0x100   : > { %4104 = vmatpush1.bf16.msra.mxu1 %v4103_v49  ;;  %v684_v49 = vld [vmem:[#allocation10 + $0x100] sm:$0xff] }
 0x101   : > { %4120 = vmatpush1.bf16.msra.mxu0 %v4119_v62  ;;  %4137 = vmatprep.subr.bf16.mxu1 %v5001_v0  ;;  %v2940_v62 = vld [vmem:[#allocation8 + $0x108] ss:$0 sm:$0xff] }
 0x102   : > { %4122 = vmatprep.subr.bf16.mxu0 %v4121_v8 }
 0x105   : > { %4124 = vmatpush1.bf16.msra.mxu0 %v4123_v13  ;;  %v741_v13 = vld [vmem:[#allocation10 + $0x2c8] sm:$0xff] }
 0x106   : > { %4126 = vmatprep.subr.bf16.mxu0 %v4125_v18  ;;  %v670_v18 = vld [vmem:[#allocation10 + $0x90] sm:$0xff]  ;;  %v4138_v21 = vpack.c.bf16 %v741_v13, %v736_v11 }
 0x107   : > { %v4197_v25 = vpack.c.bf16 %v670_v18, %v665_v17  ;;  %v714_v17 = vld [vmem:[#allocation10 + $0x1f0] sm:$0xff]  ;;  %v719_v18 = vld [vmem:[#allocation10 + $0x218] sm:$0xff] }
 0x109   : > { %4128 = vmatpush1.bf16.msra.mxu0 %v4127_v26  ;;  %v751_v26 = vld [vmem:[#allocation10 + $0x318] sm:$0xff] }
 0x10a   : > { %4130 = vmatprep.subr.bf16.mxu0 %v4129_v31  ;;  %v680_v31 = vld [vmem:[#allocation10 + $0xe0] sm:$0xff]  ;;  %v4141_v33 = vpack.c.bf16 %v751_v26, %v746_v23  ;;  %v4219_v23 = vpack.c.bf16 %v719_v18, %v714_v17  ;;  %v811_v26 = vld [vmem:[#allocation10 + $0x4f8] sm:$0xff]  ;;  %v697_v17 = vld [vmem:[#allocation10 + $0x168] sm:$0xff] }
 0x10b   : > { %v4201_v37 = vpack.c.bf16 %v680_v31, %v675_v30  ;;  %v653_v31 = vld [vmem:[#allocation10 + $0x8] sm:$0xff] }
 0x10c   : > { %v1244_v18 = vld [vmem:[#allocation8 + $0x1d8] sm:$0xff] }
 0x10d   : > { %4132 = vmatpush1.bf16.msra.mxu0 %v4131_v39  ;;  %v674_v39 = vld [vmem:[#allocation10 + $0xb0] sm:$0xff] }
 0x10e   : > { %4134 = vmatprep.subr.bf16.mxu0 %v4133_v44  ;;  %v4144_v44 = vpack.c.bf16 %v761_v38, %v756_v35  ;;  %v4203_v45 = vpack.c.bf16 %v679_v40, %v674_v39  ;;  %v657_v40 = vld [vmem:[#allocation10 + $0x28] sm:$0xff] }
 0x111   : > { %4136 = vmatpush1.bf16.msra.mxu0 %v4135_v50  ;;  %v689_v50 = vld [vmem:[#allocation10 + $0x128] sm:$0xff] }
 0x112   : > { %4194 = vmatprep.subr.bf16.mxu0 %v4193_v51  ;;  %v695_v51 = vld [vmem:[#allocation10 + $0x158] sm:$0xff] }
 0x1a7   : > { %v428_v52 = vpop.f32.mrb[0].mxu0 }
 0x1a8   : > { %v3335_v53 = vpop.f32.mrb[1].mxu0  ;;  %v5330_v32 = vadd.f32 %v2939_v19, %v428_v52  ;;  %v700_v52 = vld [vmem:[#allocation10 + $0x180] sm:$0xff]  ;;  %v725_v19 = vld [vmem:[#allocation10 + $0x248] sm:$0xff] }
 0x1aa   : > { %v532_v54 = vpop.f32.mrb[0].mxu1  ;;  %v432_v43 = vmin.f32 %v5330_v32, 20.0  ;;  %vm436_vm3 = vcmp.gt.f32.partialorder %v5330_v32, 20.0 }
 0x1ab   : > { %v3370_v55 = vpop.f32.mrb[1].mxu1  ;;  %v5323_v63 = vadd.f32 %v2940_v62, %v532_v54  ;;  %v4147_v54 = vpack.c.bf16 %v771_v48, %v766_v46  ;;  %v710_v62 = vld [vmem:[#allocation10 + $0x1d0] sm:$0xff] }
 0x1ac   : > { %v433_v53 = vmul.f32 1.442695, %v432_v43  ;;  %v4207_v55 = vpack.c.bf16 %v689_v50, %v684_v49  ;;  %v662_v48 = vld [vmem:[#allocation10 + $0x50] sm:$0xff] }
 0x1ad   : > { %v536_v2 = vmin.f32 %v5323_v63, 20.0  ;;  %vm540_vm2 = vcmp.gt.f32.partialorder %v5323_v63, 20.0 }
 0x1af   : > { %v537_v5 = vmul.f32 1.442695, %v536_v2 }
 0x1c7   : > { %v636_v57 = vpop.f32.mrb[2].mxu0 }
 0x1c8   : > { %v637_v58 = vadd.f32 %v2941_v56, %v636_v57  ;;  %v3405_v59 = vpop.f32.mrb[3].mxu0  ;;  %v776_v56 = vld [vmem:[#allocation10 + $0x3e0] sm:$0xff]  ;;  %v4209_v57 = vpack.c.bf16 %v700_v52, %v695_v51  ;;  %v667_v51 = vld [vmem:[#allocation10 + $0x78] sm:$0xff] }
 0x1c9   : > { %v694_v59 = vld [vmem:[#allocation10 + $0x150] sm:$0xff]  ;;  %v1238_v52 = vld [vmem:[#allocation8 + $0x1a8] sm:$0xff] }
 0x1ca   : > { %v640_v60 = vmin.f32 %v637_v58, 20.0  ;;  %vm644_vm1 = vcmp.gt.f32.partialorder %v637_v58, 20.0 }
 0x1cc   : > { %v641_v61 = vmul.f32 1.442695, %v640_v60  ;;  %v699_v60 = vld [vmem:[#allocation10 + $0x178] sm:$0xff] }
 0x1ce   : > { %4702 = vpow2.f32 %v641_v61  ;;  %v705_v61 = vld [vmem:[#allocation10 + $0x1a8] sm:$0xff] }
 0x1cf   : > { %4704 = vpow2.f32 %v537_v5  ;;  %v4213_v5 = vpack.c.bf16 %v710_v62, %v705_v61  ;;  %v677_v62 = vld [vmem:[#allocation10 + $0xc8] sm:$0xff] }
 0x1d8   : > { %v4703_v3 = vpop.eup %4702 }
 0x1d9   : > { %v643_v4 = vadd.f32 1.0, %v4703_v3  ;;  %v4705_v8 = vpop.eup %4704  ;;  %v4211_v3 = vpack.c.bf16 %v699_v60, %v694_v59  ;;  %v672_v59 = vld [vmem:[#allocation10 + $0xa0] sm:$0xff] }
 0x1da   : > { %v539_v12 = vadd.f32 1.0, %v4705_v8  ;;  %v709_v8 = vld [vmem:[#allocation10 + $0x1c8] sm:$0xff] }
 0x1db   : > { %v645_v6 = vmul.f32 %v643_v4, %v643_v4  ;;  %v786_v4 = vld [vmem:[#allocation10 + $0x430] sm:$0xff] }
 0x1dc   : > { %v541_v24 = vmul.f32 %v539_v12, %v539_v12 }
 0x1dd   : > { %v646_v7 = vadd.f32 1.0, %v645_v6  ;;  %v791_v6 = vld [vmem:[#allocation10 + $0x458] sm:$0xff] }
 0x1de   : > { %v542_v36 = vadd.f32 1.0, %v541_v24  ;;  %v4153_v12 = vpack.c.bf16 %v791_v6, %v786_v4  ;;  %v806_v24 = vld [vmem:[#allocation10 + $0x4d0] sm:$0xff]  ;;  %v688_v4 = vld [vmem:[#allocation10 + $0x120] sm:$0xff] }
 0x1df   : > { %4706 = vrcp.f32 %v646_v7  ;;  %v704_v7 = vld [vmem:[#allocation10 + $0x1a0] sm:$0xff]  ;;  %v4159_v35 = vpack.c.bf16 %v811_v26, %v806_v24  ;;  %v682_v6 = vld [vmem:[#allocation10 + $0xf0] sm:$0xff]  ;;  %v707_v26 = vld [vmem:[#allocation10 + $0x1b8] sm:$0xff] }
 0x1e0   : > { %4708 = vrcp.f32 %v542_v36  ;;  %v4215_v13 = vpack.c.bf16 %v709_v8, %v704_v7  ;;  %v4223_v36 = vpack.c.bf16 %v729_v28, %v724_v27  ;;  %v687_v8 = vld [vmem:[#allocation10 + $0x118] sm:$0xff]  ;;  %v702_v24 = vld [vmem:[#allocation10 + $0x190] sm:$0xff]  ;;  %v1247_v28 = vld [vmem:[#allocation8 + $0x1f0] sm:$0xff] }
 0x1e1   : > { %4710 = vpow2.f32 %v433_v53  ;;  %v1239_v53 = vld [vmem:[#allocation8 + $0x1b0] sm:$0xff]  ;;  %v1246_v27 = vld [vmem:[#allocation8 + $0x1e8] sm:$0xff] }
 0x1e9   : > { %v4707_v9 = vpop.eup %4706 }
 0x1ea   : > { %v648_v10 = vmul.f32 2.0, %v4707_v9  ;;  %v715_v9 = vld [vmem:[#allocation10 + $0x1f8] sm:$0xff]  ;;  %v4709_v11 = vpop.eup %4708 }
 0x1eb   : > { %v4711_v30 = vpop.eup %4710 }
 0x1ec   : > { %v649_v16 = vsub.f32 1.0, %v648_v10  ;;  %v720_v10 = vld [vmem:[#allocation10 + $0x220] sm:$0xff]  ;;  %v435_v38 = vadd.f32 1.0, %v4711_v30  ;;  %v713_v30 = vld [vmem:[#allocation10 + $0x1e8] sm:$0xff] }
 0x1ed   : > { %v4217_v15 = vpack.c.bf16 %v720_v10, %v715_v9  ;;  %v1242_v9 = vld [vmem:[#allocation8 + $0x1c8] sm:$0xff]  ;;  %v1243_v10 = vld [vmem:[#allocation8 + $0x1d0] sm:$0xff] }
 0x1ee   : > { %v650_v20 = vmul.f32 %v649_v16, %v637_v58  ;;  %v801_v16 = vld [vmem:[#allocation10 + $0x4a8] sm:$0xff]  ;;  %v437_v49 = vmul.f32 %v435_v38, %v435_v38 }
 0x1ef   : > { %v717_v38 = vld [vmem:[#allocation10 + $0x208] sm:$0xff] }
 0x1f0   : > { %v5326_v29 = vsel %vm644_vm1, %v637_v58, %v650_v20  ;;  %v781_v58 = vld [vmem:[#allocation10 + $0x408] sm:$0xff]  ;;  %v730_v20 = vld [vmem:[#allocation10 + $0x270] sm:$0xff]  ;;  %v438_v60 = vadd.f32 1.0, %v437_v49  ;;  %v1250_v49 = vld [vmem:[#allocation8 + $0x208] sm:$0xff] }
 0x1f1   : > { %877 = vmatmul.mubr.f32.vlgmr.msra.gmra.mrb[2].mxu1 %v5326_v29  ;;  %948 = vmatmul.mubr.f32.vlgmr.msra.gmra.mrb[4].mxu0 %v5326_v29  ;;  %v4150_v2 = vpack.c.bf16 %v781_v58, %v776_v56  ;;  %v678_v56 = vld [vmem:[#allocation10 + $0xd0] sm:$0xff]  ;;  %v4253_v58 = vpack.c.bf16 %v1239_v53, %v1238_v52 }
 0x1f2   : > { %4139 = vmatpush3.bf16.msra.mxu1 %v4138_v21  ;;  %4196 = vmatpush1.bf16.msra.mxu0 %v4195_v22  ;;  %v544_v21 = vmul.f32 2.0, %v4709_v11  ;;  %v4156_v22 = vpack.c.bf16 %v801_v16, %v796_v14  ;;  %4712 = vrcp.f32 %v438_v60  ;;  %v693_v11 = vld [vmem:[#allocation10 + $0x148] sm:$0xff]  ;;  %v4259_v14 = vpack.c.bf16 %v1243_v10, %v1242_v9  ;;  %v671_v60 = vld [vmem:[#allocation10 + $0x98] sm:$0xff] }
 0x1f3   : > { %4140 = vmatprep.subr.bf16.mxu1 %v5001_v0  ;;  %4198 = vmatprep.subr.bf16.mxu0 %v4197_v25  ;;  %v4221_v25 = vpack.c.bf16 %v730_v20, %v725_v19  ;;  %v1245_v19 = vld [vmem:[#allocation8 + $0x1e0] sm:$0xff]  ;;  %v703_v20 = vld [vmem:[#allocation10 + $0x198] sm:$0xff] }
 0x1f4   : > { %3438 = vmatprep.mubr.msk.f32.mxu1 %vm5002_vm0, %v5003_v1  ;;  %1159 = vmatprep.mubr.f32.mxu0 %v5003_v1  ;;  %v711_v9 = vld [vmem:[#allocation10 + $0x1d8] sm:$0xff] }
 0x1f6   : > { %4142 = vmatpush3.bf16.msra.mxu1 %v4141_v33  ;;  %4200 = vmatpush1.bf16.msra.mxu0 %v4199_v34  ;;  %v658_v33 = vld [vmem:[#allocation10 + $0x30] sm:$0xff]  ;;  %v545_v34 = vsub.f32 1.0, %v544_v21  ;;  %v708_v21 = vld [vmem:[#allocation10 + $0x1c0] sm:$0xff] }
 0x1f7   : > { %4143 = vmatprep.subr.bf16.mxu1 %v5001_v0  ;;  %4202 = vmatprep.subr.bf16.mxu0 %v4201_v37  ;;  %v652_v37 = vld [vmem:[#allocation10] sm:$0xff]  ;;  %v4161_v39 = vpack.c.bf16 %v658_v33, %v653_v31  ;;  %v718_v31 = vld [vmem:[#allocation10 + $0x210] sm:$0xff] }
 0x1f8   : > { %v546_v43 = vmul.f32 %v545_v34, %v5323_v63  ;;  %v4163_v46 = vpack.c.bf16 %v657_v40, %v652_v37  ;;  %v4183_v34 = vpack.c.bf16 %v707_v26, %v702_v24  ;;  %v4185_v37 = vpack.c.bf16 %v718_v31, %v713_v30  ;;  %v1249_v40 = vld [vmem:[#allocation8 + $0x200] sm:$0xff]  ;;  %v1345_v24 = vld [vmem:[#allocation8 + $0x248] sm:$0xff]  ;;  %v1346_v26 = vld [vmem:[#allocation8 + $0x250] sm:$0xff] }
 0x1f9   : > { %v1349_v30 = vld [vmem:[#allocation8 + $0x268] sm:$0xff] }
 0x1fa   : > { %4145 = vmatpush3.bf16.msra.mxu1 %v4144_v44  ;;  %4204 = vmatpush1.bf16.msra.mxu0 %v4203_v45  ;;  %v663_v44 = vld [vmem:[#allocation10 + $0x58] sm:$0xff]  ;;  %v668_v45 = vld [vmem:[#allocation10 + $0x80] sm:$0xff] }
 0x1fb   : > { %4146 = vmatprep.subr.bf16.mxu1 %v5001_v0  ;;  %4206 = vmatprep.subr.bf16.mxu0 %v4205_v47  ;;  %v4250_v47 = vpack.c.bf16 %v1237_v42, %v1236_v41  ;;  %v4165_v50 = vpack.c.bf16 %v668_v45, %v663_v44  ;;  %v723_v41 = vld [vmem:[#allocation10 + $0x238] sm:$0xff]  ;;  %v728_v42 = vld [vmem:[#allocation10 + $0x260] sm:$0xff] }
 0x1fc   : > { %v4713_v33 = vpop.eup %4712 }
 0x1fe   : > { %4148 = vmatpush3.bf16.msra.mxu1 %v4147_v54  ;;  %4208 = vmatpush1.bf16.msra.mxu0 %v4207_v55  ;;  %v5347_v54 = vsel %vm540_vm2, %v5323_v63, %v546_v43  ;;  %v673_v55 = vld [vmem:[#allocation10 + $0xa8] sm:$0xff]  ;;  %v1241_v63 = vld [vmem:[#allocation8 + $0x1c0] sm:$0xff]  ;;  %v440_v43 = vmul.f32 2.0, %v4713_v33  ;;  %v1350_v33 = vld [vmem:[#allocation8 + $0x270] sm:$0xff] }
 0x1ff   : > { %4149 = vmatprep.subr.bf16.mxu1 %v5001_v0  ;;  %4210 = vmatprep.subr.bf16.mxu0 %v4209_v57  ;;  %v4167_v57 = vpack.c.bf16 %v667_v51, %v662_v48  ;;  %v4169_v61 = vpack.c.bf16 %v678_v56, %v673_v55  ;;  %v727_v48 = vld [vmem:[#allocation10 + $0x258] sm:$0xff]  ;;  %v656_v55 = vld [vmem:[#allocation10 + $0x20] sm:$0xff]  ;;  %v661_v56 = vld [vmem:[#allocation10 + $0x48] sm:$0xff] }
 0x200   : > { %v441_v51 = vsub.f32 1.0, %v440_v43 }
 0x202   : > { %4151 = vmatpush3.bf16.msra.mxu1 %v4150_v2  ;;  %4212 = vmatpush1.bf16.msra.mxu0 %v4211_v3  ;;  %v1240_v2 = vld [vmem:[#allocation8 + $0x1b8] sm:$0xff]  ;;  %v683_v3 = vld [vmem:[#allocation10 + $0xf8] sm:$0xff] }
 0x203   : > { %4152 = vmatprep.subr.bf16.mxu1 %v5001_v0  ;;  %4214 = vmatprep.subr.bf16.mxu0 %v4213_v5  ;;  %v4256_v5 = vpack.c.bf16 %v1241_v63, %v1240_v2  ;;  %v4173_v7 = vpack.c.bf16 %v688_v4, %v683_v3  ;;  %v676_v2 = vld [vmem:[#allocation10 + $0xc0] sm:$0xff]  ;;  %v681_v63 = vld [vmem:[#allocation10 + $0xe8] sm:$0xff]  ;;  %v691_v4 = vld [vmem:[#allocation10 + $0x138] sm:$0xff] }
 0x204   : > { %v4232_v3 = vpack.c.bf16 %v681_v63, %v676_v2  ;;  %v1443_v2 = vld [vmem:[#allocation8 + $0x2a8] sm:$0xff]  ;;  %v1444_v63 = vld [vmem:[#allocation8 + $0x2b0] sm:$0xff] }
 0x206   : > { %4154 = vmatpush3.bf16.msra.mxu1 %v4153_v12  ;;  %4216 = vmatpush1.bf16.msra.mxu0 %v4215_v13  ;;  %v698_v12 = vld [vmem:[#allocation10 + $0x170] sm:$0xff]  ;;  %v4175_v13 = vpack.c.bf16 %v687_v8, %v682_v6  ;;  %v701_v6 = vld [vmem:[#allocation10 + $0x188] sm:$0xff] }
 0x207   : > { %4155 = vmatprep.subr.bf16.mxu1 %v5001_v0  ;;  %4218 = vmatprep.subr.bf16.mxu0 %v4217_v15  ;;  %v692_v15 = vld [vmem:[#allocation10 + $0x140] sm:$0xff]  ;;  %v4177_v16 = vpack.c.bf16 %v698_v12, %v693_v11  ;;  %v706_v8 = vld [vmem:[#allocation10 + $0x1b0] sm:$0xff]  ;;  %v721_v12 = vld [vmem:[#allocation10 + $0x228] sm:$0xff] }
 0x208   : > { %v4241_v10 = vpack.c.bf16 %v711_v9, %v706_v8  ;;  %v716_v11 = vld [vmem:[#allocation10 + $0x200] sm:$0xff]  ;;  %v1449_v8 = vld [vmem:[#allocation8 + $0x2d8] sm:$0xff]  ;;  %v1450_v9 = vld [vmem:[#allocation8 + $0x2e0] sm:$0xff] }
 0x20a   : > { %4157 = vmatpush3.bf16.msra.mxu1 %v4156_v22  ;;  %4220 = vmatpush1.bf16.msra.mxu0 %v4219_v23  ;;  %v4179_v22 = vpack.c.bf16 %v697_v17, %v692_v15  ;;  %v4262_v23 = vpack.c.bf16 %v1245_v19, %v1244_v18  ;;  %v731_v15 = vld [vmem:[#allocation10 + $0x278] sm:$0xff]  ;;  %v1340_v17 = vld [vmem:[#allocation8 + $0x220] sm:$0xff] }
 0x20b   : > { %4158 = vmatprep.subr.bf16.mxu1 %v5001_v0  ;;  %4222 = vmatprep.subr.bf16.mxu0 %v4221_v25  ;;  %v4181_v25 = vpack.c.bf16 %v708_v21, %v703_v20  ;;  %v1341_v18 = vld [vmem:[#allocation8 + $0x228] sm:$0xff]  ;;  %v1342_v20 = vld [vmem:[#allocation8 + $0x230] sm:$0xff]  ;;  %v1343_v21 = vld [vmem:[#allocation8 + $0x238] sm:$0xff] }
 0x20c   : > { %v4274_v19 = vpack.c.bf16 %v1341_v18, %v1340_v17  ;;  %v1455_v17 = vld [vmem:[#allocation8 + $0x308] sm:$0xff]  ;;  %v1456_v18 = vld [vmem:[#allocation8 + $0x310] sm:$0xff] }
 0x20e   : > { %4160 = vmatpush3.bf16.msra.mxu1 %v4159_v35  ;;  %4224 = vmatpush1.bf16.msra.mxu0 %v4223_v36  ;;  %v4265_v35 = vpack.c.bf16 %v1247_v28, %v1246_v27  ;;  %v712_v36 = vld [vmem:[#allocation10 + $0x1e0] sm:$0xff]  ;;  %v1348_v28 = vld [vmem:[#allocation8 + $0x260] sm:$0xff] }
 0x20f   : > { %4162 = vmatprep.subr.bf16.mxu1 %v4161_v39  ;;  %4249 = vmatprep.subr.bf16.mxu0 %v5001_v0  ;;  %v1248_v39 = vld [vmem:[#allocation8 + $0x1f8] sm:$0xff]  ;;  %v4187_v44 = vpack.c.bf16 %v717_v38, %v712_v36  ;;  %v4286_v31 = vpack.c.bf16 %v1349_v30, %v1348_v28  ;;  %v1352_v36 = vld [vmem:[#allocation8 + $0x280] sm:$0xff] }
 0x210   : > { %v4268_v45 = vpack.c.bf16 %v1249_v40, %v1248_v39  ;;  %v1354_v39 = vld [vmem:[#allocation8 + $0x290] sm:$0xff]  ;;  %v1355_v40 = vld [vmem:[#allocation8 + $0x298] sm:$0xff] }
 0x211   : > { %3439 = vmatmul.mubr.f32.vlgmr.msra.gmra.mrb[4].mxu1 %v5326_v29  ;;  %1160 = vmatmul.mubr.f32.vlgmr.msra.gmra.mrb[4].mxu0 %v5347_v54  ;;  %v4171_v29 = vpack.c.bf16 %v677_v62, %v672_v59  ;;  %v666_v59 = vld [vmem:[#allocation10 + $0x70] sm:$0xff] }
 0x212   : > { %4164 = vmatpush1.bf16.msra.mxu1 %v4163_v46  ;;  %4251 = vmatpush3.bf16.msra.mxu0 %v4250_v47  ;;  %v722_v46 = vld [vmem:[#allocation10 + $0x230] sm:$0xff]  ;;  %v4189_v47 = vpack.c.bf16 %v728_v42, %v723_v41  ;;  %v4229_v62 = vpack.c.bf16 %v671_v60, %v666_v59  ;;  %v4295_v41 = vpack.c.bf16 %v1355_v40, %v1354_v39  ;;  %v1546_v39 = vld [vmem:[#allocation8 + $0x330] sm:$0xff]  ;;  %v1547_v40 = vld [vmem:[#allocation8 + $0x338] sm:$0xff] }
 0x213   : > { %4166 = vmatprep.subr.bf16.mxu1 %v4165_v50  ;;  %4252 = vmatprep.subr.bf16.mxu0 %v5001_v0  ;;  %v1251_v50 = vld [vmem:[#allocation8 + $0x210] sm:$0xff]  ;;  %v4191_v52 = vpack.c.bf16 %v727_v48, %v722_v46 }
 0x214   : > { %1088 = vmatprep.mubr.f32.mxu1 %v5003_v1  ;;  %3508 = vmatprep.mubr.msk.f32.mxu0 %vm5002_vm0, %v5003_v1  ;;  %v4271_v53 = vpack.c.bf16 %v1251_v50, %v1250_v49 }
 0x216   : > { %4168 = vmatpush1.bf16.msra.mxu1 %v4167_v57  ;;  %4254 = vmatpush3.bf16.msra.mxu0 %v4253_v58  ;;  %v442_v57 = vmul.f32 %v441_v51, %v5330_v32  ;;  %v4226_v58 = vpack.c.bf16 %v661_v56, %v656_v55 }
 0x217   : > { %4170 = vmatprep.subr.bf16.mxu1 %v4169_v61  ;;  %4255 = vmatprep.subr.bf16.mxu0 %v5001_v0 }
 0x218   : > { %v443_v61 = vsel %vm436_vm3, %v5330_v32, %v442_v57  ;;  %v686_v32 = vld [vmem:[#allocation10 + $0x110] sm:$0xff] }
 0x21a   : > { %4172 = vmatpush1.bf16.msra.mxu1 %v4171_v29  ;;  %4257 = vmatpush3.bf16.msra.mxu0 %v4256_v5  ;;  %v4235_v29 = vpack.c.bf16 %v691_v4, %v686_v32  ;;  %v696_v5 = vld [vmem:[#allocation10 + $0x160] sm:$0xff]  ;;  %v1445_v32 = vld [vmem:[#allocation8 + $0x2b8] sm:$0xff]  ;;  %v1446_v4 = vld [vmem:[#allocation8 + $0x2c0] sm:$0xff] }
 0x21b   : > { %4174 = vmatprep.subr.bf16.mxu1 %v4173_v7  ;;  %4258 = vmatprep.subr.bf16.mxu0 %v5001_v0  ;;  %v4238_v7 = vpack.c.bf16 %v701_v6, %v696_v5  ;;  %v1447_v5 = vld [vmem:[#allocation8 + $0x2c8] sm:$0xff]  ;;  %v1448_v6 = vld [vmem:[#allocation8 + $0x2d0] sm:$0xff] }
 0x21e   : > { %4176 = vmatpush1.bf16.msra.mxu1 %v4175_v13  ;;  %4260 = vmatpush3.bf16.msra.mxu0 %v4259_v14  ;;  %v4244_v13 = vpack.c.bf16 %v721_v12, %v716_v11  ;;  %v726_v14 = vld [vmem:[#allocation10 + $0x250] sm:$0xff]  ;;  %v1451_v11 = vld [vmem:[#allocation8 + $0x2e8] sm:$0xff]  ;;  %v1452_v12 = vld [vmem:[#allocation8 + $0x2f0] sm:$0xff] }
 0x21f   : > { %4178 = vmatprep.subr.bf16.mxu1 %v4177_v16  ;;  %4261 = vmatprep.subr.bf16.mxu0 %v5001_v0  ;;  %v4247_v16 = vpack.c.bf16 %v731_v15, %v726_v14  ;;  %v1453_v14 = vld [vmem:[#allocation8 + $0x2f8] sm:$0xff]  ;;  %v1454_v15 = vld [vmem:[#allocation8 + $0x300] sm:$0xff] }
 0x222   : > { %4180 = vmatpush1.bf16.msra.mxu1 %v4179_v22  ;;  %4263 = vmatpush3.bf16.msra.mxu0 %v4262_v23  ;;  %v4277_v22 = vpack.c.bf16 %v1343_v21, %v1342_v20  ;;  %v1344_v23 = vld [vmem:[#allocation8 + $0x240] sm:$0xff]  ;;  %v1457_v20 = vld [vmem:[#allocation8 + $0x318] sm:$0xff] }
 0x223   : > { %4182 = vmatprep.subr.bf16.mxu1 %v4181_v25  ;;  %4264 = vmatprep.subr.bf16.mxu0 %v5001_v0  ;;  %v4280_v25 = vpack.c.bf16 %v1345_v24, %v1344_v23  ;;  %v1458_v21 = vld [vmem:[#allocation8 + $0x320] sm:$0xff] }
 0x224   : > { %v2943_v23 = vld [vmem:[#allocation8 + $0x2a0] ss:$0 sm:$0xff] }
 0x226   : > { %4184 = vmatpush1.bf16.msra.mxu1 %v4183_v34  ;;  %4266 = vmatpush3.bf16.msra.mxu0 %v4265_v35  ;;  %v1351_v34 = vld [vmem:[#allocation8 + $0x278] sm:$0xff] }
 0x227   : > { %4186 = vmatprep.subr.bf16.mxu1 %v4185_v37  ;;  %4267 = vmatprep.subr.bf16.mxu0 %v5001_v0  ;;  %v4289_v35 = vpack.c.bf16 %v1351_v34, %v1350_v33  ;;  %v1353_v37 = vld [vmem:[#allocation8 + $0x288] sm:$0xff] }
 0x228   : > { %v4292_v38 = vpack.c.bf16 %v1353_v37, %v1352_v36 }
 0x22a   : > { %4188 = vmatpush1.bf16.msra.mxu1 %v4187_v44  ;;  %4269 = vmatpush3.bf16.msra.mxu0 %v4268_v45  ;;  %v2942_v44 = vld [vmem:[#allocation8 + $0x218] ss:$0 sm:$0xff] }
 0x22b   : > { %4190 = vmatprep.subr.bf16.mxu1 %v4189_v47  ;;  %4270 = vmatprep.subr.bf16.mxu0 %v5001_v0 }
 0x22e   : > { %4192 = vmatpush1.bf16.msra.mxu1 %v4191_v52  ;;  %4272 = vmatpush3.bf16.msra.mxu0 %v4271_v53 }
 0x22f   : > { %4225 = vmatprep.subr.bf16.mxu1 %v5001_v0  ;;  %4273 = vmatprep.subr.bf16.mxu0 %v5001_v0 }
 0x231   : > { %1089 = vmatmul.mubr.f32.vlgmr.msra.gmra.mrb[2].mxu1 %v5347_v54  ;;  %3509 = vmatmul.mubr.f32.vlgmr.msra.gmra.mrb[6].mxu0 %v443_v61 }
 0x232   : > { %4227 = vmatpush3.bf16.msra.mxu1 %v4226_v58  ;;  %3473 = vmatprep.mubr.msk.f32.mxu1 %vm5002_vm0, %v5003_v1 }
 0x233   : > { %4228 = vmatprep.subr.bf16.mxu1 %v5001_v0  ;;  %3543 = vmatprep.mubr.msk.f32.mxu0 %vm5002_vm0, %v5003_v1 }
 0x234   : > { %4275 = vmatpush3.bf16.msra.mxu0 %v4274_v19  ;;  %v4316_v19 = vpack.c.bf16 %v1456_v18, %v1455_v17  ;;  %v1650_v18 = vld [vmem:[#allocation8 + $0x3b8] sm:$0xff] }
 0x235   : > { %4276 = vmatprep.subr.bf16.mxu0 %v5001_v0 }
 0x236   : > { %4230 = vmatpush3.bf16.msra.mxu1 %v4229_v62 }
 0x237   : > { %4231 = vmatprep.subr.bf16.mxu1 %v5001_v0 }
 0x238   : > { %4278 = vmatpush3.bf16.msra.mxu0 %v4277_v22  ;;  %v4319_v22 = vpack.c.bf16 %v1458_v21, %v1457_v20  ;;  %v1652_v21 = vld [vmem:[#allocation8 + $0x3c8] sm:$0xff] }
 0x239   : > { %4279 = vmatprep.subr.bf16.mxu0 %v5001_v0 }
 0x23a   : > { %4233 = vmatpush3.bf16.msra.mxu1 %v4232_v3  ;;  %v4298_v3 = vpack.c.bf16 %v1444_v63, %v1443_v2  ;;  %v1560_v63 = vld [vmem:[#allocation8 + $0x3a0] sm:$0xff] }
 0x23b   : > { %4234 = vmatprep.subr.bf16.mxu1 %v5001_v0 }
 0x23c   : > { %4281 = vmatpush3.bf16.msra.mxu0 %v4280_v25 }
 0x23d   : > { %4282 = vmatprep.subr.bf16.mxu0 %v5001_v0 }
 0x23e   : > { %4236 = vmatpush3.bf16.msra.mxu1 %v4235_v29  ;;  %v4301_v29 = vpack.c.bf16 %v1446_v4, %v1445_v32  ;;  %v2944_v4 = vld [vmem:[#allocation8 + $0x328] ss:$0 sm:$0xff] }
 0x23f   : > { %4237 = vmatprep.subr.bf16.mxu1 %v5001_v0 }
 0x242   : > { %4239 = vmatpush3.bf16.msra.mxu1 %v4238_v7  ;;  %v4304_v7 = vpack.c.bf16 %v1448_v6, %v1447_v5 }
 0x243   : > { %4240 = vmatprep.subr.bf16.mxu1 %v5001_v0 }
 0x246   : > { %4242 = vmatpush3.bf16.msra.mxu1 %v4241_v10  ;;  %v4307_v10 = vpack.c.bf16 %v1450_v9, %v1449_v8 }
 0x247   : > { %4243 = vmatprep.subr.bf16.mxu1 %v5001_v0 }
 0x24a   : > { %4245 = vmatpush3.bf16.msra.mxu1 %v4244_v13  ;;  %v4310_v13 = vpack.c.bf16 %v1452_v12, %v1451_v11 }
 0x24b   : > { %4246 = vmatprep.subr.bf16.mxu1 %v5001_v0 }
 0x24e   : > { %4248 = vmatpush3.bf16.msra.mxu1 %v4247_v16  ;;  %v4313_v16 = vpack.c.bf16 %v1454_v15, %v1453_v14 }
 0x24f   : > { %4297 = vmatprep.subr.bf16.mxu1 %v5001_v0 }
 0x251   : > { %3474 = vmatmul.mubr.f32.vlgmr.msra.gmra.mrb[4].mxu1 %v5347_v54  ;;  %v1347_v54 = vld [vmem:[#allocation8 + $0x258] sm:$0xff] }
 0x252   : > { %3578 = vmatprep.mubr.msk.f32.mxu1 %vm5002_vm0, %v5003_v1  ;;  %v4283_v27 = vpack.c.bf16 %v1347_v54, %v1346_v26  ;;  %4299 = vmatpush3.bf16.msra.mxu1 %v4298_v3  ;;  %v1561_v3 = vld [vmem:[#allocation8 + $0x3a8] sm:$0xff] }
 0x253   : > { %4300 = vmatprep.subr.bf16.mxu1 %v5001_v0  ;;  %v4343_v32 = vpack.c.bf16 %v1561_v3, %v1560_v63  ;;  %v1755_v3 = vld [vmem:[#allocation8 + $0x450] sm:$0xff] }
 0x254   : > { %4284 = vmatpush3.bf16.msra.mxu0 %v4283_v27 }
 0x255   : > { %4285 = vmatprep.subr.bf16.mxu0 %v5001_v0 }
 0x256   : > { %4302 = vmatpush3.bf16.msra.mxu1 %v4301_v29 }
 0x257   : > { %4303 = vmatprep.subr.bf16.mxu1 %v5001_v0 }
 0x258   : > { %4287 = vmatpush3.bf16.msra.mxu0 %v4286_v31 }
 0x259   : > { %4288 = vmatprep.subr.bf16.mxu0 %v5001_v0 }
 0x25a   : > { %4305 = vmatpush3.bf16.msra.mxu1 %v4304_v7 }
 0x25b   : > { %4306 = vmatprep.subr.bf16.mxu1 %v5001_v0 }
 0x25c   : > { %4290 = vmatpush3.bf16.msra.mxu0 %v4289_v35 }
 0x25d   : > { %4291 = vmatprep.subr.bf16.mxu0 %v5001_v0 }
 0x25e   : > { %4308 = vmatpush3.bf16.msra.mxu1 %v4307_v10 }
 0x25f   : > { %4309 = vmatprep.subr.bf16.mxu1 %v5001_v0 }
 0x260   : > { %4293 = vmatpush3.bf16.msra.mxu0 %v4292_v38 }
 0x261   : > { %4294 = vmatprep.subr.bf16.mxu0 %v5001_v0 }
 0x262   : > { %4311 = vmatpush3.bf16.msra.mxu1 %v4310_v13 }
 0x263   : > { %4312 = vmatprep.subr.bf16.mxu1 %v5001_v0 }
 0x264   : > { %4296 = vmatpush3.bf16.msra.mxu0 %v4295_v41  ;;  %v4322_v41 = vpack.c.bf16 %v1547_v40, %v1546_v39  ;;  %v1664_v40 = vld [vmem:[#allocation8 + $0x428] sm:$0xff] }
 0x265   : > { %4321 = vmatprep.subr.bf16.mxu0 %v5001_v0 }
 0x266   : > { %4314 = vmatpush3.bf16.msra.mxu1 %v4313_v16 }
 0x267   : > { %4315 = vmatprep.subr.bf16.mxu1 %v5001_v0 }
 0x26a   : > { %4317 = vmatpush3.bf16.msra.mxu1 %v4316_v19  ;;  %v1651_v19 = vld [vmem:[#allocation8 + $0x3c0] sm:$0xff] }
 0x26b   : > { %4318 = vmatprep.subr.bf16.mxu1 %v5001_v0  ;;  %v4346_v20 = vpack.c.bf16 %v1651_v19, %v1650_v18  ;;  %v1767_v19 = vld [vmem:[#allocation8 + $0x4b0] sm:$0xff] }
 0x26e   : > { %4320 = vmatpush3.bf16.msra.mxu1 %v4319_v22  ;;  %v1653_v22 = vld [vmem:[#allocation8 + $0x3d0] sm:$0xff] }
 0x26f   : > { %4345 = vmatprep.subr.bf16.mxu1 %v5001_v0 }
 0x2e4   : > { %v5390_v42 = vpop.f32.mrb[4].mxu0 }
 0x2e5   : > { %v5392_v43 = vpop.f32.mrb[5].mxu0 }
 0x304   : > { %v1090_v45 = vpop.f32.mrb[2].mxu1  ;;  %v1323_v46 = vpop.f32.mrb[6].mxu0 }
 0x305   : > { %v1324_v47 = vadd.f32 %v2942_v44, %v1323_v46  ;;  %v5394_v48 = vpop.f32.mrb[3].mxu1  ;;  %v3510_v49 = vpop.f32.mrb[7].mxu0  ;;  %v1548_v44 = vld [vmem:[#allocation8 + $0x340] sm:$0xff] }
 0x306   : > { %v1551_v49 = vld [vmem:[#allocation8 + $0x358] sm:$0xff] }
 0x307   : > { %v1327_v50 = vadd.f32 %v1324_v47, %v1090_v45  ;;  %v1549_v45 = vld [vmem:[#allocation8 + $0x348] sm:$0xff]  ;;  %v1550_v47 = vld [vmem:[#allocation8 + $0x350] sm:$0xff] }
 0x308   : > { %v4325_v46 = vpack.c.bf16 %v1549_v45, %v1548_v44  ;;  %v2945_v45 = vld [vmem:[#allocation8 + $0x3b0] ss:$0 sm:$0xff] }
 0x309   : > { %v1328_v51 = vmin.f32 %v1327_v50, 20.0  ;;  %vm1332_vm4 = vcmp.gt.f32.partialorder %v1327_v50, 20.0 }
 0x30b   : > { %v1329_v52 = vmul.f32 1.442695, %v1328_v51  ;;  %v1552_v51 = vld [vmem:[#allocation8 + $0x360] sm:$0xff] }
 0x30d   : > { %4714 = vpow2.f32 %v1329_v52  ;;  %v1553_v52 = vld [vmem:[#allocation8 + $0x368] sm:$0xff] }
 0x317   : > { %v4715_v53 = vpop.eup %4714 }
 0x318   : > { %v1331_v55 = vadd.f32 1.0, %v4715_v53  ;;  %v4331_v53 = vpack.c.bf16 %v1553_v52, %v1552_v51 }
 0x31a   : > { %v1333_v56 = vmul.f32 %v1331_v55, %v1331_v55  ;;  %v1554_v55 = vld [vmem:[#allocation8 + $0x370] sm:$0xff] }
 0x31c   : > { %v1334_v57 = vadd.f32 1.0, %v1333_v56  ;;  %v1555_v56 = vld [vmem:[#allocation8 + $0x378] sm:$0xff] }
 0x31e   : > { %4716 = vrcp.f32 %v1334_v57  ;;  %v4334_v57 = vpack.c.bf16 %v1555_v56, %v1554_v55 }
 0x328   : > { %v4717_v58 = vpop.eup %4716 }
 0x329   : > { %v1336_v59 = vmul.f32 2.0, %v4717_v58  ;;  %v1556_v58 = vld [vmem:[#allocation8 + $0x380] sm:$0xff] }
 0x32b   : > { %v1337_v60 = vsub.f32 1.0, %v1336_v59  ;;  %v1557_v59 = vld [vmem:[#allocation8 + $0x388] sm:$0xff] }
 0x32d   : > { %v1338_v61 = vmul.f32 %v1337_v60, %v1327_v50  ;;  %v4337_v60 = vpack.c.bf16 %v1557_v59, %v1556_v58 }
 0x32f   : > { %v1339_v62 = vsel %vm1332_vm4, %v1327_v50, %v1338_v61  ;;  %v4328_v50 = vpack.c.bf16 %v1551_v49, %v1550_v47  ;;  %v1558_v61 = vld [vmem:[#allocation8 + $0x390] sm:$0xff] }
 0x330   : > { %3544 = vmatmul.mubr.f32.vlgmr.msra.gmra.mrb[8].mxu0 %v1339_v62  ;;  %v1559_v62 = vld [vmem:[#allocation8 + $0x398] sm:$0xff] }
 0x331   : > { %3613 = vmatprep.mubr.msk.f32.mxu0 %vm5002_vm0, %v5003_v1  ;;  %4323 = vmatpush3.bf16.msra.mxu0 %v4322_v41  ;;  %v4340_v2 = vpack.c.bf16 %v1559_v62, %v1558_v61  ;;  %v1665_v41 = vld [vmem:[#allocation8 + $0x430] sm:$0xff] }
 0x332   : > { %4324 = vmatprep.subr.bf16.mxu0 %v5001_v0  ;;  %v4367_v44 = vpack.c.bf16 %v1665_v41, %v1664_v40  ;;  %v1858_v41 = vld [vmem:[#allocation8 + $0x4d8] sm:$0xff] }
 0x335   : > { %4326 = vmatpush3.bf16.msra.mxu0 %v4325_v46 }
 0x336   : > { %4327 = vmatprep.subr.bf16.mxu0 %v5001_v0 }
 0x339   : > { %4329 = vmatpush3.bf16.msra.mxu0 %v4328_v50 }
 0x33a   : > { %4330 = vmatprep.subr.bf16.mxu0 %v5001_v0 }
 0x33d   : > { %4332 = vmatpush3.bf16.msra.mxu0 %v4331_v53 }
 0x33e   : > { %4333 = vmatprep.subr.bf16.mxu0 %v5001_v0 }
 0x341   : > { %4335 = vmatpush3.bf16.msra.mxu0 %v4334_v57 }
 0x342   : > { %4336 = vmatprep.subr.bf16.mxu0 %v5001_v0 }
 0x345   : > { %4338 = vmatpush3.bf16.msra.mxu0 %v4337_v60 }
 0x346   : > { %4339 = vmatprep.subr.bf16.mxu0 %v5001_v0 }
 0x349   : > { %4341 = vmatpush3.bf16.msra.mxu0 %v4340_v2  ;;  %v1753_v2 = vld [vmem:[#allocation8 + $0x440] sm:$0xff] }
 0x34a   : > { %4342 = vmatprep.subr.bf16.mxu0 %v5001_v0 }
 0x34d   : > { %4344 = vmatpush3.bf16.msra.mxu0 %v4343_v32  ;;  %v1756_v32 = vld [vmem:[#allocation8 + $0x458] sm:$0xff] }
 0x34e   : > { %4369 = vmatprep.subr.bf16.mxu0 %v5001_v0 }
 0x403   : > { %v1427_v24 = vpop.f32.mrb[8].mxu0 }
 0x404   : > { %v1428_v25 = vadd.f32 %v2943_v23, %v1427_v24  ;;  %v3545_v26 = vpop.f32.mrb[9].mxu0  ;;  %v4349_v23 = vpack.c.bf16 %v1653_v22, %v1652_v21  ;;  %v1654_v24 = vld [vmem:[#allocation8 + $0x3d8] sm:$0xff] }
 0x405   : > { %v2946_v22 = vld [vmem:[#allocation8 + $0x438] ss:$0 sm:$0xff] }
 0x406   : > { %v1431_v54 = vmin.f32 %v1428_v25, 20.0  ;;  %vm1435_vm5 = vcmp.gt.f32.partialorder %v1428_v25, 20.0 }
 0x408   : > { %v1432_v27 = vmul.f32 1.442695, %v1431_v54  ;;  %v1656_v54 = vld [vmem:[#allocation8 + $0x3e8] sm:$0xff] }
 0x40a   : > { %4718 = vpow2.f32 %v1432_v27  ;;  %v1657_v27 = vld [vmem:[#allocation8 + $0x3f0] sm:$0xff] }
 0x414   : > { %v4719_v28 = vpop.eup %4718 }
 0x415   : > { %v1434_v30 = vadd.f32 1.0, %v4719_v28  ;;  %v4355_v28 = vpack.c.bf16 %v1657_v27, %v1656_v54 }
 0x417   : > { %v1436_v31 = vmul.f32 %v1434_v30, %v1434_v30  ;;  %v1658_v30 = vld [vmem:[#allocation8 + $0x3f8] sm:$0xff] }
 0x419   : > { %v1437_v33 = vadd.f32 1.0, %v1436_v31  ;;  %v1659_v31 = vld [vmem:[#allocation8 + $0x400] sm:$0xff] }
 0x41b   : > { %4720 = vrcp.f32 %v1437_v33  ;;  %v4358_v33 = vpack.c.bf16 %v1659_v31, %v1658_v30 }
 0x425   : > { %v4721_v34 = vpop.eup %4720 }
 0x426   : > { %v1439_v35 = vmul.f32 2.0, %v4721_v34  ;;  %v1660_v34 = vld [vmem:[#allocation8 + $0x408] sm:$0xff] }
 0x428   : > { %v1440_v36 = vsub.f32 1.0, %v1439_v35  ;;  %v1661_v35 = vld [vmem:[#allocation8 + $0x410] sm:$0xff] }
 0x42a   : > { %v1441_v37 = vmul.f32 %v1440_v36, %v1428_v25  ;;  %v4361_v36 = vpack.c.bf16 %v1661_v35, %v1660_v34 }
 0x42c   : > { %v1442_v38 = vsel %vm1435_vm5, %v1428_v25, %v1441_v37  ;;  %v1655_v25 = vld [vmem:[#allocation8 + $0x3e0] sm:$0xff]  ;;  %v1662_v37 = vld [vmem:[#allocation8 + $0x418] sm:$0xff] }
 0x42d   : > { %3579 = vmatmul.mubr.f32.vlgmr.msra.gmra.mrb[6].mxu1 %v1442_v38  ;;  %v4352_v26 = vpack.c.bf16 %v1655_v25, %v1654_v24  ;;  %v1663_v38 = vld [vmem:[#allocation8 + $0x420] sm:$0xff] }
 0x42e   : > { %3648 = vmatprep.mubr.msk.f32.mxu1 %vm5002_vm0, %v5003_v1  ;;  %4347 = vmatpush3.bf16.msra.mxu1 %v4346_v20  ;;  %v4364_v39 = vpack.c.bf16 %v1663_v38, %v1662_v37  ;;  %v1768_v20 = vld [vmem:[#allocation8 + $0x4b8] sm:$0xff]  ;;  %v1856_v38 = vld [vmem:[#allocation8 + $0x4c8] sm:$0xff] }
 0x42f   : > { %4348 = vmatprep.subr.bf16.mxu1 %v5001_v0  ;;  %v4391_v21 = vpack.c.bf16 %v1768_v20, %v1767_v19  ;;  %v1962_v19 = vld [vmem:[#allocation8 + $0x560] sm:$0xff]  ;;  %v1963_v20 = vld [vmem:[#allocation8 + $0x568] sm:$0xff] }
 0x432   : > { %4350 = vmatpush3.bf16.msra.mxu1 %v4349_v23 }
 0x433   : > { %4351 = vmatprep.subr.bf16.mxu1 %v5001_v0 }
 0x436   : > { %4353 = vmatpush3.bf16.msra.mxu1 %v4352_v26 }
 0x437   : > { %4354 = vmatprep.subr.bf16.mxu1 %v5001_v0 }
 0x43a   : > { %4356 = vmatpush3.bf16.msra.mxu1 %v4355_v28 }
 0x43b   : > { %4357 = vmatprep.subr.bf16.mxu1 %v5001_v0 }
 0x43e   : > { %4359 = vmatpush3.bf16.msra.mxu1 %v4358_v33 }
 0x43f   : > { %4360 = vmatprep.subr.bf16.mxu1 %v5001_v0 }
 0x442   : > { %4362 = vmatpush3.bf16.msra.mxu1 %v4361_v36 }
 0x443   : > { %4363 = vmatprep.subr.bf16.mxu1 %v5001_v0 }
 0x446   : > { %4365 = vmatpush3.bf16.msra.mxu1 %v4364_v39  ;;  %v1857_v39 = vld [vmem:[#allocation8 + $0x4d0] sm:$0xff] }
 0x447   : > { %4366 = vmatprep.subr.bf16.mxu1 %v5001_v0  ;;  %v4394_v40 = vpack.c.bf16 %v1857_v39, %v1856_v38  ;;  %v1974_v38 = vld [vmem:[#allocation8 + $0x5c0] sm:$0xff]  ;;  %v1975_v39 = vld [vmem:[#allocation8 + $0x5c8] sm:$0xff] }
 0x44a   : > { %4368 = vmatpush3.bf16.msra.mxu1 %v4367_v44  ;;  %v1859_v44 = vld [vmem:[#allocation8 + $0x4e0] sm:$0xff] }
 0x44b   : > { %4393 = vmatprep.subr.bf16.mxu1 %v5001_v0 }
 0x500   : > { %v1530_v29 = vpop.f32.mrb[6].mxu1 }
 0x501   : > { %v1531_v5 = vadd.f32 %v2944_v4, %v1530_v29  ;;  %v3580_v6 = vpop.f32.mrb[7].mxu1  ;;  %v4373_v4 = vpack.c.bf16 %v1756_v32, %v1755_v3  ;;  %v1757_v29 = vld [vmem:[#allocation8 + $0x460] sm:$0xff] }
 0x502   : > { %v2947_v3 = vld [vmem:[#allocation8 + $0x4c0] ss:$0 sm:$0xff] }
 0x503   : > { %v1534_v7 = vmin.f32 %v1531_v5, 20.0  ;;  %vm1538_vm6 = vcmp.gt.f32.partialorder %v1531_v5, 20.0 }
 0x505   : > { %v1535_v8 = vmul.f32 1.442695, %v1534_v7  ;;  %v1759_v7 = vld [vmem:[#allocation8 + $0x470] sm:$0xff] }
 0x507   : > { %4722 = vpow2.f32 %v1535_v8  ;;  %v1760_v8 = vld [vmem:[#allocation8 + $0x478] sm:$0xff] }
 0x511   : > { %v4723_v9 = vpop.eup %4722 }
 0x512   : > { %v1537_v10 = vadd.f32 1.0, %v4723_v9  ;;  %v4379_v9 = vpack.c.bf16 %v1760_v8, %v1759_v7 }
 0x514   : > { %v1539_v11 = vmul.f32 %v1537_v10, %v1537_v10  ;;  %v1761_v10 = vld [vmem:[#allocation8 + $0x480] sm:$0xff] }
 0x516   : > { %v1540_v12 = vadd.f32 1.0, %v1539_v11  ;;  %v1762_v11 = vld [vmem:[#allocation8 + $0x488] sm:$0xff] }
 0x518   : > { %4724 = vrcp.f32 %v1540_v12  ;;  %v4382_v12 = vpack.c.bf16 %v1762_v11, %v1761_v10 }
 0x522   : > { %v4725_v13 = vpop.eup %4724 }
 0x523   : > { %v1542_v14 = vmul.f32 2.0, %v4725_v13  ;;  %v1763_v13 = vld [vmem:[#allocation8 + $0x490] sm:$0xff] }
 0x525   : > { %v1543_v15 = vsub.f32 1.0, %v1542_v14  ;;  %v1764_v14 = vld [vmem:[#allocation8 + $0x498] sm:$0xff] }
 0x527   : > { %v1544_v16 = vmul.f32 %v1543_v15, %v1531_v5  ;;  %v4385_v15 = vpack.c.bf16 %v1764_v14, %v1763_v13 }
 0x529   : > { %v1545_v17 = vsel %vm1538_vm6, %v1531_v5, %v1544_v16  ;;  %v1758_v5 = vld [vmem:[#allocation8 + $0x468] sm:$0xff]  ;;  %v1765_v16 = vld [vmem:[#allocation8 + $0x4a0] sm:$0xff] }
 0x52a   : > { %3614 = vmatmul.mubr.f32.vlgmr.msra.gmra.mrb[10].mxu0 %v1545_v17  ;;  %v4376_v6 = vpack.c.bf16 %v1758_v5, %v1757_v29  ;;  %v1766_v17 = vld [vmem:[#allocation8 + $0x4a8] sm:$0xff] }
 0x52b   : > { %3683 = vmatprep.mubr.msk.f32.mxu0 %vm5002_vm0, %v5003_v1  ;;  %v4388_v18 = vpack.c.bf16 %v1766_v17, %v1765_v16  ;;  %v1960_v16 = vld [vmem:[#allocation8 + $0x550] sm:$0xff]  ;;  %v1961_v17 = vld [vmem:[#allocation8 + $0x558] sm:$0xff] }
 0x5fd   : > { %v1633_v46 = vpop.f32.mrb[10].mxu0 }
 0x5fe   : > { %v1634_v47 = vadd.f32 %v2945_v45, %v1633_v46  ;;  %v3615_v49 = vpop.f32.mrb[11].mxu0  ;;  %v4397_v45 = vpack.c.bf16 %v1859_v44, %v1858_v41  ;;  %v1860_v46 = vld [vmem:[#allocation8 + $0x4e8] sm:$0xff] }
 0x5ff   : > { %v2948_v41 = vld [vmem:[#allocation8 + $0x548] ss:$0 sm:$0xff] }
 0x600   : > { %v1637_v50 = vadd.f32 %v1634_v47, %v5394_v48  ;;  %v1754_v48 = vld [vmem:[#allocation8 + $0x448] sm:$0xff]  ;;  %v1861_v47 = vld [vmem:[#allocation8 + $0x4f0] sm:$0xff] }
 0x601   : > { %v4370_v63 = vpack.c.bf16 %v1754_v48, %v1753_v2  ;;  %v4400_v49 = vpack.c.bf16 %v1861_v47, %v1860_v46  ;;  %v1870_v2 = vld [vmem:[#allocation8 + $0x538] sm:$0xff]  ;;  %v1871_v48 = vld [vmem:[#allocation8 + $0x540] sm:$0xff] }
 0x602   : > { %v1638_v51 = vmin.f32 %v1637_v50, 20.0  ;;  %vm1642_vm7 = vcmp.gt.f32.partialorder %v1637_v50, 20.0 }
 0x603   : > { %4371 = vmatpush3.bf16.msra.mxu0 %v4370_v63  ;;  %v4415_v63 = vpack.c.bf16 %v1871_v48, %v1870_v2  ;;  %v2065_v2 = vld [vmem:[#allocation8 + $0x5e8] sm:$0xff]  ;;  %v2066_v48 = vld [vmem:[#allocation8 + $0x5f0] sm:$0xff] }
 0x604   : > { %v1639_v52 = vmul.f32 1.442695, %v1638_v51  ;;  %4372 = vmatprep.subr.bf16.mxu0 %v5001_v0  ;;  %v1863_v51 = vld [vmem:[#allocation8 + $0x500] sm:$0xff] }
 0x606   : > { %4726 = vpow2.f32 %v1639_v52 }
 0x607   : > { %4374 = vmatpush3.bf16.msra.mxu0 %v4373_v4 }
 0x608   : > { %4375 = vmatprep.subr.bf16.mxu0 %v5001_v0 }
 0x60b   : > { %4377 = vmatpush3.bf16.msra.mxu0 %v4376_v6 }
 0x60c   : > { %4378 = vmatprep.subr.bf16.mxu0 %v5001_v0 }
 0x60f   : > { %4380 = vmatpush3.bf16.msra.mxu0 %v4379_v9 }
 0x610   : > { %v4727_v53 = vpop.eup %4726  ;;  %4381 = vmatprep.subr.bf16.mxu0 %v5001_v0 }
 0x611   : > { %v1641_v55 = vadd.f32 1.0, %v4727_v53  ;;  %v1864_v53 = vld [vmem:[#allocation8 + $0x508] sm:$0xff] }
 0x613   : > { %v1643_v56 = vmul.f32 %v1641_v55, %v1641_v55  ;;  %4383 = vmatpush3.bf16.msra.mxu0 %v4382_v12  ;;  %v1865_v55 = vld [vmem:[#allocation8 + $0x510] sm:$0xff] }
 0x614   : > { %4384 = vmatprep.subr.bf16.mxu0 %v5001_v0 }
 0x615   : > { %v1644_v57 = vadd.f32 1.0, %v1643_v56  ;;  %v4406_v56 = vpack.c.bf16 %v1865_v55, %v1864_v53 }
 0x617   : > { %4728 = vrcp.f32 %v1644_v57  ;;  %4386 = vmatpush3.bf16.msra.mxu0 %v4385_v15  ;;  %v1866_v57 = vld [vmem:[#allocation8 + $0x518] sm:$0xff] }
 0x618   : > { %4387 = vmatprep.subr.bf16.mxu0 %v5001_v0 }
 0x61b   : > { %4389 = vmatpush3.bf16.msra.mxu0 %v4388_v18  ;;  %v4418_v18 = vpack.c.bf16 %v1961_v17, %v1960_v16  ;;  %v2077_v16 = vld [vmem:[#allocation8 + $0x648] sm:$0xff]  ;;  %v2078_v17 = vld [vmem:[#allocation8 + $0x650] sm:$0xff] }
 0x61c   : > { %4390 = vmatprep.subr.bf16.mxu0 %v5001_v0 }
 0x61f   : > { %4392 = vmatpush3.bf16.msra.mxu0 %v4391_v21  ;;  %v4421_v21 = vpack.c.bf16 %v1963_v20, %v1962_v19  ;;  %v2949_v19 = vld [vmem:[#allocation8 + $0x5d0] ss:$0 sm:$0xff] }
 0x620   : > { %4417 = vmatprep.subr.bf16.mxu0 %v5001_v0 }
 0x621   : > { %v4729_v58 = vpop.eup %4728 }
 0x622   : > { %v1646_v59 = vmul.f32 2.0, %v4729_v58  ;;  %v1867_v58 = vld [vmem:[#allocation8 + $0x520] sm:$0xff] }
 0x624   : > { %v1647_v60 = vsub.f32 1.0, %v1646_v59  ;;  %v4409_v59 = vpack.c.bf16 %v1867_v58, %v1866_v57 }
 0x626   : > { %v1648_v61 = vmul.f32 %v1647_v60, %v1637_v50  ;;  %v1868_v60 = vld [vmem:[#allocation8 + $0x528] sm:$0xff] }
 0x628   : > { %v1649_v62 = vsel %vm1642_vm7, %v1637_v50, %v1648_v61  ;;  %v1862_v50 = vld [vmem:[#allocation8 + $0x4f8] sm:$0xff]  ;;  %v1869_v61 = vld [vmem:[#allocation8 + $0x530] sm:$0xff] }
 0x629   : > { %3649 = vmatmul.mubr.f32.vlgmr.msra.gmra.mrb[8].mxu1 %v1649_v62  ;;  %v4403_v52 = vpack.c.bf16 %v1863_v51, %v1862_v50  ;;  %v4412_v62 = vpack.c.bf16 %v1869_v61, %v1868_v60  ;;  %v2063_v61 = vld [vmem:[#allocation8 + $0x5d8] sm:$0xff] }
 0x62a   : > { %3718 = vmatprep.mubr.msk.f32.mxu1 %vm5002_vm0, %v5003_v1  ;;  %4395 = vmatpush3.bf16.msra.mxu1 %v4394_v40  ;;  %v4439_v40 = vpack.c.bf16 %v1975_v39, %v1974_v38  ;;  %v2169_v38 = vld [vmem:[#allocation8 + $0x670] sm:$0xff]  ;;  %v2170_v39 = vld [vmem:[#allocation8 + $0x678] sm:$0xff] }
 0x62b   : > { %4396 = vmatprep.subr.bf16.mxu1 %v5001_v0 }
 0x62e   : > { %4398 = vmatpush3.bf16.msra.mxu1 %v4397_v45 }
 0x62f   : > { %4399 = vmatprep.subr.bf16.mxu1 %v5001_v0 }
 0x632   : > { %4401 = vmatpush3.bf16.msra.mxu1 %v4400_v49 }
 0x633   : > { %4402 = vmatprep.subr.bf16.mxu1 %v5001_v0 }
 0x636   : > { %4404 = vmatpush3.bf16.msra.mxu1 %v4403_v52 }
 0x637   : > { %4405 = vmatprep.subr.bf16.mxu1 %v5001_v0 }
 0x63a   : > { %4407 = vmatpush3.bf16.msra.mxu1 %v4406_v56 }
 0x63b   : > { %4408 = vmatprep.subr.bf16.mxu1 %v5001_v0 }
 0x63e   : > { %4410 = vmatpush3.bf16.msra.mxu1 %v4409_v59 }
 0x63f   : > { %4411 = vmatprep.subr.bf16.mxu1 %v5001_v0 }
 0x642   : > { %4413 = vmatpush3.bf16.msra.mxu1 %v4412_v62 }
 0x643   : > { %4414 = vmatprep.subr.bf16.mxu1 %v5001_v0 }
 0x646   : > { %4416 = vmatpush3.bf16.msra.mxu1 %v4415_v63  ;;  %v4445_v63 = vpack.c.bf16 %v2066_v48, %v2065_v2 }
 0x647   : > { %4441 = vmatprep.subr.bf16.mxu1 %v5001_v0 }
 0x6fc   : > { %v1737_v23 = vpop.f32.mrb[8].mxu1 }
 0x6fd   : > { %v1738_v24 = vadd.f32 %v2946_v22, %v1737_v23  ;;  %v3650_v25 = vpop.f32.mrb[9].mxu1  ;;  %v1964_v22 = vld [vmem:[#allocation8 + $0x570] sm:$0xff]  ;;  %v1965_v23 = vld [vmem:[#allocation8 + $0x578] sm:$0xff] }
 0x6fe   : > { %v1966_v25 = vld [vmem:[#allocation8 + $0x580] sm:$0xff] }
 0x6ff   : > { %v1741_v26 = vmin.f32 %v1738_v24, 20.0  ;;  %vm1745_vm8 = vcmp.gt.f32.partialorder %v1738_v24, 20.0 }
 0x701   : > { %v1742_v54 = vmul.f32 1.442695, %v1741_v26  ;;  %v1967_v26 = vld [vmem:[#allocation8 + $0x588] sm:$0xff] }
 0x703   : > { %4730 = vpow2.f32 %v1742_v54  ;;  %v4427_v54 = vpack.c.bf16 %v1967_v26, %v1966_v25 }
 0x70d   : > { %v4731_v27 = vpop.eup %4730 }
 0x70e   : > { %v1744_v28 = vadd.f32 1.0, %v4731_v27  ;;  %v1968_v27 = vld [vmem:[#allocation8 + $0x590] sm:$0xff] }
 0x710   : > { %v1746_v30 = vmul.f32 %v1744_v28, %v1744_v28  ;;  %v1969_v28 = vld [vmem:[#allocation8 + $0x598] sm:$0xff] }
 0x712   : > { %v1747_v31 = vadd.f32 1.0, %v1746_v30  ;;  %v4430_v30 = vpack.c.bf16 %v1969_v28, %v1968_v27 }
 0x714   : > { %4732 = vrcp.f32 %v1747_v31  ;;  %v1970_v31 = vld [vmem:[#allocation8 + $0x5a0] sm:$0xff] }
 0x71e   : > { %v4733_v33 = vpop.eup %4732 }
 0x71f   : > { %v1749_v34 = vmul.f32 2.0, %v4733_v33  ;;  %v1971_v33 = vld [vmem:[#allocation8 + $0x5a8] sm:$0xff] }
 0x721   : > { %v1750_v35 = vsub.f32 1.0, %v1749_v34  ;;  %v4433_v34 = vpack.c.bf16 %v1971_v33, %v1970_v31 }
 0x723   : > { %v1751_v36 = vmul.f32 %v1750_v35, %v1738_v24  ;;  %v1972_v35 = vld [vmem:[#allocation8 + $0x5b0] sm:$0xff] }
 0x725   : > { %v1752_v37 = vsel %vm1745_vm8, %v1738_v24, %v1751_v36  ;;  %v4424_v24 = vpack.c.bf16 %v1965_v23, %v1964_v22  ;;  %v1973_v36 = vld [vmem:[#allocation8 + $0x5b8] sm:$0xff] }
 0x726   : > { %3684 = vmatmul.mubr.f32.vlgmr.msra.gmra.mrb[12].mxu0 %v1752_v37  ;;  %v4436_v37 = vpack.c.bf16 %v1973_v36, %v1972_v35  ;;  %v2167_v35 = vld [vmem:[#allocation8 + $0x660] sm:$0xff]  ;;  %v2168_v36 = vld [vmem:[#allocation8 + $0x668] sm:$0xff] }
 0x727   : > { %3753 = vmatprep.mubr.msk.f32.mxu0 %vm5002_vm0, %v5003_v1  ;;  %4419 = vmatpush3.bf16.msra.mxu0 %v4418_v18  ;;  %v4463_v18 = vpack.c.bf16 %v2078_v17, %v2077_v16  ;;  %v2273_v16 = vld [vmem:[#allocation8 + $0x700] sm:$0xff] }
 0x728   : > { %4420 = vmatprep.subr.bf16.mxu0 %v5001_v0 }
 0x72b   : > { %4422 = vmatpush3.bf16.msra.mxu0 %v4421_v21 }
 0x72c   : > { %4423 = vmatprep.subr.bf16.mxu0 %v5001_v0 }
 0x72f   : > { %4425 = vmatpush3.bf16.msra.mxu0 %v4424_v24 }
 0x730   : > { %4426 = vmatprep.subr.bf16.mxu0 %v5001_v0 }
 0x733   : > { %4428 = vmatpush3.bf16.msra.mxu0 %v4427_v54 }
 0x734   : > { %4429 = vmatprep.subr.bf16.mxu0 %v5001_v0 }
 0x737   : > { %4431 = vmatpush3.bf16.msra.mxu0 %v4430_v30 }
 0x738   : > { %4432 = vmatprep.subr.bf16.mxu0 %v5001_v0 }
 0x73b   : > { %4434 = vmatpush3.bf16.msra.mxu0 %v4433_v34 }
 0x73c   : > { %4435 = vmatprep.subr.bf16.mxu0 %v5001_v0 }
 0x73f   : > { %4437 = vmatpush3.bf16.msra.mxu0 %v4436_v37  ;;  %v4466_v37 = vpack.c.bf16 %v2168_v36, %v2167_v35  ;;  %v2285_v35 = vld [vmem:[#allocation8 + $0x760] sm:$0xff] }
 0x740   : > { %4438 = vmatprep.subr.bf16.mxu0 %v5001_v0 }
 0x743   : > { %4440 = vmatpush3.bf16.msra.mxu0 %v4439_v40  ;;  %v4469_v40 = vpack.c.bf16 %v2170_v39, %v2169_v38 }
 0x744   : > { %4465 = vmatprep.subr.bf16.mxu0 %v5001_v0 }
 0x7f9   : > { %v1840_v32 = vpop.f32.mrb[12].mxu0 }
 0x7fa   : > { %v1841_v4 = vadd.f32 %v2947_v3, %v1840_v32  ;;  %v3685_v29 = vpop.f32.mrb[13].mxu0  ;;  %v2067_v3 = vld [vmem:[#allocation8 + $0x5f8] sm:$0xff]  ;;  %v2068_v32 = vld [vmem:[#allocation8 + $0x600] sm:$0xff] }
 0x7fb   : > { %v2069_v29 = vld [vmem:[#allocation8 + $0x608] sm:$0xff] }
 0x7fc   : > { %v1844_v5 = vmin.f32 %v1841_v4, 20.0  ;;  %vm1848_vm9 = vcmp.gt.f32.partialorder %v1841_v4, 20.0 }
 0x7fe   : > { %v1845_v6 = vmul.f32 1.442695, %v1844_v5  ;;  %v2070_v5 = vld [vmem:[#allocation8 + $0x610] sm:$0xff] }
 0x800   : > { %4734 = vpow2.f32 %v1845_v6  ;;  %v4451_v6 = vpack.c.bf16 %v2070_v5, %v2069_v29 }
 0x80a   : > { %v4735_v7 = vpop.eup %4734 }
 0x80b   : > { %v1847_v8 = vadd.f32 1.0, %v4735_v7  ;;  %v2071_v7 = vld [vmem:[#allocation8 + $0x618] sm:$0xff] }
 0x80d   : > { %v1849_v9 = vmul.f32 %v1847_v8, %v1847_v8  ;;  %v2072_v8 = vld [vmem:[#allocation8 + $0x620] sm:$0xff] }
 0x80f   : > { %v1850_v10 = vadd.f32 1.0, %v1849_v9  ;;  %v4454_v9 = vpack.c.bf16 %v2072_v8, %v2071_v7 }
 0x811   : > { %4736 = vrcp.f32 %v1850_v10  ;;  %v2073_v10 = vld [vmem:[#allocation8 + $0x628] sm:$0xff] }
 0x81b   : > { %v4737_v11 = vpop.eup %4736 }
 0x81c   : > { %v1852_v12 = vmul.f32 2.0, %v4737_v11  ;;  %v2074_v11 = vld [vmem:[#allocation8 + $0x630] sm:$0xff] }
 0x81e   : > { %v1853_v13 = vsub.f32 1.0, %v1852_v12  ;;  %v4457_v12 = vpack.c.bf16 %v2074_v11, %v2073_v10 }
 0x820   : > { %v1854_v14 = vmul.f32 %v1853_v13, %v1841_v4  ;;  %v2075_v13 = vld [vmem:[#allocation8 + $0x638] sm:$0xff] }
 0x822   : > { %v1855_v15 = vsel %vm1848_vm9, %v1841_v4, %v1854_v14  ;;  %v4448_v4 = vpack.c.bf16 %v2068_v32, %v2067_v3  ;;  %v2076_v14 = vld [vmem:[#allocation8 + $0x640] sm:$0xff] }
 0x823   : > { %3719 = vmatmul.mubr.f32.vlgmr.msra.gmra.mrb[10].mxu1 %v1855_v15  ;;  %v4460_v15 = vpack.c.bf16 %v2076_v14, %v2075_v13  ;;  %v2270_v13 = vld [vmem:[#allocation8 + $0x6e8] sm:$0xff] }
 0x824   : > { %3788 = vmatprep.mubr.msk.f32.mxu1 %vm5002_vm0, %v5003_v1 }
 0x8f6   : > { %v1943_v44 = vpop.f32.mrb[10].mxu1 }
 0x8f7   : > { %v1944_v45 = vadd.f32 %v2948_v41, %v1943_v44  ;;  %v3720_v46 = vpop.f32.mrb[11].mxu1  ;;  %v2171_v41 = vld [vmem:[#allocation8 + $0x680] sm:$0xff]  ;;  %v2172_v44 = vld [vmem:[#allocation8 + $0x688] sm:$0xff] }
 0x8f8   : > { %v2173_v46 = vld [vmem:[#allocation8 + $0x690] sm:$0xff] }
 0x8f9   : > { %v1947_v47 = vadd.f32 %v1944_v45, %v5390_v42  ;;  %v2064_v42 = vld [vmem:[#allocation8 + $0x5e0] sm:$0xff]  ;;  %v4472_v45 = vpack.c.bf16 %v2172_v44, %v2171_v41 }
 0x8fa   : > { %v4442_v62 = vpack.c.bf16 %v2064_v42, %v2063_v61  ;;  %v2182_v61 = vld [vmem:[#allocation8 + $0x6d8] sm:$0xff] }
 0x8fb   : > { %v1948_v49 = vmin.f32 %v1947_v47, 20.0  ;;  %vm1952_vm10 = vcmp.gt.f32.partialorder %v1947_v47, 20.0 }
 0x8fc   : > { %4443 = vmatpush3.bf16.msra.mxu1 %v4442_v62  ;;  %v2950_v62 = vld [vmem:[#allocation8 + $0x658] ss:$0 sm:$0xff] }
 0x8fd   : > { %v1949_v50 = vmul.f32 1.442695, %v1948_v49  ;;  %4444 = vmatprep.subr.bf16.mxu1 %v5001_v0 }
 0x8ff   : > { %4738 = vpow2.f32 %v1949_v50  ;;  %v2175_v50 = vld [vmem:[#allocation8 + $0x6a0] sm:$0xff] }
 0x900   : > { %4446 = vmatpush3.bf16.msra.mxu1 %v4445_v63 }
 0x901   : > { %4447 = vmatprep.subr.bf16.mxu1 %v5001_v0 }
 0x904   : > { %4449 = vmatpush3.bf16.msra.mxu1 %v4448_v4 }
 0x905   : > { %4450 = vmatprep.subr.bf16.mxu1 %v5001_v0 }
 0x908   : > { %4452 = vmatpush3.bf16.msra.mxu1 %v4451_v6 }
 0x909   : > { %v4739_v51 = vpop.eup %4738  ;;  %4453 = vmatprep.subr.bf16.mxu1 %v5001_v0 }
 0x90a   : > { %v1951_v52 = vadd.f32 1.0, %v4739_v51  ;;  %v2176_v51 = vld [vmem:[#allocation8 + $0x6a8] sm:$0xff] }
 0x90c   : > { %v1953_v53 = vmul.f32 %v1951_v52, %v1951_v52  ;;  %4455 = vmatpush3.bf16.msra.mxu1 %v4454_v9  ;;  %v4478_v52 = vpack.c.bf16 %v2176_v51, %v2175_v50 }
 0x90d   : > { %4456 = vmatprep.subr.bf16.mxu1 %v5001_v0 }
 0x90e   : > { %v1954_v55 = vadd.f32 1.0, %v1953_v53  ;;  %v2177_v53 = vld [vmem:[#allocation8 + $0x6b0] sm:$0xff] }
 0x910   : > { %4740 = vrcp.f32 %v1954_v55  ;;  %4458 = vmatpush3.bf16.msra.mxu1 %v4457_v12  ;;  %v2178_v55 = vld [vmem:[#allocation8 + $0x6b8] sm:$0xff] }
 0x911   : > { %4459 = vmatprep.subr.bf16.mxu1 %v5001_v0 }
 0x914   : > { %4461 = vmatpush3.bf16.msra.mxu1 %v4460_v15  ;;  %v2272_v15 = vld [vmem:[#allocation8 + $0x6f8] sm:$0xff] }
 0x915   : > { %4462 = vmatprep.subr.bf16.mxu1 %v5001_v0  ;;  %v4493_v17 = vpack.c.bf16 %v2273_v16, %v2272_v15 }
 0x918   : > { %4464 = vmatpush3.bf16.msra.mxu1 %v4463_v18  ;;  %v2274_v18 = vld [vmem:[#allocation8 + $0x708] sm:$0xff] }
 0x919   : > { %4489 = vmatprep.subr.bf16.mxu1 %v5001_v0 }
 0x91a   : > { %v4741_v56 = vpop.eup %4740 }
 0x91b   : > { %v1956_v57 = vmul.f32 2.0, %v4741_v56  ;;  %v4481_v56 = vpack.c.bf16 %v2178_v55, %v2177_v53 }
 0x91d   : > { %v1957_v58 = vsub.f32 1.0, %v1956_v57  ;;  %v2179_v57 = vld [vmem:[#allocation8 + $0x6c0] sm:$0xff] }
 0x91f   : > { %v1958_v59 = vmul.f32 %v1957_v58, %v1947_v47  ;;  %v2180_v58 = vld [vmem:[#allocation8 + $0x6c8] sm:$0xff] }
 0x921   : > { %v1959_v60 = vsel %vm1952_vm10, %v1947_v47, %v1958_v59  ;;  %v2174_v47 = vld [vmem:[#allocation8 + $0x698] sm:$0xff]  ;;  %v4484_v59 = vpack.c.bf16 %v2180_v58, %v2179_v57 }
 0x922   : > { %3754 = vmatmul.mubr.f32.vlgmr.msra.gmra.mrb[14].mxu0 %v1959_v60  ;;  %v4475_v49 = vpack.c.bf16 %v2174_v47, %v2173_v46  ;;  %v2181_v60 = vld [vmem:[#allocation8 + $0x6d0] sm:$0xff]  ;;  %v2374_v57 = vld [vmem:[#allocation8 + $0x778] sm:$0xff] }
 0x923   : > { %3823 = vmatprep.mubr.msk.f32.mxu0 %vm5002_vm0, %v5003_v1  ;;  %4467 = vmatpush3.bf16.msra.mxu0 %v4466_v37  ;;  %v4487_v42 = vpack.c.bf16 %v2182_v61, %v2181_v60  ;;  %v2951_v37 = vld [vmem:[#allocation8 + $0x6e0] ss:$0 sm:$0xff]  ;;  %v2376_v60 = vld [vmem:[#allocation8 + $0x788] sm:$0xff] }
 0x924   : > { %4468 = vmatprep.subr.bf16.mxu0 %v5001_v0 }
 0x927   : > { %4470 = vmatpush3.bf16.msra.mxu0 %v4469_v40 }
 0x928   : > { %4471 = vmatprep.subr.bf16.mxu0 %v5001_v0 }
 0x92b   : > { %4473 = vmatpush3.bf16.msra.mxu0 %v4472_v45 }
 0x92c   : > { %4474 = vmatprep.subr.bf16.mxu0 %v5001_v0 }
 0x92f   : > { %4476 = vmatpush3.bf16.msra.mxu0 %v4475_v49 }
 0x930   : > { %4477 = vmatprep.subr.bf16.mxu0 %v5001_v0 }
 0x933   : > { %4479 = vmatpush3.bf16.msra.mxu0 %v4478_v52 }
 0x934   : > { %4480 = vmatprep.subr.bf16.mxu0 %v5001_v0 }
 0x937   : > { %4482 = vmatpush3.bf16.msra.mxu0 %v4481_v56  ;;  %v2373_v56 = vld [vmem:[#allocation8 + $0x770] sm:$0xff] }
 0x938   : > { %4483 = vmatprep.subr.bf16.mxu0 %v5001_v0  ;;  %v4514_v58 = vpack.c.bf16 %v2374_v57, %v2373_v56  ;;  %v2953_v57 = vld [vmem:[#allocation8 + $0x7f0] ss:$0 sm:$0xff] }
 0x93b   : > { %4485 = vmatpush3.bf16.msra.mxu0 %v4484_v59  ;;  %v2375_v59 = vld [vmem:[#allocation8 + $0x780] sm:$0xff] }
 0x93c   : > { %4486 = vmatprep.subr.bf16.mxu0 %v5001_v0  ;;  %v4517_v61 = vpack.c.bf16 %v2376_v60, %v2375_v59 }
 0x93f   : > { %4488 = vmatpush3.bf16.msra.mxu0 %v4487_v42  ;;  %v2377_v42 = vld [vmem:[#allocation8 + $0x790] sm:$0xff] }
 0x940   : > { %4537 = vmatprep.subr.bf16.mxu0 %v5001_v0 }
 0x9f5   : > { %v2047_v20 = vpop.f32.mrb[14].mxu0 }
 0x9f6   : > { %v2048_v21 = vadd.f32 %v2949_v19, %v2047_v20  ;;  %v3755_v22 = vpop.f32.mrb[15].mxu0  ;;  %v2275_v19 = vld [vmem:[#allocation8 + $0x710] sm:$0xff] }
 0x9f7   : > { %v4496_v20 = vpack.c.bf16 %v2275_v19, %v2274_v18  ;;  %v2277_v22 = vld [vmem:[#allocation8 + $0x720] sm:$0xff] }
 0x9f8   : > { %v2051_v23 = vmin.f32 %v2048_v21, 20.0  ;;  %vm2055_vm11 = vcmp.gt.f32.partialorder %v2048_v21, 20.0 }
 0x9fa   : > { %v2052_v24 = vmul.f32 1.442695, %v2051_v23 }
 0x9fc   : > { %4742 = vpow2.f32 %v2052_v24  ;;  %v2278_v24 = vld [vmem:[#allocation8 + $0x728] sm:$0xff] }
 0xa06   : > { %v4743_v25 = vpop.eup %4742 }
 0xa07   : > { %v2054_v26 = vadd.f32 1.0, %v4743_v25  ;;  %v2279_v25 = vld [vmem:[#allocation8 + $0x730] sm:$0xff] }
 0xa09   : > { %v2056_v54 = vmul.f32 %v2054_v26, %v2054_v26  ;;  %v4502_v26 = vpack.c.bf16 %v2279_v25, %v2278_v24 }
 0xa0b   : > { %v2057_v27 = vadd.f32 1.0, %v2056_v54  ;;  %v2280_v54 = vld [vmem:[#allocation8 + $0x738] sm:$0xff] }
 0xa0d   : > { %4744 = vrcp.f32 %v2057_v27  ;;  %v2281_v27 = vld [vmem:[#allocation8 + $0x740] sm:$0xff] }
 0xa17   : > { %v4745_v28 = vpop.eup %4744 }
 0xa18   : > { %v2059_v30 = vmul.f32 2.0, %v4745_v28  ;;  %v4505_v28 = vpack.c.bf16 %v2281_v27, %v2280_v54  ;;  %v2477_v27 = vld [vmem:[#allocation8 + $0x7f8] sm:$0xff] }
 0xa1a   : > { %v2060_v31 = vsub.f32 1.0, %v2059_v30  ;;  %v2282_v30 = vld [vmem:[#allocation8 + $0x748] sm:$0xff] }
 0xa1c   : > { %v2061_v33 = vmul.f32 %v2060_v31, %v2048_v21  ;;  %v2283_v31 = vld [vmem:[#allocation8 + $0x750] sm:$0xff] }
 0xa1e   : > { %v2062_v34 = vsel %vm2055_vm11, %v2048_v21, %v2061_v33  ;;  %v2276_v21 = vld [vmem:[#allocation8 + $0x718] sm:$0xff]  ;;  %v4508_v33 = vpack.c.bf16 %v2283_v31, %v2282_v30  ;;  %v2479_v31 = vld [vmem:[#allocation8 + $0x808] sm:$0xff] }
 0xa1f   : > { %3789 = vmatmul.mubr.f32.vlgmr.msra.gmra.mrb[12].mxu1 %v2062_v34  ;;  %v4499_v23 = vpack.c.bf16 %v2277_v22, %v2276_v21  ;;  %v2284_v34 = vld [vmem:[#allocation8 + $0x758] sm:$0xff] }
 0xa20   : > { %3858 = vmatprep.mubr.msk.f32.mxu1 %vm5002_vm0, %v5003_v1  ;;  %v4511_v36 = vpack.c.bf16 %v2285_v35, %v2284_v34  ;;  %v2481_v35 = vld [vmem:[#allocation8 + $0x818] sm:$0xff] }
 0xaf2   : > { %v2150_v2 = vpop.f32.mrb[12].mxu1 }
 0xaf3   : > { %v2151_v48 = vadd.f32 %v2950_v62, %v2150_v2  ;;  %v3790_v63 = vpop.f32.mrb[13].mxu1  ;;  %v2378_v62 = vld [vmem:[#allocation8 + $0x798] sm:$0xff] }
 0xaf4   : > { %v4520_v2 = vpack.c.bf16 %v2378_v62, %v2377_v42  ;;  %v2380_v63 = vld [vmem:[#allocation8 + $0x7a8] sm:$0xff] }
 0xaf5   : > { %v2154_v3 = vadd.f32 %v2151_v48, %v5392_v43  ;;  %v2271_v43 = vld [vmem:[#allocation8 + $0x6f0] sm:$0xff]  ;;  %v2379_v48 = vld [vmem:[#allocation8 + $0x7a0] sm:$0xff] }
 0xaf6   : > { %v4490_v14 = vpack.c.bf16 %v2271_v43, %v2270_v13  ;;  %v2952_v43 = vld [vmem:[#allocation8 + $0x768] ss:$0 sm:$0xff] }
 0xaf7   : > { %v2155_v32 = vmin.f32 %v2154_v3, 20.0  ;;  %vm2159_vm12 = vcmp.gt.f32.partialorder %v2154_v3, 20.0 }
 0xaf8   : > { %4491 = vmatpush3.bf16.msra.mxu1 %v4490_v14 }
 0xaf9   : > { %v2156_v4 = vmul.f32 1.442695, %v2155_v32  ;;  %4492 = vmatprep.subr.bf16.mxu1 %v5001_v0  ;;  %v2381_v32 = vld [vmem:[#allocation8 + $0x7b0] sm:$0xff] }
 0xafb   : > { %4746 = vpow2.f32 %v2156_v4  ;;  %v2382_v4 = vld [vmem:[#allocation8 + $0x7b8] sm:$0xff] }
 0xafc   : > { %4494 = vmatpush3.bf16.msra.mxu1 %v4493_v17 }
 0xafd   : > { %4495 = vmatprep.subr.bf16.mxu1 %v5001_v0 }
 0xb00   : > { %4497 = vmatpush3.bf16.msra.mxu1 %v4496_v20 }
 0xb01   : > { %4498 = vmatprep.subr.bf16.mxu1 %v5001_v0 }
 0xb04   : > { %4500 = vmatpush3.bf16.msra.mxu1 %v4499_v23 }
 0xb05   : > { %v4747_v29 = vpop.eup %4746  ;;  %4501 = vmatprep.subr.bf16.mxu1 %v5001_v0 }
 0xb06   : > { %v2158_v5 = vadd.f32 1.0, %v4747_v29  ;;  %v4526_v29 = vpack.c.bf16 %v2382_v4, %v2381_v32 }
 0xb08   : > { %v2160_v6 = vmul.f32 %v2158_v5, %v2158_v5  ;;  %4503 = vmatpush3.bf16.msra.mxu1 %v4502_v26  ;;  %v2383_v5 = vld [vmem:[#allocation8 + $0x7c0] sm:$0xff] }
 0xb09   : > { %4504 = vmatprep.subr.bf16.mxu1 %v5001_v0 }
 0xb0a   : > { %v2161_v7 = vadd.f32 1.0, %v2160_v6  ;;  %v2384_v6 = vld [vmem:[#allocation8 + $0x7c8] sm:$0xff] }
 0xb0c   : > { %4748 = vrcp.f32 %v2161_v7  ;;  %4506 = vmatpush3.bf16.msra.mxu1 %v4505_v28  ;;  %v4529_v7 = vpack.c.bf16 %v2384_v6, %v2383_v5  ;;  %v2478_v28 = vld [vmem:[#allocation8 + $0x800] sm:$0xff] }
 0xb0d   : > { %4507 = vmatprep.subr.bf16.mxu1 %v5001_v0  ;;  %v4538_v30 = vpack.c.bf16 %v2478_v28, %v2477_v27  ;;  %v2580_v6 = vld [vmem:[#allocation8 + $0x880] sm:$0xff]  ;;  %v2954_v27 = vld [vmem:[#allocation8 + $0x878] ss:$0 sm:$0xff] }
 0xb10   : > { %4509 = vmatpush3.bf16.msra.mxu1 %v4508_v33  ;;  %v2480_v33 = vld [vmem:[#allocation8 + $0x810] sm:$0xff] }
 0xb11   : > { %4510 = vmatprep.subr.bf16.mxu1 %v5001_v0  ;;  %v4541_v34 = vpack.c.bf16 %v2480_v33, %v2479_v31 }
 0xb14   : > { %4512 = vmatpush3.bf16.msra.mxu1 %v4511_v36  ;;  %v2482_v36 = vld [vmem:[#allocation8 + $0x820] sm:$0xff] }
 0xb15   : > { %4513 = vmatprep.subr.bf16.mxu1 %v5001_v0 }
 0xb16   : > { %v4749_v8 = vpop.eup %4748 }
 0xb17   : > { %v2163_v9 = vmul.f32 2.0, %v4749_v8  ;;  %v2385_v8 = vld [vmem:[#allocation8 + $0x7d0] sm:$0xff] }
 0xb19   : > { %v2164_v10 = vsub.f32 1.0, %v2163_v9  ;;  %v2386_v9 = vld [vmem:[#allocation8 + $0x7d8] sm:$0xff] }
 0xb1b   : > { %v2165_v11 = vmul.f32 %v2164_v10, %v2154_v3  ;;  %v4532_v10 = vpack.c.bf16 %v2386_v9, %v2385_v8  ;;  %v2582_v9 = vld [vmem:[#allocation8 + $0x890] sm:$0xff] }
 0xb1d   : > { %v2166_v12 = vsel %vm2159_vm12, %v2154_v3, %v2165_v11  ;;  %v4523_v3 = vpack.c.bf16 %v2380_v63, %v2379_v48  ;;  %v2387_v11 = vld [vmem:[#allocation8 + $0x7e0] sm:$0xff] }
 0xb1e   : > { %3824 = vmatmul.mubr.f32.vlgmr.msra.gmra.mrb[16].mxu0 %v2166_v12  ;;  %v2388_v12 = vld [vmem:[#allocation8 + $0x7e8] sm:$0xff] }
 0xb1f   : > { %3928 = vmatprep.mubr.msk.f32.mxu0 %vm5002_vm0, %v5003_v1  ;;  %v4535_v13 = vpack.c.bf16 %v2388_v12, %v2387_v11  ;;  %4539 = vmatpush3.bf16.msra.mxu0 %v4538_v30  ;;  %v2584_v12 = vld [vmem:[#allocation8 + $0x8a0] sm:$0xff] }
 0xb20   : > { %4540 = vmatprep.subr.bf16.mxu0 %v5001_v0 }
 0xb23   : > { %4542 = vmatpush3.bf16.msra.mxu0 %v4541_v34 }
 0xb24   : > { %4543 = vmatprep.subr.bf16.mxu0 %v5001_v0 }
 0xbf1   : > { %v2254_v38 = vpop.f32.mrb[16].mxu0 }
 0xbf2   : > { %v2255_v39 = vadd.f32 %v2951_v37, %v2254_v38  ;;  %v3825_v40 = vpop.f32.mrb[17].mxu0  ;;  %v4544_v37 = vpack.c.bf16 %v2482_v36, %v2481_v35  ;;  %v2483_v38 = vld [vmem:[#allocation8 + $0x828] sm:$0xff] }
 0xbf4   : > { %v2258_v41 = vmin.f32 %v2255_v39, 20.0  ;;  %vm2262_vm13 = vcmp.gt.f32.partialorder %v2255_v39, 20.0  ;;  %4545 = vmatpush3.bf16.msra.mxu0 %v4544_v37 }
 0xbf5   : > { %4546 = vmatprep.subr.bf16.mxu0 %v5001_v0 }
 0xbf6   : > { %v2259_v44 = vmul.f32 1.442695, %v2258_v41  ;;  %v2485_v41 = vld [vmem:[#allocation8 + $0x838] sm:$0xff] }
 0xbf8   : > { %4750 = vpow2.f32 %v2259_v44  ;;  %v2486_v44 = vld [vmem:[#allocation8 + $0x840] sm:$0xff] }
 0xc02   : > { %v4751_v45 = vpop.eup %4750 }
 0xc03   : > { %v2261_v46 = vadd.f32 1.0, %v4751_v45  ;;  %v4550_v45 = vpack.c.bf16 %v2486_v44, %v2485_v41 }
 0xc05   : > { %v2263_v47 = vmul.f32 %v2261_v46, %v2261_v46  ;;  %v2487_v46 = vld [vmem:[#allocation8 + $0x848] sm:$0xff] }
 0xc07   : > { %v2264_v49 = vadd.f32 1.0, %v2263_v47  ;;  %v2488_v47 = vld [vmem:[#allocation8 + $0x850] sm:$0xff] }
 0xc09   : > { %4752 = vrcp.f32 %v2264_v49  ;;  %v4553_v49 = vpack.c.bf16 %v2488_v47, %v2487_v46  ;;  %v2683_v46 = vld [vmem:[#allocation8 + $0x908] sm:$0xff]  ;;  %v2684_v47 = vld [vmem:[#allocation8 + $0x910] sm:$0xff] }
 0xc13   : > { %v4753_v50 = vpop.eup %4752 }
 0xc14   : > { %v2266_v51 = vmul.f32 2.0, %v4753_v50  ;;  %v2489_v50 = vld [vmem:[#allocation8 + $0x858] sm:$0xff] }
 0xc16   : > { %v2267_v52 = vsub.f32 1.0, %v2266_v51  ;;  %v2490_v51 = vld [vmem:[#allocation8 + $0x860] sm:$0xff] }
 0xc18   : > { %v2268_v53 = vmul.f32 %v2267_v52, %v2255_v39  ;;  %v4556_v52 = vpack.c.bf16 %v2490_v51, %v2489_v50  ;;  %v2685_v50 = vld [vmem:[#allocation8 + $0x918] sm:$0xff]  ;;  %v2686_v51 = vld [vmem:[#allocation8 + $0x920] sm:$0xff] }
 0xc1a   : > { %v2269_v55 = vsel %vm2262_vm13, %v2255_v39, %v2268_v53  ;;  %v2484_v39 = vld [vmem:[#allocation8 + $0x830] sm:$0xff]  ;;  %v2491_v53 = vld [vmem:[#allocation8 + $0x868] sm:$0xff] }
 0xc1b   : > { %3859 = vmatmul.mubr.f32.vlgmr.msra.gmra.mrb[14].mxu1 %v2269_v55  ;;  %v4547_v40 = vpack.c.bf16 %v2484_v39, %v2483_v38  ;;  %v2492_v55 = vld [vmem:[#allocation8 + $0x870] sm:$0xff] }
 0xc1c   : > { %3893 = vmatprep.mubr.msk.f32.mxu1 %vm5002_vm0, %v5003_v1  ;;  %4515 = vmatpush3.bf16.msra.mxu1 %v4514_v58  ;;  %v4559_v56 = vpack.c.bf16 %v2492_v55, %v2491_v53  ;;  %v2687_v53 = vld [vmem:[#allocation8 + $0x928] sm:$0xff]  ;;  %v2688_v55 = vld [vmem:[#allocation8 + $0x930] sm:$0xff] }
 0xc1d   : > { %4516 = vmatprep.subr.bf16.mxu1 %v5001_v0  ;;  %4548 = vmatpush3.bf16.msra.mxu0 %v4547_v40 }
 0xc1e   : > { %4549 = vmatprep.subr.bf16.mxu0 %v5001_v0 }
 0xc20   : > { %4518 = vmatpush3.bf16.msra.mxu1 %v4517_v61 }
 0xc21   : > { %4519 = vmatprep.subr.bf16.mxu1 %v5001_v0  ;;  %4551 = vmatpush3.bf16.msra.mxu0 %v4550_v45 }
 0xc22   : > { %4552 = vmatprep.subr.bf16.mxu0 %v5001_v0 }
 0xc24   : > { %4521 = vmatpush3.bf16.msra.mxu1 %v4520_v2 }
 0xc25   : > { %4522 = vmatprep.subr.bf16.mxu1 %v5001_v0  ;;  %4554 = vmatpush3.bf16.msra.mxu0 %v4553_v49  ;;  %v4586_v49 = vpack.c.bf16 %v2684_v47, %v2683_v46 }
 0xc26   : > { %4555 = vmatprep.subr.bf16.mxu0 %v5001_v0 }
 0xc28   : > { %4524 = vmatpush3.bf16.msra.mxu1 %v4523_v3 }
 0xc29   : > { %4525 = vmatprep.subr.bf16.mxu1 %v5001_v0  ;;  %4557 = vmatpush3.bf16.msra.mxu0 %v4556_v52  ;;  %v4589_v52 = vpack.c.bf16 %v2686_v51, %v2685_v50 }
 0xc2a   : > { %4558 = vmatprep.subr.bf16.mxu0 %v5001_v0 }
 0xc2c   : > { %4527 = vmatpush3.bf16.msra.mxu1 %v4526_v29 }
 0xc2d   : > { %4528 = vmatprep.subr.bf16.mxu1 %v5001_v0  ;;  %4560 = vmatpush3.bf16.msra.mxu0 %v4559_v56  ;;  %v4592_v56 = vpack.c.bf16 %v2688_v55, %v2687_v53 }
 0xc2e   : > { %4561 = vmatprep.subr.bf16.mxu0 %v5001_v0 }
 0xc30   : > { %4530 = vmatpush3.bf16.msra.mxu1 %v4529_v7  ;;  %v2581_v7 = vld [vmem:[#allocation8 + $0x888] sm:$0xff] }
 0xc31   : > { %4531 = vmatprep.subr.bf16.mxu1 %v5001_v0  ;;  %v4562_v8 = vpack.c.bf16 %v2581_v7, %v2580_v6  ;;  %v2955_v6 = vld [vmem:[#allocation8 + $0x900] ss:$0 sm:$0xff] }
 0xc34   : > { %4533 = vmatpush3.bf16.msra.mxu1 %v4532_v10  ;;  %v2583_v10 = vld [vmem:[#allocation8 + $0x898] sm:$0xff] }
 0xc35   : > { %4534 = vmatprep.subr.bf16.mxu1 %v5001_v0  ;;  %v4565_v11 = vpack.c.bf16 %v2583_v10, %v2582_v9 }
 0xc38   : > { %4536 = vmatpush3.bf16.msra.mxu1 %v4535_v13  ;;  %v2585_v13 = vld [vmem:[#allocation8 + $0x8a8] sm:$0xff] }
 0xc39   : > { %4585 = vmatprep.subr.bf16.mxu1 %v5001_v0 }
 0xcee   : > { %v2357_v14 = vpop.f32.mrb[14].mxu1 }
 0xcef   : > { %v2358_v15 = vadd.f32 %v2952_v43, %v2357_v14  ;;  %v3860_v16 = vpop.f32.mrb[15].mxu1  ;;  %v4568_v43 = vpack.c.bf16 %v2585_v13, %v2584_v12  ;;  %v2586_v14 = vld [vmem:[#allocation8 + $0x8b0] sm:$0xff] }
 0xcf0   : > { %v2588_v16 = vld [vmem:[#allocation8 + $0x8c0] sm:$0xff] }
 0xcf1   : > { %v2361_v17 = vmin.f32 %v2358_v15, 20.0  ;;  %vm2365_vm14 = vcmp.gt.f32.partialorder %v2358_v15, 20.0 }
 0xcf3   : > { %v2362_v18 = vmul.f32 1.442695, %v2361_v17  ;;  %v2589_v17 = vld [vmem:[#allocation8 + $0x8c8] sm:$0xff] }
 0xcf5   : > { %4754 = vpow2.f32 %v2362_v18  ;;  %v4574_v18 = vpack.c.bf16 %v2589_v17, %v2588_v16 }
 0xcff   : > { %v4755_v19 = vpop.eup %4754 }
 0xd00   : > { %v2364_v20 = vadd.f32 1.0, %v4755_v19  ;;  %v2590_v19 = vld [vmem:[#allocation8 + $0x8d0] sm:$0xff] }
 0xd02   : > { %v2366_v21 = vmul.f32 %v2364_v20, %v2364_v20  ;;  %v2591_v20 = vld [vmem:[#allocation8 + $0x8d8] sm:$0xff] }
 0xd04   : > { %v2367_v22 = vadd.f32 1.0, %v2366_v21  ;;  %v4577_v21 = vpack.c.bf16 %v2591_v20, %v2590_v19 }
 0xd06   : > { %4756 = vrcp.f32 %v2367_v22  ;;  %v2592_v22 = vld [vmem:[#allocation8 + $0x8e0] sm:$0xff] }
 0xd10   : > { %v4757_v23 = vpop.eup %4756 }
 0xd11   : > { %v2369_v24 = vmul.f32 2.0, %v4757_v23  ;;  %v2593_v23 = vld [vmem:[#allocation8 + $0x8e8] sm:$0xff] }
 0xd13   : > { %v2370_v25 = vsub.f32 1.0, %v2369_v24  ;;  %v4580_v24 = vpack.c.bf16 %v2593_v23, %v2592_v22 }
 0xd15   : > { %v2371_v26 = vmul.f32 %v2370_v25, %v2358_v15  ;;  %v2594_v25 = vld [vmem:[#allocation8 + $0x8f0] sm:$0xff] }
 0xd17   : > { %v2372_v54 = vsel %vm2365_vm14, %v2358_v15, %v2371_v26  ;;  %v2595_v26 = vld [vmem:[#allocation8 + $0x8f8] sm:$0xff] }
 0xd18   : > { %3894 = vmatmul.mubr.f32.vlgmr.msra.gmra.mrb[4].mxu1 %v2372_v54  ;;  %v4583_v54 = vpack.c.bf16 %v2595_v26, %v2594_v25 }
 0xd19   : > { %3998 = vmatprep.mubr.msk.f32.mxu1 %vm5002_vm0, %v5003_v1  ;;  %4587 = vmatpush3.bf16.msra.mxu1 %v4586_v49 }
 0xd1a   : > { %4588 = vmatprep.subr.bf16.mxu1 %v5001_v0 }
 0xd1d   : > { %4590 = vmatpush3.bf16.msra.mxu1 %v4589_v52 }
 0xd1e   : > { %4591 = vmatprep.subr.bf16.mxu1 %v5001_v0 }
 0xd21   : > { %4593 = vmatpush3.bf16.msra.mxu1 %v4592_v56 }
 0xd22   : > { %4594 = vmatprep.subr.bf16.mxu1 %v5001_v0 }
 0xdeb   : > { %v2460_v58 = vpop.f32.mrb[4].mxu1 }
 0xdec   : > { %v2461_v59 = vadd.f32 %v2953_v57, %v2460_v58  ;;  %v3895_v60 = vpop.f32.mrb[5].mxu1  ;;  %v2689_v57 = vld [vmem:[#allocation8 + $0x938] sm:$0xff]  ;;  %v2690_v58 = vld [vmem:[#allocation8 + $0x940] sm:$0xff] }
 0xded   : > { %v2691_v60 = vld [vmem:[#allocation8 + $0x948] sm:$0xff] }
 0xdee   : > { %v2465_v61 = vmin.f32 %v2461_v59, 20.0  ;;  %vm2469_vm15 = vcmp.gt.f32.partialorder %v2461_v59, 20.0 }
 0xdf0   : > { %v2466_v42 = vmul.f32 1.442695, %v2465_v61  ;;  %v2692_v61 = vld [vmem:[#allocation8 + $0x950] sm:$0xff] }
 0xdf2   : > { %4758 = vpow2.f32 %v2466_v42  ;;  %v4598_v42 = vpack.c.bf16 %v2692_v61, %v2691_v60 }
 0xdfc   : > { %v4759_v62 = vpop.eup %4758 }
 0xdfd   : > { %v2468_v2 = vadd.f32 1.0, %v4759_v62  ;;  %v2693_v62 = vld [vmem:[#allocation8 + $0x958] sm:$0xff] }
 0xdff   : > { %v2470_v48 = vmul.f32 %v2468_v2, %v2468_v2  ;;  %v2694_v2 = vld [vmem:[#allocation8 + $0x960] sm:$0xff] }
 0xe01   : > { %v2471_v63 = vadd.f32 1.0, %v2470_v48  ;;  %v4601_v48 = vpack.c.bf16 %v2694_v2, %v2693_v62 }
 0xe03   : > { %4760 = vrcp.f32 %v2471_v63  ;;  %v2695_v63 = vld [vmem:[#allocation8 + $0x968] sm:$0xff] }
 0xe0d   : > { %v4761_v3 = vpop.eup %4760 }
 0xe0e   : > { %v2473_v32 = vmul.f32 2.0, %v4761_v3  ;;  %v2696_v3 = vld [vmem:[#allocation8 + $0x970] sm:$0xff] }
 0xe10   : > { %v2474_v4 = vsub.f32 1.0, %v2473_v32  ;;  %v4604_v32 = vpack.c.bf16 %v2696_v3, %v2695_v63 }
 0xe12   : > { %v2475_v29 = vmul.f32 %v2474_v4, %v2461_v59  ;;  %v2697_v4 = vld [vmem:[#allocation8 + $0x978] sm:$0xff] }
 0xe14   : > { %v2476_v5 = vsel %vm2469_vm15, %v2461_v59, %v2475_v29  ;;  %v4595_v59 = vpack.c.bf16 %v2690_v58, %v2689_v57  ;;  %v2698_v29 = vld [vmem:[#allocation8 + $0x980] sm:$0xff] }
 0xe15   : > { %3929 = vmatmul.mubr.f32.vlgmr.msra.gmra.mrb[18].mxu0 %v2476_v5  ;;  %v4607_v5 = vpack.c.bf16 %v2698_v29, %v2697_v4 }
 0xe16   : > { %3963 = vmatprep.mubr.msk.f32.mxu0 %vm5002_vm0, %v5003_v1  ;;  %4563 = vmatpush3.bf16.msra.mxu0 %v4562_v8  ;;  %v2587_v1 = vld [vmem:[#allocation8 + $0x8b8] sm:$0xff] }
 0xe17   : > { %4564 = vmatprep.subr.bf16.mxu0 %v5001_v0  ;;  %v4571_v15 = vpack.c.bf16 %v2587_v1, %v2586_v14  ;;  %4596 = vmatpush3.bf16.msra.mxu1 %v4595_v59 }
 0xe18   : > { %4597 = vmatprep.subr.bf16.mxu1 %v5001_v0 }
 0xe1a   : > { %4566 = vmatpush3.bf16.msra.mxu0 %v4565_v11 }
 0xe1b   : > { %4567 = vmatprep.subr.bf16.mxu0 %v5001_v0  ;;  %4599 = vmatpush3.bf16.msra.mxu1 %v4598_v42 }
 0xe1c   : > { %4600 = vmatprep.subr.bf16.mxu1 %v5001_v0 }
 0xe1e   : > { %4569 = vmatpush3.bf16.msra.mxu0 %v4568_v43 }
 0xe1f   : > { %4570 = vmatprep.subr.bf16.mxu0 %v5001_v0  ;;  %4602 = vmatpush3.bf16.msra.mxu1 %v4601_v48 }
 0xe20   : > { %4603 = vmatprep.subr.bf16.mxu1 %v5001_v0 }
 0xe22   : > { %4572 = vmatpush3.bf16.msra.mxu0 %v4571_v15 }
 0xe23   : > { %4573 = vmatprep.subr.bf16.mxu0 %v5001_v0  ;;  %4605 = vmatpush3.bf16.msra.mxu1 %v4604_v32 }
 0xe24   : > { %4606 = vmatprep.subr.bf16.mxu1 %v5001_v0 }
 0xe26   : > { %4575 = vmatpush3.bf16.msra.mxu0 %v4574_v18  ;;  %v2956_v18 = vld [vmem:[#allocation8 + $0x988] ss:$0 sm:$0xff] }
 0xe27   : > { %4576 = vmatprep.subr.bf16.mxu0 %v5001_v0  ;;  %4608 = vmatpush3.bf16.msra.mxu1 %v4607_v5 }
 0xe2a   : > { %4578 = vmatpush3.bf16.msra.mxu0 %v4577_v21 }
 0xe2b   : > { %4579 = vmatprep.subr.bf16.mxu0 %v5001_v0 }
 0xe2e   : > { %4581 = vmatpush3.bf16.msra.mxu0 %v4580_v24 }
 0xe2f   : > { %4582 = vmatprep.subr.bf16.mxu0 %v5001_v0 }
 0xe32   : > { %4584 = vmatpush3.bf16.msra.mxu0 %v4583_v54 }
 0xee8   : > { %v2564_v28 = vpop.f32.mrb[18].mxu0 }
 0xee9   : > { %v2565_v30 = vadd.f32 %v2954_v27, %v2564_v28  ;;  %v3930_v31 = vpop.f32.mrb[19].mxu0 }
 0xeeb   : > { %v2568_v33 = vmin.f32 %v2565_v30, 20.0  ;;  %vm2572_vm0 = vcmp.gt.f32.partialorder %v2565_v30, 20.0 }
 0xeed   : > { %v2569_v34 = vmul.f32 1.442695, %v2568_v33 }
 0xeef   : > { %4762 = vpow2.f32 %v2569_v34 }
 0xef9   : > { %v4763_v35 = vpop.eup %4762 }
 0xefa   : > { %v2571_v36 = vadd.f32 1.0, %v4763_v35 }
 0xefc   : > { %v2573_v37 = vmul.f32 %v2571_v36, %v2571_v36 }
 0xefe   : > { %v2574_v38 = vadd.f32 1.0, %v2573_v37 }
 0xf00   : > { %4764 = vrcp.f32 %v2574_v38 }
 0xf0a   : > { %v4765_v39 = vpop.eup %4764 }
 0xf0b   : > { %v2576_v40 = vmul.f32 2.0, %v4765_v39 }
 0xf0d   : > { %v2577_v41 = vsub.f32 1.0, %v2576_v40 }
 0xf0f   : > { %v2578_v44 = vmul.f32 %v2577_v41, %v2565_v30 }
 0xf11   : > { %v2579_v45 = vsel %vm2572_vm0, %v2565_v30, %v2578_v44 }
 0xf12   : > { %3964 = vmatmul.mubr.f32.vlgmr.msra.gmra.mrb[20].mxu0 %v2579_v45 }
 0xfe5   : > { %v2667_v7 = vpop.f32.mrb[20].mxu0 }
 0xfe6   : > { %v2668_v8 = vadd.f32 %v2955_v6, %v2667_v7  ;;  %v3965_v9 = vpop.f32.mrb[21].mxu0 }
 0xfe8   : > { %v2671_v10 = vmin.f32 %v2668_v8, 20.0  ;;  %vm2675_vm1 = vcmp.gt.f32.partialorder %v2668_v8, 20.0 }
 0xfea   : > { %v2672_v11 = vmul.f32 1.442695, %v2671_v10 }
 0xfec   : > { %4766 = vpow2.f32 %v2672_v11 }
 0xff6   : > { %v4767_v12 = vpop.eup %4766 }
 0xff7   : > { %v2674_v13 = vadd.f32 1.0, %v4767_v12 }
 0xff9   : > { %v2676_v43 = vmul.f32 %v2674_v13, %v2674_v13 }
 0xffb   : > { %v2677_v14 = vadd.f32 1.0, %v2676_v43 }
 0xffd   : > { %4768 = vrcp.f32 %v2677_v14 }
0x1007   : > { %v4769_v1 = vpop.eup %4768 }
0x1008   : > { %v2679_v15 = vmul.f32 2.0, %v4769_v1 }
0x100a   : > { %v2680_v16 = vsub.f32 1.0, %v2679_v15 }
0x100c   : > { %v2681_v0 = vmul.f32 %v2680_v16, %v2668_v8 }
0x100e   : > { %v2682_v17 = vsel %vm2675_vm1, %v2668_v8, %v2681_v0 }
0x100f   : > { %3999 = vmatmul.mubr.f32.vlgmr.msra.gmra.mrb[16].mxu1 %v2682_v17 }
0x10e2   : > { %v2770_v19 = vpop.f32.mrb[16].mxu1 }
0x10e3   : > { %v2771_v20 = vadd.f32 %v2956_v18, %v2770_v19  ;;  %v4000_v21 = vpop.f32.mrb[17].mxu1 }
0x10e5   : > { %2774 = vst [vmem:[%s339_s23] sm:$0xff] %v2771_v20 }
0x10e6   : > { %4929 = shalt.err (!%p4926_p2)
}
0x10e7   : > { %s4930_s12 = scalar_lea.hbm %s5530_s10, 128  ;;  %s4934_s27 = scalar_lea.hbm %s5579_s5, 256 }
0x10e8   : > { %p4931_p5 = scmp.ne.s32.totalorder %s5530_s10, %s4930_s12  ;;  %p4935_p0 = scmp.lt.u32.totalorder %s5530_s10, %s5579_s5 }
0x10e9   : > { %p4936_p7 = scmp.lt.u32.totalorder %s4934_s27, %s4930_s12  ;;  %p4938_p6 = scmp.lt.u32.totalorder %s4930_s12, %s5530_s10 }
0x10ea   : > { %p4932_p12 = pnand %p4931_p5, %p5621_p10 }
0x10eb   : > { %p4937_p1 = por %p4936_p7, %p4935_p0 }
0x10ec   : > { %p4933_p3 = pneg %p4932_p12 }
0x10ed   : > { %p4939_p8 = por %p4938_p6, %p4937_p1 }
0x10ef   : > { %p4940_p9 = pnand %p4939_p8, %p4933_p3 }
0x10f1   : > { %4943 = shalt.err (!%p4940_p9)
}
0x10f2   : > { %4632 = dma.vmem_to_hbm [thread:$0]  (%p5621_p10), %s5532_s1, 128, %s5530_s10, %s2776_s30  }
0x10f3 PF: > { %s5622_s14 = sld [smem:[#allocation16_spill]]  ;;  %s2801_s26 = sand.u32 1, %s4978_s18  }
0x10f4   : > { %p5623_p11 = scmp.ne.s32.totalorder %s5599_s25, 0  ;;  %s2802_s28 = scalar_lea.sflag [#allocation4], %s2801_s26 }
0x10f9   : > { %p5624_p4 = scmp.ge.s32.totalorder %s5622_s14, 2 }
0x10fb   : > { %p4652_p13 = pnand %p5624_p4, %p5623_p11 }
0x10fd   : > { %4973 = dma.done.wait (!%p4652_p13), %s2802_s28, 128  }
0x10fe   : > { %4975 = vsyncadd (!%p4652_p13), %s2802_s28, 4294967168  ;;  %s5625_s21 = sld [smem:[#allocation17_spill]]  ;;  %s5626_s17 = sld [smem:[#allocation18_spill]] }
0x10ff   : > { %s5627_s18 = smov %s4982_s19  ;;  %s5628_s19 = smov %s4986_s20 }
0x1104   : > { %p22_p2 = scmp.ge.s32.totalorder %s5625_s21, 4   ;;  %s5629_s20 = smov %s5626_s17 }
0x1106   :  { %24 = sbr.rel (!%p22_p2) target bundleno = 11 (0xb), region = 117 }
0x110d   :  { %2807 = vsyncpa [#allocation3], 1 }
0x110e   :  { %2809 = vsyncpa [#allocation3 + $0x1], 1 }
0x110f   :  { %2810 = vsyncpa [#allocation6], 1 }
0x1110   :  { %2812 = vsyncpa [#allocation6 + $0x1], 1 }
0x1111   :  { %2813 = vsyncpa [#allocation9], 1 }
0x1112   :  { %2814 = vsyncpa [#allocation4], 1 }
0x1113   :  { %2816 = vsyncpa [#allocation4 + $0x1], 1 }

</bundles_post_ra>
